<compile_context>
chip_gen: v6e
topology: v6e:2x2x1
jax: 0.10.0
libtpu: 0.0.40
codegen_flags: <defaults>
</compile_context>

<pallas_src>
import functools

import jax
import jax.numpy as jnp
from jax.experimental import pallas as pl
from jax.experimental.pallas import tpu as pltpu

LANE = 128
SUBLANE = 8


def _round_up(x, m):
    return (x + m - 1) // m * m


@functools.lru_cache(maxsize=1)
def _vmem_limit_bytes():
    """Scoped-VMEM budget: ~1/2 of physical VMEM (64MB on v5e/v6e, 32MB v7x)."""
    try:
        cap = getattr(pltpu.get_tpu_info(), "vmem_capacity_bytes", None)
        if cap:
            return int(min(cap // 2, 64 * 1024 * 1024))
    except Exception:
        pass
    return 32 * 1024 * 1024


# ---------------------------------------------------------------------------
# Generic fused conv kernel: grouped shifted-slab taps -> MXU matmuls,
# fused bias (+ residual) (+ ReLU); output either in "natural" flat layout or
# directly in the next conv's zero-padded slab layout.
# ---------------------------------------------------------------------------
def _make_conv_kernel(tap_groups, group_size, cin_p, q, apply_relu,
                      has_residual, res_offset, out_shift, wp, w_valid,
                      out_is_slab):
    def kernel(*refs):
        x_ref, w_ref, b_ref = refs[0], refs[1], refs[2]
        pos = 3
        r_ref = None
        if has_residual:
            r_ref = refs[pos]
            pos += 1
        o_ref = refs[pos]
        pos += 1
        slab_ref = refs[pos] if group_size > 1 else None

        tc = o_ref.shape[-1]
        acc = jnp.zeros((q, tc), jnp.float32)
        for g, taps in enumerate(tap_groups):
            if group_size == 1:
                ph, off = taps[0]
                x_tap = x_ref[0, ph, pl.ds(off, q), :]
                acc = acc + jnp.dot(x_tap, w_ref[g],
                                    preferred_element_type=jnp.float32)
            else:
                # Merge the taps of this group into one K = group_size*Cin slab
                # (higher MXU depth fill, fewer f32 accumulate adds).
                for j, (ph, off) in enumerate(taps):
                    slab_ref[:, j * cin_p:(j + 1) * cin_p] = (
                        x_ref[0, ph, pl.ds(off, q), :])
                acc = acc + jnp.dot(slab_ref[...], w_ref[g],
                                    preferred_element_type=jnp.float32)

        y = acc + b_ref[...]                               # folded-BN bias
        if has_residual:
            y = y + r_ref[0, pl.ds(res_offset, q), :].astype(jnp.float32)
        if apply_relu:
            y = jnp.maximum(y, 0.0)

        if out_is_slab:
            # Emit directly in the next conv's zero-padded flat layout:
            # junk columns -> 0, halo rows -> 0, valid rows shifted by wp+1.
            row = jax.lax.broadcasted_iota(jnp.int32, (q, tc), 0)
            y = jnp.where((row % wp) < w_valid, y, 0.0)
            o_ref[...] = jnp.zeros_like(o_ref)
            o_ref[0, pl.ds(out_shift, q), :] = y.astype(o_ref.dtype)
        else:
            o_ref[0] = y.astype(o_ref.dtype)

    return kernel


def _fused_conv(x_slab, w_groups, bias, taps, *, q, wp, w_valid,
                residual=None, res_offset=0, apply_relu=True,
                out_rows=None, out_shift=0, out_dtype=jnp.float32):
    """Fused conv over flat padded slab(s).

    x_slab:   (N, NPH, P_in, Cin_p) bf16 flat zero-padded activation slab(s)
    w_groups: (G, group_size*Cin_p, Cout_p) bf16 (BN scale folded in)
    bias:     (1, Cout_p) f32
    taps:     list[G] of list[group_size] of (phase_idx, flat row offset)
    residual: optional (N, P_r, Cout_p), added before ReLU (read at res_offset)
    out:      (N, q, Cout_p) "natural" layout, or if out_rows is given,
              (N, out_rows, Cout_p) zero-padded slab layout shifted by out_shift.
    """
    n, nph, p_in, cin_p = x_slab.shape
    n_groups, kg, cout_p = w_groups.shape
    group_size = len(taps[0])
    assert kg == group_size * cin_p
    tc = 256 if cout_p % 256 == 0 else 128
    out_is_slab = out_rows is not None
    rows = out_rows if out_is_slab else q

    inputs = [x_slab, w_groups, bias]
    in_specs = [
        pl.BlockSpec((1, nph, p_in, cin_p), lambda i, c: (i, 0, 0, 0)),
        pl.BlockSpec((n_groups, kg, tc), lambda i, c: (0, 0, c)),
        pl.BlockSpec((1, tc), lambda i, c: (0, c)),
    ]
    if residual is not None:
        p_res = residual.shape[1]
        inputs.append(residual)
        in_specs.append(pl.BlockSpec((1, p_res, tc), lambda i, c: (i, 0, c)))

    scratch = []
    if group_size > 1:
        scratch.append(pltpu.VMEM((q, group_size * cin_p), jnp.bfloat16))

    taps_total = n_groups * group_size
    flops = 2 * n * q * taps_total * cin_p * cout_p
    bytes_accessed = (x_slab.size * x_slab.dtype.itemsize
                      + w_groups.size * 2 + bias.size * 4
                      + (residual.size * residual.dtype.itemsize
                         if residual is not None else 0)
                      + n * rows * cout_p * jnp.dtype(out_dtype).itemsize)

    kernel = _make_conv_kernel(
        taps, group_size, cin_p, q, apply_relu, residual is not None,
        res_offset, out_shift, wp, w_valid, out_is_slab)

    return pl.pallas_call(
        kernel,
        out_shape=jax.ShapeDtypeStruct((n, rows, cout_p), out_dtype),
        grid=(n, cout_p // tc),
        in_specs=in_specs,
        out_specs=pl.BlockSpec((1, rows, tc), lambda i, c: (i, 0, c)),
        scratch_shapes=scratch,
        compiler_params=pltpu.CompilerParams(
            dimension_semantics=("parallel", "parallel"),
            vmem_limit_bytes=_vmem_limit_bytes()),
        cost_estimate=pl.CostEstimate(flops=flops, transcendentals=0,
                                      bytes_accessed=bytes_accessed),
    )(*inputs)


# ---------------------------------------------------------------------------
# XLA-side layout prep (input conditioning only; nothing between the convs).
# ---------------------------------------------------------------------------
def _slab_stride1(x_nhwc, cin_p, wp):
    """Flat zero-padded layout: x[n,h,w,:] sits at flat row (h+1)*wp+(w+1)."""
    n, h, w, c = x_nhwc.shape
    xp = jnp.pad(x_nhwc.astype(jnp.bfloat16),
                 ((0, 0), (1, 2), (1, wp - w - 1), (0, cin_p - c)))
    return xp.reshape(n, 1, (h + 3) * wp, cin_p)


def _phase_slabs_stride2(x_nhwc, cin_p, wp, ho, wo):
    """4 stride-2 phase images, flat-padded: phase (a,b) holds
    x[n, 2i+a, 2j+b, :] at flat row (i+1)*wp + (j+1) of slab index a*2+b."""
    n, h, w, c = x_nhwc.shape
    xb = x_nhwc.astype(jnp.bfloat16)
    slabs = []
    for a in (0, 1):
        for b in (0, 1):
            ph = xb[:, a::2, b::2, :]
            hp, wpp = ph.shape[1], ph.shape[2]
            ph = jnp.pad(ph, ((0, 0), (1, ho + 1 - hp), (1, wp - 1 - wpp),
                              (0, cin_p - c)))
            slabs.append(ph.reshape(n, (ho + 2) * wp, cin_p))
    return jnp.stack(slabs, axis=1)


def _taps_3x3(stride, wp):
    """(phase, flat row offset) per tap, grouped by kh; plus matching (kh,kw)."""
    tap_groups, kk_groups = [], []
    for kh in range(3):
        tg, kg = [], []
        for kw in range(3):
            if stride == 1:
                tg.append((0, kh * wp + kw))
            else:  # stride 2: 2x2 phase decomposition
                phase = ((kh + 1) % 2) * 2 + ((kw + 1) % 2)
                off = (0 if kh == 0 else 1) * wp + (0 if kw == 0 else 1)
                tg.append((phase, off))
            kg.append((kh, kw))
        tap_groups.append(tg)
        kk_groups.append(kg)
    return tap_groups, kk_groups


def _weight_groups_3x3(w_oihw, scale, cin_p, cout_p, kk_groups):
    cout, cin = w_oihw.shape[0], w_oihw.shape[1]
    w = jnp.transpose(w_oihw, (2, 3, 1, 0)) * scale            # (3,3,Cin,Cout)
    w = jnp.pad(w, ((0, 0), (0, 0), (0, cin_p - cin), (0, cout_p - cout)))
    groups = [jnp.concatenate([w[kh, kw] for kh, kw in grp], axis=0)
              for grp in kk_groups]
    return jnp.stack(groups, axis=0).astype(jnp.bfloat16)      # (3,3*Cin_p,Cout_p)


def _weight_1x1(w_oi11, scale, cin_p, cout_p):
    cout, cin = w_oi11.shape[0], w_oi11.shape[1]
    w = w_oi11[:, :, 0, 0].T * scale                            # (Cin, Cout)
    w = jnp.pad(w, ((0, cin_p - cin), (0, cout_p - cout)))
    return w[None].astype(jnp.bfloat16)                         # (1,Cin_p,Cout_p)


def _fold_bn(gamma, beta, mean, var, eps=1e-5):
    scale = gamma / jnp.sqrt(var + eps)
    return scale, beta - mean * scale


def _pad_bias(bias, cout_p):
    b = jnp.pad(bias.astype(jnp.float32), (0, cout_p - bias.shape[0]))
    return b.reshape(1, cout_p)


def _bn_params(planes, offset):
    i = jnp.arange(planes, dtype=jnp.float32)
    return dict(gamma=1.0 + 0.01 * (i + offset), beta=0.01 * (i + offset),
                mean=0.02 * (i - offset), var=1.0 + 0.05 * i)


def init_basic_block_params(key, in_planes, planes, stride):
    k1, k2, k3 = jax.random.split(key, 3)
    params = {
        "w1": 0.1 * jax.random.normal(k1, (planes, in_planes, 3, 3), jnp.float32),
        "bn1": _bn_params(planes, 0.0),
        "w2": 0.1 * jax.random.normal(k2, (planes, planes, 3, 3), jnp.float32),
        "bn2": _bn_params(planes, 1.0),
    }
    if stride != 1 or in_planes != planes:
        # Reference module builds this only for stride != 1; also build it for
        # a channel mismatch since identity addition is ill-defined otherwise.
        params["w_sc"] = 0.1 * jax.random.normal(
            k3, (planes, in_planes, 1, 1), jnp.float32)
        params["bn_sc"] = _bn_params(planes, 2.0)
    return params


# ---------------------------------------------------------------------------
# BasicBlock forward
# ---------------------------------------------------------------------------
def basic_block_forward(params, x_nchw, stride):
    assert stride in (1, 2), "TODO(synk): only stride 1 and 2 are supported"
    x = jnp.transpose(x_nchw, (0, 2, 3, 1))                    # NCHW -> NHWC
    n, h, w, in_planes = x.shape
    planes = params["w1"].shape[0]

    ho = (h - 1) // stride + 1
    wo = (w - 1) // stride + 1
    wp = _round_up(wo + 2, SUBLANE)        # sublane-aligned flat row pitch
    cin_p = _round_up(in_planes, LANE)
    cp = _round_up(planes, LANE)
    q = ho * wp                            # natural output rows per image
    p_out1 = (ho + 3) * wp                 # conv2-input slab rows

    s1, b1 = _fold_bn(**params["bn1"])
    s2, b2 = _fold_bn(**params["bn2"])

    # -- input conditioning (single XLA prep pass) --
    if stride == 1:
        x_slab = _slab_stride1(x, cin_p, wp)                   # (n,1,(h+3)wp,Cin_p)
    else:
        x_slab = _phase_slabs_stride2(x, cin_p, wp, ho, wo)    # (n,4,(ho+2)wp,Cin_p)

    # -- conv1 (3x3, stride) + bn1 + relu -> bf16 slab in conv2's layout --
    taps1, kk1 = _taps_3x3(stride, wp)
    w1 = _weight_groups_3x3(params["w1"], s1, cin_p, cp, kk1)
    out1_slab = _fused_conv(
        x_slab, w1, _pad_bias(b1, cp), taps1,
        q=q, wp=wp, w_valid=wo, apply_relu=True,
        out_rows=p_out1, out_shift=wp + 1, out_dtype=jnp.bfloat16)
    out1_slab = out1_slab.reshape(n, 1, p_out1, cp)

    # -- shortcut --
    if "w_sc" in params:
        ssc, bsc = _fold_bn(**params["bn_sc"])
        wsc = _weight_1x1(params["w_sc"], ssc, cin_p, cp)
        # 1x1 projection: single tap reading the (even,even) phase / valid data
        # -> the strided subsampling is fused into the kernel's tap read.
        residual = _fused_conv(
            x_slab, wsc, _pad_bias(bsc, cp), [[(0, wp + 1)]],
            q=q, wp=wp, w_valid=wo, apply_relu=False,
            out_dtype=jnp.bfloat16)                            # (n, q, cp)
        res_offset = 0
    else:
        # identity (stride==1, in_planes==planes): reuse the input slab as-is.
        residual = x_slab.reshape(n, (h + 3) * wp, cin_p)
        res_offset = wp + 1

    # -- conv2 (3x3, stride 1) + bn2 + residual add + relu (single kernel) --
    taps2, kk2 = _taps_3x3(1, wp)
    w2 = _weight_groups_3x3(params["w2"], s2, cp, cp, kk2)
    out = _fused_conv(
        out1_slab, w2, _pad_bias(b2, cp), taps2,
        q=q, wp=wp, w_valid=wo,
        residual=residual, res_offset=res_offset,
        apply_relu=True, out_dtype=jnp.float32)                # (n, q, cp)

    # single un-pad / layout restore at the very end
    out = out.reshape(n, ho, wp, cp)[:, :, :wo, :planes]
    return jnp.transpose(out, (0, 3, 1, 2))                    # NHWC -> NCHW


# ---------------------------------------------------------------------------
# Pure-JAX reference (f32, HIGHEST precision) for correctness checking.
# ---------------------------------------------------------------------------
def _reference_forward(params, x_nchw, stride):
    x = jnp.transpose(x_nchw, (0, 2, 3, 1)).astype(jnp.float32)

    def conv(a, wgt, st, pad):
        return jax.lax.conv_general_dilated(
            a, jnp.transpose(wgt, (2, 3, 1, 0)), (st, st),
            ((pad, pad), (pad, pad)),
            dimension_numbers=("NHWC", "HWIO", "NHWC"),
            precision=jax.lax.Precision.HIGHEST)

    s1, b1 = _fold_bn(**params["bn1"])
    s2, b2 = _fold_bn(**params["bn2"])
    out1 = jnp.maximum(conv(x, params["w1"], stride, 1) * s1 + b1, 0.0)
    out2 = conv(out1, params["w2"], 1, 1) * s2 + b2
    if "w_sc" in params:
        ssc, bsc = _fold_bn(**params["bn_sc"])
        sc = conv(x, params["w_sc"], stride, 0) * ssc + bsc
    else:
        sc = x
    out = jnp.maximum(out2 + sc, 0.0)
    return jnp.transpose(out, (0, 3, 1, 2))


if __name__ == "__main__":
    key = jax.random.PRNGKey(0)

    test_cases = (
        # (N, in_planes, H, W, planes, stride)
        (2, 4, 16, 16, 8, 2),   # strided conv1 (phase decomp) + projection
        (2, 8, 16, 16, 8, 1),   # stride-1 path + identity shortcut
    )
    for (n, in_planes, hh, ww, planes, stride) in test_cases:
        key, kx, kp = jax.random.split(key, 3)
        x = jax.random.normal(kx, (n, in_planes, hh, ww), jnp.float32)
        params = init_basic_block_params(kp, in_planes, planes, stride)

        fwd = jax.jit(functools.partial(basic_block_forward, stride=stride))
        out = jax.block_until_ready(fwd(params, x))
        ref = jax.block_until_ready(_reference_forward(params, x, stride))

        ho = (hh - 1) // stride + 1
        wo = (ww - 1) // stride + 1
        assert out.shape == (n, planes, ho, wo), out.shape
        assert out.shape == ref.shape
        assert bool(jnp.all(out >= 0.0))                      # final ReLU
        max_err = float(jnp.max(jnp.abs(out - ref)))
        assert max_err < 1e-1, f"stride={stride}: max abs error {max_err}"

    print("KERNEL_OK")
</pallas_src>

<mosaic_0001>
module attributes {stable_mosaic.version = 11 : i64} {
  func.func @kernel(%arg0: i32, %arg1: i32, %arg2: memref<1x4x160x128xbf16, #tpu.memory_space<vmem>>, %arg3: memref<3x384x128xbf16, #tpu.memory_space<vmem>>, %arg4: memref<1x128xf32, #tpu.memory_space<vmem>>, %arg5: memref<1x176x128xbf16, #tpu.memory_space<vmem>>, %arg6: memref<128x384xbf16, #tpu.memory_space<vmem>>) attributes {dimension_semantics = [#tpu.dimension_semantics<parallel>, #tpu.dimension_semantics<parallel>], iteration_bounds = array<i64: 2, 1>, scalar_prefetch = 0 : i64, scratch_operands = 1 : i64, tpu.core_type = #tpu.core_type<tc>, window_params = [{transform_indices = @transform_0, window_bounds = array<i64: 1, 4, 160, 128>}, {transform_indices = @transform_1, window_bounds = array<i64: 3, 384, 128>}, {transform_indices = @transform_2, window_bounds = array<i64: 1, 128>}, {transform_indices = @transform_3, window_bounds = array<i64: 1, 176, 128>}]} {
    %cst = arith.constant 0.000000e+00 : f32
    %0 = vector.broadcast %cst : f32 to vector<128x128xf32>
    %c0 = arith.constant 0 : index
    %c3 = arith.constant 3 : index
    %c0_0 = arith.constant 0 : index
    %c0_1 = arith.constant 0 : index
    %1 = vector.load %arg2[%c0, %c3, %c0_0, %c0_1] : memref<1x4x160x128xbf16, #tpu.memory_space<vmem>>, vector<1x1x128x128xbf16>
    %2 = vector.shape_cast %1 : vector<1x1x128x128xbf16> to vector<128x128xbf16>
    %c0_2 = arith.constant 0 : index
    %c0_3 = arith.constant 0 : index
    %3 = vector.load %arg6[%c0_2, %c0_3] : memref<128x384xbf16, #tpu.memory_space<vmem>>, vector<128x128xbf16>
    tpu.vector_store %arg6[%c0_2, %c0_3], %2 {strides = array<i32>} : memref<128x384xbf16, #tpu.memory_space<vmem>>, vector<128x128xbf16>,
    %c0_4 = arith.constant 0 : index
    %c2 = arith.constant 2 : index
    %c1 = arith.constant 1 : index
    %c0_5 = arith.constant 0 : index
    %4 = vector.load %arg2[%c0_4, %c2, %c1, %c0_5] : memref<1x4x160x128xbf16, #tpu.memory_space<vmem>>, vector<1x1x128x128xbf16>
    %5 = vector.shape_cast %4 : vector<1x1x128x128xbf16> to vector<128x128xbf16>
    %c0_6 = arith.constant 0 : index
    %c128 = arith.constant 128 : index
    %6 = vector.load %arg6[%c0_6, %c128] : memref<128x384xbf16, #tpu.memory_space<vmem>>, vector<128x128xbf16>
    tpu.vector_store %arg6[%c0_6, %c128], %5 {strides = array<i32>} : memref<128x384xbf16, #tpu.memory_space<vmem>>, vector<128x128xbf16>,
    %c0_7 = arith.constant 0 : index
    %c3_8 = arith.constant 3 : index
    %c1_9 = arith.constant 1 : index
    %c0_10 = arith.constant 0 : index
    %7 = vector.load %arg2[%c0_7, %c3_8, %c1_9, %c0_10] : memref<1x4x160x128xbf16, #tpu.memory_space<vmem>>, vector<1x1x128x128xbf16>
    %8 = vector.shape_cast %7 : vector<1x1x128x128xbf16> to vector<128x128xbf16>
    %c0_11 = arith.constant 0 : index
    %c256 = arith.constant 256 : index
    %9 = vector.load %arg6[%c0_11, %c256] : memref<128x384xbf16, #tpu.memory_space<vmem>>, vector<128x128xbf16>
    tpu.vector_store %arg6[%c0_11, %c256], %8 {strides = array<i32>} : memref<128x384xbf16, #tpu.memory_space<vmem>>, vector<128x128xbf16>,
    %c0_12 = arith.constant 0 : index
    %c0_13 = arith.constant 0 : index
    %10 = vector.load %arg6[%c0_12, %c0_13] : memref<128x384xbf16, #tpu.memory_space<vmem>>, vector<128x384xbf16>
    %c0_14 = arith.constant 0 : index
    %c0_15 = arith.constant 0 : index
    %c0_16 = arith.constant 0 : index
    %11 = vector.load %arg3[%c0_14, %c0_15, %c0_16] : memref<3x384x128xbf16, #tpu.memory_space<vmem>>, vector<1x384x128xbf16>
    %12 = vector.shape_cast %11 : vector<1x384x128xbf16> to vector<384x128xbf16>
    %cst_17 = arith.constant dense<0.000000e+00> : vector<128x128xf32>
    %13 = tpu.matmul %10, %12, %cst_17 {dimension_numbers = #tpu.dot_dimension_numbers<[1], [0], [0], [1], [0, 0, 1, 1], [], []>} : vector<128x384xbf16>, vector<384x128xbf16>, vector<128x128xf32> -> vector<128x128xf32>
    %14 = arith.addf %0, %13 : vector<128x128xf32>
    %c0_18 = arith.constant 0 : index
    %c1_19 = arith.constant 1 : index
    %c16 = arith.constant 16 : index
    %c0_20 = arith.constant 0 : index
    %15 = vector.load %arg2[%c0_18, %c1_19, %c16, %c0_20] : memref<1x4x160x128xbf16, #tpu.memory_space<vmem>>, vector<1x1x128x128xbf16>
    %16 = vector.shape_cast %15 : vector<1x1x128x128xbf16> to vector<128x128xbf16>
    %c0_21 = arith.constant 0 : index
    %c0_22 = arith.constant 0 : index
    %17 = vector.load %arg6[%c0_21, %c0_22] : memref<128x384xbf16, #tpu.memory_space<vmem>>, vector<128x128xbf16>
    tpu.vector_store %arg6[%c0_21, %c0_22], %16 {strides = array<i32>} : memref<128x384xbf16, #tpu.memory_space<vmem>>, vector<128x128xbf16>,
    %c0_23 = arith.constant 0 : index
    %c0_24 = arith.constant 0 : index
    %c17 = arith.constant 17 : index
    %c0_25 = arith.constant 0 : index
    %18 = vector.load %arg2[%c0_23, %c0_24, %c17, %c0_25] : memref<1x4x160x128xbf16, #tpu.memory_space<vmem>>, vector<1x1x128x128xbf16>
    %19 = vector.shape_cast %18 : vector<1x1x128x128xbf16> to vector<128x128xbf16>
    %c0_26 = arith.constant 0 : index
    %c128_27 = arith.constant 128 : index
    %20 = vector.load %arg6[%c0_26, %c128_27] : memref<128x384xbf16, #tpu.memory_space<vmem>>, vector<128x128xbf16>
    tpu.vector_store %arg6[%c0_26, %c128_27], %19 {strides = array<i32>} : memref<128x384xbf16, #tpu.memory_space<vmem>>, vector<128x128xbf16>,
    %c0_28 = arith.constant 0 : index
    %c1_29 = arith.constant 1 : index
    %c17_30 = arith.constant 17 : index
    %c0_31 = arith.constant 0 : index
    %21 = vector.load %arg2[%c0_28, %c1_29, %c17_30, %c0_31] : memref<1x4x160x128xbf16, #tpu.memory_space<vmem>>, vector<1x1x128x128xbf16>
    %22 = vector.shape_cast %21 : vector<1x1x128x128xbf16> to vector<128x128xbf16>
    %c0_32 = arith.constant 0 : index
    %c256_33 = arith.constant 256 : index
    %23 = vector.load %arg6[%c0_32, %c256_33] : memref<128x384xbf16, #tpu.memory_space<vmem>>, vector<128x128xbf16>
    tpu.vector_store %arg6[%c0_32, %c256_33], %22 {strides = array<i32>} : memref<128x384xbf16, #tpu.memory_space<vmem>>, vector<128x128xbf16>,
    %c0_34 = arith.constant 0 : index
    %c0_35 = arith.constant 0 : index
    %24 = vector.load %arg6[%c0_34, %c0_35] : memref<128x384xbf16, #tpu.memory_space<vmem>>, vector<128x384xbf16>
    %c1_36 = arith.constant 1 : index
    %c0_37 = arith.constant 0 : index
    %c0_38 = arith.constant 0 : index
    %25 = vector.load %arg3[%c1_36, %c0_37, %c0_38] : memref<3x384x128xbf16, #tpu.memory_space<vmem>>, vector<1x384x128xbf16>
    %26 = vector.shape_cast %25 : vector<1x384x128xbf16> to vector<384x128xbf16>
    %cst_39 = arith.constant dense<0.000000e+00> : vector<128x128xf32>
    %27 = tpu.matmul %24, %26, %cst_39 {dimension_numbers = #tpu.dot_dimension_numbers<[1], [0], [0], [1], [0, 0, 1, 1], [], []>} : vector<128x384xbf16>, vector<384x128xbf16>, vector<128x128xf32> -> vector<128x128xf32>
    %28 = arith.addf %14, %27 : vector<128x128xf32>
    %c0_40 = arith.constant 0 : index
    %c3_41 = arith.constant 3 : index
    %c16_42 = arith.constant 16 : index
    %c0_43 = arith.constant 0 : index
    %29 = vector.load %arg2[%c0_40, %c3_41, %c16_42, %c0_43] : memref<1x4x160x128xbf16, #tpu.memory_space<vmem>>, vector<1x1x128x128xbf16>
    %30 = vector.shape_cast %29 : vector<1x1x128x128xbf16> to vector<128x128xbf16>
    %c0_44 = arith.constant 0 : index
    %c0_45 = arith.constant 0 : index
    %31 = vector.load %arg6[%c0_44, %c0_45] : memref<128x384xbf16, #tpu.memory_space<vmem>>, vector<128x128xbf16>
    tpu.vector_store %arg6[%c0_44, %c0_45], %30 {strides = array<i32>} : memref<128x384xbf16, #tpu.memory_space<vmem>>, vector<128x128xbf16>,
    %c0_46 = arith.constant 0 : index
    %c2_47 = arith.constant 2 : index
    %c17_48 = arith.constant 17 : index
    %c0_49 = arith.constant 0 : index
    %32 = vector.load %arg2[%c0_46, %c2_47, %c17_48, %c0_49] : memref<1x4x160x128xbf16, #tpu.memory_space<vmem>>, vector<1x1x128x128xbf16>
    %33 = vector.shape_cast %32 : vector<1x1x128x128xbf16> to vector<128x128xbf16>
    %c0_50 = arith.constant 0 : index
    %c128_51 = arith.constant 128 : index
    %34 = vector.load %arg6[%c0_50, %c128_51] : memref<128x384xbf16, #tpu.memory_space<vmem>>, vector<128x128xbf16>
    tpu.vector_store %arg6[%c0_50, %c128_51], %33 {strides = array<i32>} : memref<128x384xbf16, #tpu.memory_space<vmem>>, vector<128x128xbf16>,
    %c0_52 = arith.constant 0 : index
    %c3_53 = arith.constant 3 : index
    %c17_54 = arith.constant 17 : index
    %c0_55 = arith.constant 0 : index
    %35 = vector.load %arg2[%c0_52, %c3_53, %c17_54, %c0_55] : memref<1x4x160x128xbf16, #tpu.memory_space<vmem>>, vector<1x1x128x128xbf16>
    %36 = vector.shape_cast %35 : vector<1x1x128x128xbf16> to vector<128x128xbf16>
    %c0_56 = arith.constant 0 : index
    %c256_57 = arith.constant 256 : index
    %37 = vector.load %arg6[%c0_56, %c256_57] : memref<128x384xbf16, #tpu.memory_space<vmem>>, vector<128x128xbf16>
    tpu.vector_store %arg6[%c0_56, %c256_57], %36 {strides = array<i32>} : memref<128x384xbf16, #tpu.memory_space<vmem>>, vector<128x128xbf16>,
    %c0_58 = arith.constant 0 : index
    %c0_59 = arith.constant 0 : index
    %38 = vector.load %arg6[%c0_58, %c0_59] : memref<128x384xbf16, #tpu.memory_space<vmem>>, vector<128x384xbf16>
    %c2_60 = arith.constant 2 : index
    %c0_61 = arith.constant 0 : index
    %c0_62 = arith.constant 0 : index
    %39 = vector.load %arg3[%c2_60, %c0_61, %c0_62] : memref<3x384x128xbf16, #tpu.memory_space<vmem>>, vector<1x384x128xbf16>
    %40 = vector.shape_cast %39 : vector<1x384x128xbf16> to vector<384x128xbf16>
    %cst_63 = arith.constant dense<0.000000e+00> : vector<128x128xf32>
    %41 = tpu.matmul %38, %40, %cst_63 {dimension_numbers = #tpu.dot_dimension_numbers<[1], [0], [0], [1], [0, 0, 1, 1], [], []>} : vector<128x384xbf16>, vector<384x128xbf16>, vector<128x128xf32> -> vector<128x128xf32>
    %42 = arith.addf %28, %41 : vector<128x128xf32>
    %c0_64 = arith.constant 0 : index
    %c0_65 = arith.constant 0 : index
    %43 = vector.load %arg4[%c0_64, %c0_65] : memref<1x128xf32, #tpu.memory_space<vmem>>, vector<1x128xf32>
    %44 = vector.broadcast %43 : vector<1x128xf32> to vector<128x128xf32>
    %45 = arith.addf %42, %44 : vector<128x128xf32>
    %cst_66 = arith.constant 0.000000e+00 : f32
    %46 = vector.broadcast %cst_66 : f32 to vector<128x128xf32>
    %47 = arith.maximumf %45, %46 : vector<128x128xf32>
    %48 = tpu.iota {dimensions = array<i32: 0>} : vector<128x128xi32>
    %c16_i32 = arith.constant 16 : i32
    %c0_i32 = arith.constant 0 : i32
    %49 = arith.cmpi eq, %c16_i32, %c0_i32 : i32
    %c1_i32 = arith.constant 1 : i32
    %50 = arith.select %49, %c1_i32, %c16_i32 : i32
    %51 = vector.broadcast %50 : i32 to vector<128x128xi32>
    %52 = arith.remsi %48, %51 : vector<128x128xi32>
    %c0_i32_67 = arith.constant 0 : i32
    %53 = vector.broadcast %c0_i32_67 : i32 to vector<128x128xi32>
    %54 = arith.cmpi ne, %52, %53 : vector<128x128xi32>
    %c0_i32_68 = arith.constant 0 : i32
    %55 = vector.broadcast %c0_i32_68 : i32 to vector<128x128xi32>
    %56 = arith.cmpi slt, %52, %55 : vector<128x128xi32>
    %c0_i32_69 = arith.constant 0 : i32
    %57 = arith.cmpi slt, %50, %c0_i32_69 : i32
    %58 = vector.broadcast %57 : i1 to vector<128x128xi1>
    %59 = vector.broadcast %58 : vector<128x128xi1> to vector<128x128xi1>
    %60 = arith.xori %56, %59 : vector<128x128xi1>
    %61 = arith.andi %60, %54 : vector<128x128xi1>
    %62 = vector.broadcast %50 : i32 to vector<128x128xi32>
    %63 = arith.addi %52, %62 : vector<128x128xi32>
    %64 = arith.select %61, %63, %52 : vector<128x128xi1>, vector<128x128xi32>
    %c8_i32 = arith.constant 8 : i32
    %65 = vector.broadcast %c8_i32 : i32 to vector<128x128xi32>
    %66 = arith.cmpi slt, %64, %65 : vector<128x128xi32>
    %cst_70 = arith.constant 0.000000e+00 : f32
    %67 = vector.broadcast %cst_70 : f32 to vector<128x128xf32>
    %68 = arith.select %66, %47, %67 : vector<128x128xi1>, vector<128x128xf32>
    %cst_71 = arith.constant 0.000000e+00 : bf16
    %69 = vector.broadcast %cst_71 : bf16 to vector<1x176x128xbf16>
    %c0_72 = arith.constant 0 : index
    %c0_73 = arith.constant 0 : index
    %c0_74 = arith.constant 0 : index
    %70 = vector.load %arg5[%c0_72, %c0_73, %c0_74] : memref<1x176x128xbf16, #tpu.memory_space<vmem>>, vector<1x176x128xbf16>
    tpu.vector_store %arg5[%c0_72, %c0_73, %c0_74], %69 {strides = array<i32>} : memref<1x176x128xbf16, #tpu.memory_space<vmem>>, vector<1x176x128xbf16>,
    %71 = arith.truncf %68 : vector<128x128xf32> to vector<128x128xbf16>
    %c0_75 = arith.constant 0 : index
    %c17_76 = arith.constant 17 : index
    %c0_77 = arith.constant 0 : index
    %72 = vector.load %arg5[%c0_75, %c17_76, %c0_77] : memref<1x176x128xbf16, #tpu.memory_space<vmem>>, vector<1x128x128xbf16>
    %73 = vector.shape_cast %72 : vector<1x128x128xbf16> to vector<128x128xbf16>
    %74 = vector.shape_cast %71 : vector<128x128xbf16> to vector<1x128x128xbf16>
    tpu.vector_store %arg5[%c0_75, %c17_76, %c0_77], %74 {strides = array<i32>} : memref<1x176x128xbf16, #tpu.memory_space<vmem>>, vector<1x128x128xbf16>,
    return
  }
  func.func @transform_0(%arg0: i32, %arg1: i32) -> (i32, i32, i32, i32) {
    %c0_i32 = arith.constant 0 : i32
    %c0_i32_0 = arith.constant 0 : i32
    %c0_i32_1 = arith.constant 0 : i32
    %c0_i32_2 = arith.constant 0 : i32
    return %arg0, %c0_i32, %c0_i32_0, %c0_i32_1 : i32, i32, i32, i32
  }
  func.func @transform_1(%arg0: i32, %arg1: i32) -> (i32, i32, i32) {
    %c0_i32 = arith.constant 0 : i32
    %c0_i32_0 = arith.constant 0 : i32
    %c0_i32_1 = arith.constant 0 : i32
    return %c0_i32, %c0_i32_0, %arg1 : i32, i32, i32
  }
  func.func @transform_2(%arg0: i32, %arg1: i32) -> (i32, i32) {
    %c0_i32 = arith.constant 0 : i32
    %c0_i32_0 = arith.constant 0 : i32
    return %c0_i32, %arg1 : i32, i32
  }
  func.func @transform_3(%arg0: i32, %arg1: i32) -> (i32, i32, i32) {
    %c0_i32 = arith.constant 0 : i32
    %c0_i32_0 = arith.constant 0 : i32
    return %arg0, %c0_i32, %arg1 : i32, i32, i32
  }
}

module attributes {stable_mosaic.version = 11 : i64} {
  func.func @kernel(%arg0: i32, %arg1: i32, %arg2: memref<1x4x160x128xbf16, #tpu.memory_space<vmem>>, %arg3: memref<1x128x128xbf16, #tpu.memory_space<vmem>>, %arg4: memref<1x128xf32, #tpu.memory_space<vmem>>, %arg5: memref<1x128x128xbf16, #tpu.memory_space<vmem>>) attributes {dimension_semantics = [#tpu.dimension_semantics<parallel>, #tpu.dimension_semantics<parallel>], iteration_bounds = array<i64: 2, 1>, scalar_prefetch = 0 : i64, scratch_operands = 0 : i64, tpu.core_type = #tpu.core_type<tc>, window_params = [{transform_indices = @transform_0, window_bounds = array<i64: 1, 4, 160, 128>}, {transform_indices = @transform_1, window_bounds = array<i64: 1, 128, 128>}, {transform_indices = @transform_2, window_bounds = array<i64: 1, 128>}, {transform_indices = @transform_3, window_bounds = array<i64: 1, 128, 128>}]} {
    %cst = arith.constant 0.000000e+00 : f32
    %0 = vector.broadcast %cst : f32 to vector<128x128xf32>
    %c0 = arith.constant 0 : index
    %c0_0 = arith.constant 0 : index
    %c17 = arith.constant 17 : index
    %c0_1 = arith.constant 0 : index
    %1 = vector.load %arg2[%c0, %c0_0, %c17, %c0_1] : memref<1x4x160x128xbf16, #tpu.memory_space<vmem>>, vector<1x1x128x128xbf16>
    %2 = vector.shape_cast %1 : vector<1x1x128x128xbf16> to vector<128x128xbf16>
    %c0_2 = arith.constant 0 : index
    %c0_3 = arith.constant 0 : index
    %c0_4 = arith.constant 0 : index
    %3 = vector.load %arg3[%c0_2, %c0_3, %c0_4] : memref<1x128x128xbf16, #tpu.memory_space<vmem>>, vector<1x128x128xbf16>
    %4 = vector.shape_cast %3 : vector<1x128x128xbf16> to vector<128x128xbf16>
    %cst_5 = arith.constant dense<0.000000e+00> : vector<128x128xf32>
    %5 = tpu.matmul %2, %4, %cst_5 {dimension_numbers = #tpu.dot_dimension_numbers<[1], [0], [0], [1], [0, 0, 1, 1], [], []>} : vector<128x128xbf16>, vector<128x128xbf16>, vector<128x128xf32> -> vector<128x128xf32>
    %6 = arith.addf %0, %5 : vector<128x128xf32>
    %c0_6 = arith.constant 0 : index
    %c0_7 = arith.constant 0 : index
    %7 = vector.load %arg4[%c0_6, %c0_7] : memref<1x128xf32, #tpu.memory_space<vmem>>, vector<1x128xf32>
    %8 = vector.broadcast %7 : vector<1x128xf32> to vector<128x128xf32>
    %9 = arith.addf %6, %8 : vector<128x128xf32>
    %10 = arith.truncf %9 : vector<128x128xf32> to vector<128x128xbf16>
    %c0_8 = arith.constant 0 : index
    %c0_9 = arith.constant 0 : index
    %c0_10 = arith.constant 0 : index
    %11 = vector.load %arg5[%c0_8, %c0_9, %c0_10] : memref<1x128x128xbf16, #tpu.memory_space<vmem>>, vector<1x128x128xbf16>
    %12 = vector.shape_cast %11 : vector<1x128x128xbf16> to vector<128x128xbf16>
    %13 = vector.shape_cast %10 : vector<128x128xbf16> to vector<1x128x128xbf16>
    tpu.vector_store %arg5[%c0_8, %c0_9, %c0_10], %13 {strides = array<i32>} : memref<1x128x128xbf16, #tpu.memory_space<vmem>>, vector<1x128x128xbf16>,
    return
  }
  func.func @transform_0(%arg0: i32, %arg1: i32) -> (i32, i32, i32, i32) {
    %c0_i32 = arith.constant 0 : i32
    %c0_i32_0 = arith.constant 0 : i32
    %c0_i32_1 = arith.constant 0 : i32
    %c0_i32_2 = arith.constant 0 : i32
    return %arg0, %c0_i32, %c0_i32_0, %c0_i32_1 : i32, i32, i32, i32
  }
  func.func @transform_1(%arg0: i32, %arg1: i32) -> (i32, i32, i32) {
    %c0_i32 = arith.constant 0 : i32
    %c0_i32_0 = arith.constant 0 : i32
    %c0_i32_1 = arith.constant 0 : i32
    return %c0_i32, %c0_i32_0, %arg1 : i32, i32, i32
  }
  func.func @transform_2(%arg0: i32, %arg1: i32) -> (i32, i32) {
    %c0_i32 = arith.constant 0 : i32
    %c0_i32_0 = arith.constant 0 : i32
    return %c0_i32, %arg1 : i32, i32
  }
  func.func @transform_3(%arg0: i32, %arg1: i32) -> (i32, i32, i32) {
    %c0_i32 = arith.constant 0 : i32
    %c0_i32_0 = arith.constant 0 : i32
    return %arg0, %c0_i32, %arg1 : i32, i32, i32
  }
}

module attributes {stable_mosaic.version = 11 : i64} {
  func.func @kernel(%arg0: i32, %arg1: i32, %arg2: memref<1x1x176x128xbf16, #tpu.memory_space<vmem>>, %arg3: memref<3x384x128xbf16, #tpu.memory_space<vmem>>, %arg4: memref<1x128xf32, #tpu.memory_space<vmem>>, %arg5: memref<1x128x128xbf16, #tpu.memory_space<vmem>>, %arg6: memref<1x128x128xf32, #tpu.memory_space<vmem>>, %arg7: memref<128x384xbf16, #tpu.memory_space<vmem>>) attributes {dimension_semantics = [#tpu.dimension_semantics<parallel>, #tpu.dimension_semantics<parallel>], iteration_bounds = array<i64: 2, 1>, scalar_prefetch = 0 : i64, scratch_operands = 1 : i64, tpu.core_type = #tpu.core_type<tc>, window_params = [{transform_indices = @transform_0, window_bounds = array<i64: 1, 1, 176, 128>}, {transform_indices = @transform_1, window_bounds = array<i64: 3, 384, 128>}, {transform_indices = @transform_2, window_bounds = array<i64: 1, 128>}, {transform_indices = @transform_3, window_bounds = array<i64: 1, 128, 128>}, {transform_indices = @transform_4, window_bounds = array<i64: 1, 128, 128>}]} {
    %cst = arith.constant 0.000000e+00 : f32
    %0 = vector.broadcast %cst : f32 to vector<128x128xf32>
    %c0 = arith.constant 0 : index
    %c0_0 = arith.constant 0 : index
    %c0_1 = arith.constant 0 : index
    %c0_2 = arith.constant 0 : index
    %1 = vector.load %arg2[%c0, %c0_0, %c0_1, %c0_2] : memref<1x1x176x128xbf16, #tpu.memory_space<vmem>>, vector<1x1x128x128xbf16>
    %2 = vector.shape_cast %1 : vector<1x1x128x128xbf16> to vector<128x128xbf16>
    %c0_3 = arith.constant 0 : index
    %c0_4 = arith.constant 0 : index
    %3 = vector.load %arg7[%c0_3, %c0_4] : memref<128x384xbf16, #tpu.memory_space<vmem>>, vector<128x128xbf16>
    tpu.vector_store %arg7[%c0_3, %c0_4], %2 {strides = array<i32>} : memref<128x384xbf16, #tpu.memory_space<vmem>>, vector<128x128xbf16>,
    %c0_5 = arith.constant 0 : index
    %c0_6 = arith.constant 0 : index
    %c1 = arith.constant 1 : index
    %c0_7 = arith.constant 0 : index
    %4 = vector.load %arg2[%c0_5, %c0_6, %c1, %c0_7] : memref<1x1x176x128xbf16, #tpu.memory_space<vmem>>, vector<1x1x128x128xbf16>
    %5 = vector.shape_cast %4 : vector<1x1x128x128xbf16> to vector<128x128xbf16>
    %c0_8 = arith.constant 0 : index
    %c128 = arith.constant 128 : index
    %6 = vector.load %arg7[%c0_8, %c128] : memref<128x384xbf16, #tpu.memory_space<vmem>>, vector<128x128xbf16>
    tpu.vector_store %arg7[%c0_8, %c128], %5 {strides = array<i32>} : memref<128x384xbf16, #tpu.memory_space<vmem>>, vector<128x128xbf16>,
    %c0_9 = arith.constant 0 : index
    %c0_10 = arith.constant 0 : index
    %c2 = arith.constant 2 : index
    %c0_11 = arith.constant 0 : index
    %7 = vector.load %arg2[%c0_9, %c0_10, %c2, %c0_11] : memref<1x1x176x128xbf16, #tpu.memory_space<vmem>>, vector<1x1x128x128xbf16>
    %8 = vector.shape_cast %7 : vector<1x1x128x128xbf16> to vector<128x128xbf16>
    %c0_12 = arith.constant 0 : index
    %c256 = arith.constant 256 : index
    %9 = vector.load %arg7[%c0_12, %c256] : memref<128x384xbf16, #tpu.memory_space<vmem>>, vector<128x128xbf16>
    tpu.vector_store %arg7[%c0_12, %c256], %8 {strides = array<i32>} : memref<128x384xbf16, #tpu.memory_space<vmem>>, vector<128x128xbf16>,
    %c0_13 = arith.constant 0 : index
    %c0_14 = arith.constant 0 : index
    %10 = vector.load %arg7[%c0_13, %c0_14] : memref<128x384xbf16, #tpu.memory_space<vmem>>, vector<128x384xbf16>
    %c0_15 = arith.constant 0 : index
    %c0_16 = arith.constant 0 : index
    %c0_17 = arith.constant 0 : index
    %11 = vector.load %arg3[%c0_15, %c0_16, %c0_17] : memref<3x384x128xbf16, #tpu.memory_space<vmem>>, vector<1x384x128xbf16>
    %12 = vector.shape_cast %11 : vector<1x384x128xbf16> to vector<384x128xbf16>
    %cst_18 = arith.constant dense<0.000000e+00> : vector<128x128xf32>
    %13 = tpu.matmul %10, %12, %cst_18 {dimension_numbers = #tpu.dot_dimension_numbers<[1], [0], [0], [1], [0, 0, 1, 1], [], []>} : vector<128x384xbf16>, vector<384x128xbf16>, vector<128x128xf32> -> vector<128x128xf32>
    %14 = arith.addf %0, %13 : vector<128x128xf32>
    %c0_19 = arith.constant 0 : index
    %c0_20 = arith.constant 0 : index
    %c16 = arith.constant 16 : index
    %c0_21 = arith.constant 0 : index
    %15 = vector.load %arg2[%c0_19, %c0_20, %c16, %c0_21] : memref<1x1x176x128xbf16, #tpu.memory_space<vmem>>, vector<1x1x128x128xbf16>
    %16 = vector.shape_cast %15 : vector<1x1x128x128xbf16> to vector<128x128xbf16>
    %c0_22 = arith.constant 0 : index
    %c0_23 = arith.constant 0 : index
    %17 = vector.load %arg7[%c0_22, %c0_23] : memref<128x384xbf16, #tpu.memory_space<vmem>>, vector<128x128xbf16>
    tpu.vector_store %arg7[%c0_22, %c0_23], %16 {strides = array<i32>} : memref<128x384xbf16, #tpu.memory_space<vmem>>, vector<128x128xbf16>,
    %c0_24 = arith.constant 0 : index
    %c0_25 = arith.constant 0 : index
    %c17 = arith.constant 17 : index
    %c0_26 = arith.constant 0 : index
    %18 = vector.load %arg2[%c0_24, %c0_25, %c17, %c0_26] : memref<1x1x176x128xbf16, #tpu.memory_space<vmem>>, vector<1x1x128x128xbf16>
    %19 = vector.shape_cast %18 : vector<1x1x128x128xbf16> to vector<128x128xbf16>
    %c0_27 = arith.constant 0 : index
    %c128_28 = arith.constant 128 : index
    %20 = vector.load %arg7[%c0_27, %c128_28] : memref<128x384xbf16, #tpu.memory_space<vmem>>, vector<128x128xbf16>
    tpu.vector_store %arg7[%c0_27, %c128_28], %19 {strides = array<i32>} : memref<128x384xbf16, #tpu.memory_space<vmem>>, vector<128x128xbf16>,
    %c0_29 = arith.constant 0 : index
    %c0_30 = arith.constant 0 : index
    %c18 = arith.constant 18 : index
    %c0_31 = arith.constant 0 : index
    %21 = vector.load %arg2[%c0_29, %c0_30, %c18, %c0_31] : memref<1x1x176x128xbf16, #tpu.memory_space<vmem>>, vector<1x1x128x128xbf16>
    %22 = vector.shape_cast %21 : vector<1x1x128x128xbf16> to vector<128x128xbf16>
    %c0_32 = arith.constant 0 : index
    %c256_33 = arith.constant 256 : index
    %23 = vector.load %arg7[%c0_32, %c256_33] : memref<128x384xbf16, #tpu.memory_space<vmem>>, vector<128x128xbf16>
    tpu.vector_store %arg7[%c0_32, %c256_33], %22 {strides = array<i32>} : memref<128x384xbf16, #tpu.memory_space<vmem>>, vector<128x128xbf16>,
    %c0_34 = arith.constant 0 : index
    %c0_35 = arith.constant 0 : index
    %24 = vector.load %arg7[%c0_34, %c0_35] : memref<128x384xbf16, #tpu.memory_space<vmem>>, vector<128x384xbf16>
    %c1_36 = arith.constant 1 : index
    %c0_37 = arith.constant 0 : index
    %c0_38 = arith.constant 0 : index
    %25 = vector.load %arg3[%c1_36, %c0_37, %c0_38] : memref<3x384x128xbf16, #tpu.memory_space<vmem>>, vector<1x384x128xbf16>
    %26 = vector.shape_cast %25 : vector<1x384x128xbf16> to vector<384x128xbf16>
    %cst_39 = arith.constant dense<0.000000e+00> : vector<128x128xf32>
    %27 = tpu.matmul %24, %26, %cst_39 {dimension_numbers = #tpu.dot_dimension_numbers<[1], [0], [0], [1], [0, 0, 1, 1], [], []>} : vector<128x384xbf16>, vector<384x128xbf16>, vector<128x128xf32> -> vector<128x128xf32>
    %28 = arith.addf %14, %27 : vector<128x128xf32>
    %c0_40 = arith.constant 0 : index
    %c0_41 = arith.constant 0 : index
    %c32 = arith.constant 32 : index
    %c0_42 = arith.constant 0 : index
    %29 = vector.load %arg2[%c0_40, %c0_41, %c32, %c0_42] : memref<1x1x176x128xbf16, #tpu.memory_space<vmem>>, vector<1x1x128x128xbf16>
    %30 = vector.shape_cast %29 : vector<1x1x128x128xbf16> to vector<128x128xbf16>
    %c0_43 = arith.constant 0 : index
    %c0_44 = arith.constant 0 : index
    %31 = vector.load %arg7[%c0_43, %c0_44] : memref<128x384xbf16, #tpu.memory_space<vmem>>, vector<128x128xbf16>
    tpu.vector_store %arg7[%c0_43, %c0_44], %30 {strides = array<i32>} : memref<128x384xbf16, #tpu.memory_space<vmem>>, vector<128x128xbf16>,
    %c0_45 = arith.constant 0 : index
    %c0_46 = arith.constant 0 : index
    %c33 = arith.constant 33 : index
    %c0_47 = arith.constant 0 : index
    %32 = vector.load %arg2[%c0_45, %c0_46, %c33, %c0_47] : memref<1x1x176x128xbf16, #tpu.memory_space<vmem>>, vector<1x1x128x128xbf16>
    %33 = vector.shape_cast %32 : vector<1x1x128x128xbf16> to vector<128x128xbf16>
    %c0_48 = arith.constant 0 : index
    %c128_49 = arith.constant 128 : index
    %34 = vector.load %arg7[%c0_48, %c128_49] : memref<128x384xbf16, #tpu.memory_space<vmem>>, vector<128x128xbf16>
    tpu.vector_store %arg7[%c0_48, %c128_49], %33 {strides = array<i32>} : memref<128x384xbf16, #tpu.memory_space<vmem>>, vector<128x128xbf16>,
    %c0_50 = arith.constant 0 : index
    %c0_51 = arith.constant 0 : index
    %c34 = arith.constant 34 : index
    %c0_52 = arith.constant 0 : index
    %35 = vector.load %arg2[%c0_50, %c0_51, %c34, %c0_52] : memref<1x1x176x128xbf16, #tpu.memory_space<vmem>>, vector<1x1x128x128xbf16>
    %36 = vector.shape_cast %35 : vector<1x1x128x128xbf16> to vector<128x128xbf16>
    %c0_53 = arith.constant 0 : index
    %c256_54 = arith.constant 256 : index
    %37 = vector.load %arg7[%c0_53, %c256_54] : memref<128x384xbf16, #tpu.memory_space<vmem>>, vector<128x128xbf16>
    tpu.vector_store %arg7[%c0_53, %c256_54], %36 {strides = array<i32>} : memref<128x384xbf16, #tpu.memory_space<vmem>>, vector<128x128xbf16>,
    %c0_55 = arith.constant 0 : index
    %c0_56 = arith.constant 0 : index
    %38 = vector.load %arg7[%c0_55, %c0_56] : memref<128x384xbf16, #tpu.memory_space<vmem>>, vector<128x384xbf16>
    %c2_57 = arith.constant 2 : index
    %c0_58 = arith.constant 0 : index
    %c0_59 = arith.constant 0 : index
    %39 = vector.load %arg3[%c2_57, %c0_58, %c0_59] : memref<3x384x128xbf16, #tpu.memory_space<vmem>>, vector<1x384x128xbf16>
    %40 = vector.shape_cast %39 : vector<1x384x128xbf16> to vector<384x128xbf16>
    %cst_60 = arith.constant dense<0.000000e+00> : vector<128x128xf32>
    %41 = tpu.matmul %38, %40, %cst_60 {dimension_numbers = #tpu.dot_dimension_numbers<[1], [0], [0], [1], [0, 0, 1, 1], [], []>} : vector<128x384xbf16>, vector<384x128xbf16>, vector<128x128xf32> -> vector<128x128xf32>
    %42 = arith.addf %28, %41 : vector<128x128xf32>
    %c0_61 = arith.constant 0 : index
    %c0_62 = arith.constant 0 : index
    %43 = vector.load %arg4[%c0_61, %c0_62] : memref<1x128xf32, #tpu.memory_space<vmem>>, vector<1x128xf32>
    %44 = vector.broadcast %43 : vector<1x128xf32> to vector<128x128xf32>
    %45 = arith.addf %42, %44 : vector<128x128xf32>
    %c0_63 = arith.constant 0 : index
    %c0_64 = arith.constant 0 : index
    %c0_65 = arith.constant 0 : index
    %46 = vector.load %arg5[%c0_63, %c0_64, %c0_65] : memref<1x128x128xbf16, #tpu.memory_space<vmem>>, vector<1x128x128xbf16>
    %47 = vector.shape_cast %46 : vector<1x128x128xbf16> to vector<128x128xbf16>
    %48 = arith.extf %47 : vector<128x128xbf16> to vector<128x128xf32>
    %49 = arith.addf %45, %48 : vector<128x128xf32>
    %cst_66 = arith.constant 0.000000e+00 : f32
    %50 = vector.broadcast %cst_66 : f32 to vector<128x128xf32>
    %51 = arith.maximumf %49, %50 : vector<128x128xf32>
    %c0_67 = arith.constant 0 : index
    %c0_68 = arith.constant 0 : index
    %c0_69 = arith.constant 0 : index
    %52 = vector.load %arg6[%c0_67, %c0_68, %c0_69] : memref<1x128x128xf32, #tpu.memory_space<vmem>>, vector<1x128x128xf32>
    %53 = vector.shape_cast %52 : vector<1x128x128xf32> to vector<128x128xf32>
    %54 = vector.shape_cast %51 : vector<128x128xf32> to vector<1x128x128xf32>
    tpu.vector_store %arg6[%c0_67, %c0_68, %c0_69], %54 {strides = array<i32>} : memref<1x128x128xf32, #tpu.memory_space<vmem>>, vector<1x128x128xf32>,
    return
  }
  func.func @transform_0(%arg0: i32, %arg1: i32) -> (i32, i32, i32, i32) {
    %c0_i32 = arith.constant 0 : i32
    %c0_i32_0 = arith.constant 0 : i32
    %c0_i32_1 = arith.constant 0 : i32
    %c0_i32_2 = arith.constant 0 : i32
    return %arg0, %c0_i32, %c0_i32_0, %c0_i32_1 : i32, i32, i32, i32
  }
  func.func @transform_1(%arg0: i32, %arg1: i32) -> (i32, i32, i32) {
    %c0_i32 = arith.constant 0 : i32
    %c0_i32_0 = arith.constant 0 : i32
    %c0_i32_1 = arith.constant 0 : i32
    return %c0_i32, %c0_i32_0, %arg1 : i32, i32, i32
  }
  func.func @transform_2(%arg0: i32, %arg1: i32) -> (i32, i32) {
    %c0_i32 = arith.constant 0 : i32
    %c0_i32_0 = arith.constant 0 : i32
    return %c0_i32, %arg1 : i32, i32
  }
  func.func @transform_3(%arg0: i32, %arg1: i32) -> (i32, i32, i32) {
    %c0_i32 = arith.constant 0 : i32
    %c0_i32_0 = arith.constant 0 : i32
    return %arg0, %c0_i32, %arg1 : i32, i32, i32
  }
  func.func @transform_4(%arg0: i32, %arg1: i32) -> (i32, i32, i32) {
    %c0_i32 = arith.constant 0 : i32
    %c0_i32_0 = arith.constant 0 : i32
    return %arg0, %c0_i32, %arg1 : i32, i32, i32
  }
}

</mosaic_0001>

<bundles_post_ra>
// kernel: basic_block_forward.4
= control target key start
LH: loop header
LB: loop body
LE: loop exit
PB: predicated region body
PF: predicated region fallthrough
CT: control target
= control target key end

     0   :  { %s973_s12 = smov 0   ;;  %s975_s13 = smov 0   ;;  %s1066_s0 = inlined_call_operand.vmem [shape: bf16[2,4,160,128], index: 0, kind: input, shape index: {}]   ;;  %s1067_s1 = inlined_call_operand.vmem [shape: bf16[1,128,128], index: 1, kind: input, shape index: {}]   ;;  %s1068_s2 = inlined_call_operand.vmem [shape: f32[1,128], index: 2, kind: input, shape index: {}]   ;;  %s1069_s3 = inlined_call_operand.vmem [shape: bf16[2,128,128], index: 3, kind: output, shape index: {}]  }
   0x1   :  { %s977_s14 = smov 0  }
   0x2 LB: > { %s25_s15 = sadd.s32 1, %s947_s13  ;;  %p719_p0 = scmp.ge.s32.totalorder %s951_s14, 1  ;;  %s951_s14 = sphi %s977_s14, %s13_s14   ;;  %s947_s13 = sphi %s975_s13, %s1071_s13   ;;  %s943_s12 = sphi %s973_s12, %s1070_s12  }
   0x3   : > { %p27_p1 = scmp.ge.s32.totalorder %s25_s15, 2  ;;  %p168_p2 = scmp.lt.s32.totalorder %s951_s14, 3 }
   0x5   : > { %s1073_s15 = smov (%p27_p1, %s25_s15), 0  ;;  %p169_p3 = pnand %p719_p0, %p168_p2 }
   0x6   : > { %p202_p4 = scmp.lt.s32.totalorder (!%p169_p3), %s943_s12, 1 }
   0x7   : > { %172 = sbr.rel (%p169_p3) target bundleno = 257 (0x101), region = 32 }
   0xc   : > { %v912_v0 = vld [vmem:[%s1067_s1 + $0x38] sm:$0xff]   ;;  %v913_v1 = vld [vmem:[%s1067_s1 + $0x30] sm:$0xff]   ;;  %s1075_s12 = smov (!%p202_p4, %s943_s12), 1  ;;  %v914_v2 = vld [vmem:[%s1067_s1 + $0x28] sm:$0xff]   ;;  %vm306_vm0 = vsmask.f32 7424 }
   0xd   : > { %839 = vmatprep.subr.bf16.mxu0 %v912_v0  ;;  %871 = vmatprep.subr.bf16.mxu1 %v912_v0  ;;  %s887_s22 = smul.u32 320, %s1075_s12  ;;  %v915_v3 = vld [vmem:[%s1067_s1 + $0x20] sm:$0xff]   ;;  %v916_v6 = vld [vmem:[%s1067_s1 + $0x18] sm:$0xff]   ;;  %v917_v19 = vld [vmem:[%s1067_s1 + $0x10] sm:$0xff]   ;;  %s759_s11 = sshll.u32 %s1075_s12, 6 }
   0xe   : > { %840 = vmatpush3.bf16.msra.mxu0 %v912_v0  ;;  %879 = vmatpush3.bf16.msra.mxu1 %v912_v0  ;;  %v918_v26 = vld [vmem:[%s1067_s1 + $0x8] sm:$0xff]   ;;  %v919_v33 = vld [vmem:[%s1067_s1] sm:$0xff]   ;;  %s1047_s18 = scalar_lea.vmem %s1069_s3, %s759_s11 }
   0xf   : > { %841 = vmatprep.subr.bf16.mxu0 %v913_v1  ;;  %872 = vmatprep.subr.bf16.mxu1 %v913_v1  ;;  %s1006_s25 = scalar_lea.vmem %s1066_s0, %s887_s22  ;;  %v723_v61 = vld [vmem:[%s1068_s2] ss:$0 sm:$0xff] }
  0x10   : > { %v920_v4 = vld [vmem:[%s1006_s25 + $0x8] sm:$0xff]   ;;  %v921_v5 = vld [vmem:[%s1006_s25 + $0x10] sm:$0xff]   ;;  %v924_v23 = vld [vmem:[%s1006_s25 + $0x18] sm:$0xff]  }
  0x11   : > { %v308_v7 = vshrl.u32 %v920_v4, 16  ;;  %v310_v8 = vshll.u32 %v920_v4, 16  ;;  %v315_v9 = vshll.u32 %v921_v5, 16  ;;  %v922_v10 = vld [vmem:[%s1006_s25 + $0x28] sm:$0xff]   ;;  %v923_v11 = vld [vmem:[%s1006_s25 + $0x30] sm:$0xff]   ;;  %v925_v24 = vld [vmem:[%s1006_s25 + $0x38] sm:$0xff]  }
  0x12   : > { %842 = vmatpush3.bf16.msra.mxu0 %v913_v1  ;;  %880 = vmatpush3.bf16.msra.mxu1 %v913_v1  ;;  %v339_v14 = vshll.u32 %v922_v10, 16  ;;  %v343_v15 = vshrl.u32 %v922_v10, 16  ;;  %v347_v16 = vshll.u32 %v923_v11, 16  ;;  %v926_v27 = vld [vmem:[%s1006_s25 + $0x20] sm:$0xff]   ;;  %v323_v29 = vshll.u32 %v924_v23, 16 }
  0x13   : > { %843 = vmatprep.subr.bf16.mxu0 %v914_v2  ;;  %873 = vmatprep.subr.bf16.mxu1 %v914_v2  ;;  %v312_v12 = vrot.slane %v310_v8, 1  ;;  %v317_v13 = vrot.slane %v315_v9, 1  ;;  %v927_v28 = vld [vmem:[%s1006_s25 + $0x40] sm:$0xff]   ;;  %v355_v30 = vshll.u32 %v925_v24, 16  ;;  %v319_v31 = vshrl.u32 %v921_v5, 16 }
  0x14   : > { %v341_v18 = vrot.slane %v339_v14, 1  ;;  %v349_v20 = vrot.slane %v347_v16, 1  ;;  %v351_v32 = vshrl.u32 %v923_v11, 16  ;;  %v327_v34 = vshrl.u32 %v924_v23, 16 }
  0x15   : > { %v313_v17 = vor.u32 %v312_v12, %v308_v7  ;;  %v331_v35 = vshll.u32 %v926_v27, 16  ;;  %v359_v36 = vshrl.u32 %v925_v24, 16  ;;  %v363_v37 = vshll.u32 %v927_v28, 16  ;;  %v928_v42 = vld [vmem:[%s1006_s25 + $0x48] ss:$0 sps:$4 sm:$0x11]  }
  0x16   : > { %844 = vmatpush3.bf16.msra.mxu0 %v914_v2  ;;  %881 = vmatpush3.bf16.msra.mxu1 %v914_v2  ;;  %v345_v22 = vor.u32 %v343_v15, %v341_v18  ;;  %v325_v38 = vrot.slane %v323_v29, 1  ;;  %v357_v39 = vrot.slane %v355_v30, 1  ;;  %v321_v40 = vor.u32 %v319_v31, %v317_v13 }
  0x17   : > { %845 = vmatprep.subr.bf16.mxu0 %v915_v3  ;;  %874 = vmatprep.subr.bf16.mxu1 %v915_v3  ;;  %v318_v21 = vsel %vm306_vm0, %v313_v17, %v317_v13  ;;  %v353_v41 = vor.u32 %v351_v32, %v349_v20  ;;  %v333_v44 = vrot.slane %v331_v35, 1  ;;  %v365_v46 = vrot.slane %v363_v37, 1 }
  0x18   : > { %855 = vmatprep.mubr.bf16.mxu0 %v318_v21  ;;  %v350_v25 = vsel %vm306_vm0, %v345_v22, %v349_v20  ;;  %v329_v43 = vor.u32 %v327_v34, %v325_v38  ;;  %v361_v45 = vor.u32 %v359_v36, %v357_v39  ;;  %v335_v47 = vshrl.u32 %v926_v27, 16 }
  0x19   : > { %863 = vmatprep.mubr.bf16.mxu1 %v350_v25  ;;  %v326_v48 = vsel %vm306_vm0, %v321_v40, %v325_v38  ;;  %v358_v49 = vsel %vm306_vm0, %v353_v41, %v357_v39  ;;  %v367_v50 = vshrl.u32 %v927_v28, 16  ;;  %v371_v51 = vshll.u32 %v928_v42, 16 }
  0x1a   : > { %846 = vmatpush3.bf16.msra.mxu0 %v915_v3  ;;  %882 = vmatpush3.bf16.msra.mxu1 %v915_v3  ;;  %v334_v52 = vsel %vm306_vm0, %v329_v43, %v333_v44  ;;  %v366_v53 = vsel %vm306_vm0, %v361_v45, %v365_v46  ;;  %v337_v54 = vor.u32 %v335_v47, %v333_v44 }
  0x1b   : > { %847 = vmatprep.subr.bf16.mxu0 %v916_v6  ;;  %875 = vmatprep.subr.bf16.mxu1 %v916_v6  ;;  %v369_v55 = vor.u32 %v367_v50, %v365_v46  ;;  %v373_v56 = vrot.slane %v371_v51, 1 }
  0x1c   : > { %v342_v57 = vsel %vm306_vm0, %v337_v54, %v341_v18 }
  0x1d   : > { %v374_v58 = vsel %vm306_vm0, %v369_v55, %v373_v56 }
  0x1e   : > { %848 = vmatpush3.bf16.msra.mxu0 %v916_v6  ;;  %883 = vmatpush3.bf16.msra.mxu1 %v916_v6 }
  0x1f   : > { %849 = vmatprep.subr.bf16.mxu0 %v917_v19  ;;  %876 = vmatprep.subr.bf16.mxu1 %v917_v19 }
  0x22   : > { %850 = vmatpush3.bf16.msra.mxu0 %v917_v19  ;;  %884 = vmatpush3.bf16.msra.mxu1 %v917_v19 }
  0x23   : > { %851 = vmatprep.subr.bf16.mxu0 %v918_v26  ;;  %877 = vmatprep.subr.bf16.mxu1 %v918_v26 }
  0x26   : > { %852 = vmatpush3.bf16.msra.mxu0 %v918_v26  ;;  %885 = vmatpush3.bf16.msra.mxu1 %v918_v26 }
  0x27   : > { %853 = vmatprep.subr.bf16.mxu0 %v919_v33  ;;  %878 = vmatprep.subr.bf16.mxu1 %v919_v33 }
  0x2a   : > { %854 = vmatpush3.bf16.msra.mxu0 %v919_v33  ;;  %886 = vmatpush3.bf16.msra.mxu1 %v919_v33 }
  0x2d   : > { %856 = vmatmul.mubr.bf16.vlgmr.msra.gmra.mxu0 %v326_v48  ;;  %864 = vmatmul.mubr.bf16.vlgmr.msra.gmra.mxu1 %v358_v49 }
  0x2e   : > { %859 = vmatprep.mubr.bf16.mxu0 %v334_v52  ;;  %867 = vmatprep.mubr.bf16.mxu1 %v366_v53 }
  0x35   : > { %860 = vmatmul.mubr.bf16.gmra.mxu0 %v342_v57  ;;  %868 = vmatmul.mubr.bf16.gmra.mxu1 %v374_v58 }
  0xed   : > { %v857_v59 = vpop.f32.mrf.mxu0  ;;  %v865_v60 = vpop.f32.mrf.mxu1 }
  0xee   : > { %v474_v2 = vadd.f32 %v857_v59, %v723_v61  ;;  %v506_v3 = vadd.f32 %v865_v60, %v723_v61 }
  0xef   : > { %v465_v62 = vpop.f32.mrf.mxu0  ;;  %v497_v63 = vpop.f32.mrf.mxu1 }
  0xf0   : > { %v466_v6 = vadd.f32 %v723_v61, %v465_v62  ;;  %v498_v7 = vadd.f32 %v723_v61, %v497_v63 }
  0xf1   : > { %v858_v0 = vpop.f32.mrf.mxu0  ;;  %v866_v1 = vpop.f32.mrf.mxu1 }
  0xf2   : > { %v477_v4 = vadd.f32 %v858_v0, %v723_v61  ;;  %v509_v5 = vadd.f32 %v866_v1, %v723_v61 }
  0xf3   : > { %v468_v8 = vpop.f32.mrf.mxu0  ;;  %v500_v9 = vpop.f32.mrf.mxu1 }
  0xf4   : > { %v784_v10 = vpack.c.bf16 %v477_v4, %v474_v2  ;;  %v804_v11 = vpack.c.bf16 %v509_v5, %v506_v3  ;;  %v469_v12 = vadd.f32 %v723_v61, %v468_v8  ;;  %v501_v13 = vadd.f32 %v723_v61, %v500_v9 }
  0xf5   : > { %v861_v14 = vpop.f32.mrf.mxu0  ;;  %v869_v15 = vpop.f32.mrf.mxu1 }
  0xf6   : > { %816 = vst [vmem:[%s1047_s18 + $0x8] sm:$0xff] %v784_v10   ;;  %820 = vst [vmem:[%s1047_s18 + $0x28] sm:$0xff] %v804_v11   ;;  %v779_v16 = vpack.c.bf16 %v469_v12, %v466_v6  ;;  %v799_v17 = vpack.c.bf16 %v501_v13, %v498_v7  ;;  %v490_v22 = vadd.f32 %v861_v14, %v723_v61 }
  0xf7   : > { %v481_v18 = vpop.f32.mrf.mxu0  ;;  %v513_v19 = vpop.f32.mrf.mxu1  ;;  %v522_v23 = vadd.f32 %v869_v15, %v723_v61 }
  0xf8   : > { %780 = vst [vmem:[%s1047_s18] sm:$0xff] %v779_v16   ;;  %819 = vst [vmem:[%s1047_s18 + $0x20] sm:$0xff] %v799_v17   ;;  %v482_v26 = vadd.f32 %v723_v61, %v481_v18  ;;  %v514_v27 = vadd.f32 %v723_v61, %v513_v19 }
  0xf9   : > { %v862_v20 = vpop.f32.mrf.mxu0  ;;  %v870_v21 = vpop.f32.mrf.mxu1 }
  0xfa   : > { %v493_v24 = vadd.f32 %v862_v20, %v723_v61  ;;  %v525_v25 = vadd.f32 %v870_v21, %v723_v61 }
  0xfb   : > { %v484_v28 = vpop.f32.mrf.mxu0  ;;  %v516_v29 = vpop.f32.mrf.mxu1 }
  0xfc   : > { %v794_v30 = vpack.c.bf16 %v493_v24, %v490_v22  ;;  %v814_v31 = vpack.c.bf16 %v525_v25, %v522_v23  ;;  %v485_v32 = vadd.f32 %v723_v61, %v484_v28  ;;  %v517_v33 = vadd.f32 %v723_v61, %v516_v29 }
  0xfe   : > { %818 = vst [vmem:[%s1047_s18 + $0x18] sm:$0xff] %v794_v30   ;;  %822 = vst [vmem:[%s1047_s18 + $0x38] sm:$0xff] %v814_v31   ;;  %v789_v34 = vpack.c.bf16 %v485_v32, %v482_v26  ;;  %v809_v35 = vpack.c.bf16 %v517_v33, %v514_v27 }
 0x100   : > { %817 = vst [vmem:[%s1047_s18 + $0x10] sm:$0xff] %v789_v34   ;;  %821 = vst [vmem:[%s1047_s18 + $0x30] sm:$0xff] %v809_v35  }
 0x101 PF: > { %s13_s14 = sadd.s32 1, %s951_s14   ;;  %s1070_s12 = smov %s947_s13 }
 0x102   : > { %p10_p5 = scmp.ge.s32.totalorder %s13_s14, 4   ;;  %s1071_s13 = smov %s1073_s15 }
 0x104   :  { %12 = sbr.rel (!%p10_p5) target bundleno = 2 (0x2), region = 68 }

// kernel: basic_block_forward.5
= control target key start
LH: loop header
LB: loop body
LE: loop exit
PB: predicated region body
PF: predicated region fallthrough
CT: control target
= control target key end

     0   :  { %s4086_s15 = smov 0   ;;  %s4088_s16 = smov 0   ;;  %s5408_s0 = inlined_call_operand.vmem [shape: bf16[2,1,176,128], index: 0, kind: input, shape index: {}]   ;;  %s5409_s1 = inlined_call_operand.vmem [shape: bf16[3,384,128], index: 1, kind: input, shape index: {}]   ;;  %s5410_s2 = inlined_call_operand.vmem [shape: f32[1,128], index: 2, kind: input, shape index: {}]   ;;  %s5411_s3 = inlined_call_operand.vmem [shape: bf16[2,128,128], index: 3, kind: input, shape index: {}]   ;;  %s5412_s4 = inlined_call_operand.vmem [shape: f32[2,128,128], index: 4, kind: output, shape index: {}]  }
   0x1   :  { %s4090_s17 = smov 0  }
   0x2 LB: > { %s26_s18 = sadd.s32 1, %s4055_s16  ;;  %p3255_p0 = scmp.ge.s32.totalorder %s4059_s17, 1  ;;  %s4059_s17 = sphi %s4090_s17, %s14_s17   ;;  %s4055_s16 = sphi %s4088_s16, %s5446_s16   ;;  %s4051_s15 = sphi %s4086_s15, %s5445_s15  }
   0x3   : > { %p28_p1 = scmp.ge.s32.totalorder %s26_s18, 2  ;;  %p208_p2 = scmp.lt.s32.totalorder %s4059_s17, 3 }
   0x5   : > { %s5448_s18 = smov (%p28_p1, %s26_s18), 0  ;;  %p209_p3 = pnand %p3255_p0, %p208_p2 }
   0x7   : > { %212 = sbr.rel (%p209_p3) target bundleno = 516 (0x204), region = 36 }
   0xc   : > { %v3909_v0 = vld [vmem:[%s5409_s1 + $0x138] sm:$0xff]   ;;  %v3912_v3 = vld [vmem:[%s5409_s1 + $0x130] sm:$0xff]   ;;  %v3915_v6 = vld [vmem:[%s5409_s1 + $0x128] sm:$0xff]   ;;  %p252_p4 = scmp.lt.s32.totalorder %s4051_s15, 1  ;;  %vm563_vm0 = vcmask 1042432   ;;  %vm564_vm1 = vcmask 1046532  }
   0xd   : > { %v3910_v1 = vld [vmem:[%s5409_s1 + $0x178] sm:$0xff]   ;;  %3548 = vmatprep.subr.bf16.mxu0 %v3909_v0  ;;  %v3913_v4 = vld [vmem:[%s5409_s1 + $0x170] sm:$0xff]   ;;  %v3916_v7 = vld [vmem:[%s5409_s1 + $0x168] sm:$0xff]   ;;  %vm330_vm3 = vsmask.f32 3328 }
   0xe   : > { %v3911_v2 = vld [vmem:[%s5409_s1 + $0xf8] sm:$0xff]   ;;  %3788 = vmatprep.subr.bf16.mxu1 %v3910_v1  ;;  %v3914_v5 = vld [vmem:[%s5409_s1 + $0xf0] sm:$0xff]   ;;  %v3917_v8 = vld [vmem:[%s5409_s1 + $0xe8] sm:$0xff]   ;;  %s5450_s15 = smov (!%p252_p4, %s4051_s15), 1  ;;  %vm331_vm4 = vsmask.f32 7440 }
   0xf   : > { %3549 = vmatpush3.bf16.msra.mxu0 %v3911_v2  ;;  %3789 = vmatpush3.bf16.msra.mxu1 %v3910_v1  ;;  %v3918_v9 = vld [vmem:[%s5409_s1 + $0x120] sm:$0xff]   ;;  %v3921_v12 = vld [vmem:[%s5409_s1 + $0x118] sm:$0xff]   ;;  %v3924_v15 = vld [vmem:[%s5409_s1 + $0x110] sm:$0xff]   ;;  %s3884_s7 = smul.u32 88, %s5450_s15  ;;  %s3507_s11 = sshll.u32 %s5450_s15, 6 }
  0x10   : > { %3550 = vmatprep.subr.bf16.mxu0 %v3912_v3  ;;  %3790 = vmatprep.subr.bf16.mxu1 %v3913_v4  ;;  %v3919_v10 = vld [vmem:[%s5409_s1 + $0x160] sm:$0xff]   ;;  %v3922_v13 = vld [vmem:[%s5409_s1 + $0x158] sm:$0xff]   ;;  %v3925_v16 = vld [vmem:[%s5409_s1 + $0x150] sm:$0xff]   ;;  %s5283_s14 = scalar_lea.vmem %s5411_s3, %s3507_s11  ;;  %s3508_s21 = sshll.u32 %s5450_s15, 7 }
  0x11   : > { %v3920_v11 = vld [vmem:[%s5409_s1 + $0xe0] sm:$0xff]   ;;  %v3923_v14 = vld [vmem:[%s5409_s1 + $0xd8] sm:$0xff]   ;;  %v3926_v17 = vld [vmem:[%s5409_s1 + $0xd0] sm:$0xff]   ;;  %s4180_s22 = scalar_lea.vmem %s5408_s0, %s3884_s7  ;;  %s5308_s15 = scalar_lea.vmem %s5412_s4, %s3508_s21 }
  0x12   : > { %v3927_v18 = vld [vmem:[%s5409_s1 + $0x108] sm:$0xff]   ;;  %v3930_v21 = vld [vmem:[%s5409_s1 + $0x100] sm:$0xff]   ;;  %vm4188_vm2 = vmor %vm563_vm0, %vm564_vm1 }
  0x13   : > { %3551 = vmatpush3.bf16.msra.mxu0 %v3914_v5  ;;  %3791 = vmatpush3.bf16.msra.mxu1 %v3913_v4  ;;  %v3928_v19 = vld [vmem:[%s5409_s1 + $0x148] sm:$0xff]   ;;  %v529_v22 = vld [vmem:[%s4180_s22] sm:$0xe]  ;;  %v530_v23 = vld [vmem:[%s4180_s22 + $0x4] sm:$0xf] }
  0x14   : > { %3552 = vmatprep.subr.bf16.mxu0 %v3915_v6  ;;  %3792 = vmatprep.subr.bf16.mxu1 %v3916_v7  ;;  %v3929_v20 = vld [vmem:[%s5409_s1 + $0xc8] sm:$0xff]   ;;  %v3931_v25 = vld [vmem:[%s5409_s1 + $0x140] sm:$0xff]   ;;  %v3261_v27 = vrot.slane %v529_v22, 9  ;;  %v568_v28 = vrot.slane %v530_v23, 5  ;;  %v974_v32 = vld [vmem:[%s4180_s22 + $0x10] sm:$0xf] }
  0x15   : > { %v531_v24 = vld [vmem:[%s4180_s22 + $0x8] sm:$0xf]  ;;  %v973_v31 = vld [vmem:[%s4180_s22 + $0xc] sm:$0xf]  ;;  %v3932_v33 = vld [vmem:[%s5409_s1 + $0xc0] sm:$0xff]   ;;  %v1011_v39 = vrot.slane %v974_v32, 5 }
  0x16   : > { %v571_v29 = vrot.slane %v531_v24, 5  ;;  %v972_v30 = vld [vmem:[%s4180_s22 + $0x8] sm:$0xe]  ;;  %v569_v34 = vsel %vm4188_vm2, %v3261_v27, %v568_v28  ;;  %v570_v35 = vrot.slane %v568_v28, 4  ;;  %v1008_v37 = vrot.slane %v973_v31, 5  ;;  %v3937_v42 = vld [vmem:[%s5409_s1 + $0x78] sm:$0xff]   ;;  %vm4239_vm5 = vmor %vm330_vm3, %vm331_vm4 }
  0x17   : > { %3553 = vmatpush3.bf16.msra.mxu0 %v3917_v8  ;;  %3793 = vmatpush3.bf16.msra.mxu1 %v3916_v7  ;;  %v3262_v36 = vrot.slane %v972_v30, 9  ;;  %v2345_v38 = vld [vmem:[%s4180_s22 + $0x10] sm:$0xe]  ;;  %631 = vst [vmem:[#allocation2 + $0x8] sm:$0xf] %v569_v34  ;;  %v4213_v47 = vld [vmem:[%s5409_s1 + $0xb8] sm:$0xff]  }
  0x18   : > { %3554 = vmatprep.subr.bf16.mxu0 %v3918_v9  ;;  %3794 = vmatprep.subr.bf16.mxu1 %v3919_v10  ;;  %v2346_v40 = vld [vmem:[%s4180_s22 + $0x14] sm:$0xf]  ;;  %v2347_v41 = vld [vmem:[%s4180_s22 + $0x18] sm:$0xf]  ;;  %v572_v43 = vsel %vm4188_vm2, %v570_v35, %v571_v29  ;;  %v281_v45 = vld [vmem:[%s4180_s22] sm:$0xf] }
  0x19   : > { %v2381_v44 = vrot.slane %v2346_v40, 5  ;;  %v282_v46 = vld [vmem:[%s4180_s22 + $0x4] sm:$0xf]  ;;  %v4215_v48 = vrot.slane %v571_v29, 4  ;;  %632 = vst [vmem:[#allocation2 + $0x14] sm:$0xf] %v572_v43  ;;  %v1009_v51 = vsel %vm4188_vm2, %v3262_v36, %v1008_v37 }
  0x1a   : > { %297 = vst [vmem:[#allocation2] sm:$0xf] %v281_v45  ;;  %298 = vst [vmem:[#allocation2 + $0xc] sm:$0xf] %v282_v46  ;;  %v313_v49 = vld [vmem:[%s4180_s22] sm:$0xf] }
  0x1b   : > { %3555 = vmatpush3.bf16.msra.mxu0 %v3920_v11  ;;  %3795 = vmatpush3.bf16.msra.mxu1 %v3919_v10  ;;  %v314_v50 = vld [vmem:[%s4180_s22 + $0x4] sm:$0xf]  ;;  %v1010_v52 = vrot.slane %v1008_v37, 4  ;;  %v3407_v53 = vrot.slane %v2345_v38, 9  ;;  %v2384_v54 = vrot.slane %v2347_v41, 5  ;;  %v4222_v56 = vrot.slane %v1011_v39, 4 }
  0x1c   : > { %3556 = vmatprep.subr.bf16.mxu0 %v3921_v12  ;;  %3796 = vmatprep.subr.bf16.mxu1 %v3922_v13  ;;  %v315_v55 = vld [vmem:[%s4180_s22 + $0x8] sm:$0xf]  ;;  %v2383_v57 = vrot.slane %v2381_v44, 4  ;;  %v334_v58 = vshrl.u32 %v313_v49, 16  ;;  %v337_v59 = vshll.u32 %v313_v49, 16  ;;  %v343_v60 = vshll.u32 %v314_v50, 16 }
  0x1d   : > { %v347_v61 = vshrl.u32 %v314_v50, 16  ;;  %v353_v62 = vshll.u32 %v315_v55, 16  ;;  %v357_v1 = vshrl.u32 %v315_v55, 16  ;;  %v1012_v3 = vsel %vm4188_vm2, %v1010_v52, %v1011_v39  ;;  %v759_v10 = vld [vmem:[%s4180_s22 + $0x8] sm:$0xf] }
  0x1e   : > { %v336_v63 = vrot.slane %v334_v58, 4  ;;  %v339_v0 = vrot.slane %v337_v59, 5  ;;  %v4225_v2 = vld [vmem:[#allocation2 + $0x8] sm:$0xf]  ;;  %v4229_v4 = vrot.slane %v2384_v54, 4  ;;  %v345_v5 = vrot.slane %v343_v60, 5 }
  0x1f   : > { %3557 = vmatpush3.bf16.msra.mxu0 %v3923_v14  ;;  %3797 = vmatpush3.bf16.msra.mxu1 %v3922_v13  ;;  %v349_v6 = vrot.slane %v347_v61, 4  ;;  %1071 = vst [vmem:[#allocation2 + $0x8] sm:$0xf] %v1009_v51  ;;  %v355_v8 = vrot.slane %v353_v62, 5  ;;  %v359_v9 = vrot.slane %v357_v1, 4  ;;  %v2382_v13 = vsel %vm4188_vm2, %v3407_v53, %v2381_v44 }
  0x20   : > { %3558 = vmatprep.subr.bf16.mxu0 %v3924_v15  ;;  %3798 = vmatprep.subr.bf16.mxu1 %v3925_v16  ;;  %v340_v7 = vor.u32 %v339_v0, %v336_v63  ;;  %v760_v11 = vld [vmem:[%s4180_s22 + $0xc] sm:$0xf]  ;;  %v4233_v12 = vld [vmem:[#allocation2 + $0x14] sm:$0xf]  ;;  %v2132_v32 = vld [vmem:[%s4180_s22 + $0x10] sm:$0xf] }
  0x21   : > { %v350_v15 = vor.u32 %v349_v6, %v345_v5  ;;  %1072 = vst [vmem:[#allocation2 + $0x14] sm:$0xf] %v1012_v3  ;;  %v790_v22 = vshrl.u32 %v760_v11, 16  ;;  %v360_v29 = vor.u32 %v359_v9, %v355_v8  ;;  %v2133_v37 = vld [vmem:[%s4180_s22 + $0x14] sm:$0xf]  ;;  %v2150_v40 = vshrl.u32 %v2132_v32, 16 }
  0x22   : > { %v2134_v38 = vld [vmem:[%s4180_s22 + $0x18] sm:$0xf]  ;;  %v2153_v41 = vshll.u32 %v2132_v32, 16  ;;  %v532_v43 = vld [vmem:[%s4180_s22 + $0xc] sm:$0xf]  ;;  %v2163_v46 = vshrl.u32 %v2133_v37, 16 }
  0x23   : > { %3559 = vmatpush3.bf16.msra.mxu0 %v3926_v17  ;;  %3799 = vmatpush3.bf16.msra.mxu1 %v3925_v16  ;;  %v761_v16 = vld [vmem:[%s4180_s22 + $0x10] sm:$0xf]  ;;  %v777_v17 = vshrl.u32 %v759_v10, 16  ;;  %v351_v23 = vrot.slane %v350_v15, 4  ;;  %v792_v31 = vrot.slane %v790_v22, 4  ;;  %v2169_v49 = vshll.u32 %v2134_v38, 16 }
  0x24   : > { %3560 = vmatprep.subr.bf16.mxu0 %v3927_v18  ;;  %3800 = vmatprep.subr.bf16.mxu1 %v3928_v19  ;;  %v780_v18 = vshll.u32 %v759_v10, 16  ;;  %v796_v27 = vshll.u32 %v761_v16, 16  ;;  %v800_v36 = vshrl.u32 %v761_v16, 16  ;;  %v2152_v51 = vrot.slane %v2150_v40, 4  ;;  %v727_v60 = vld [vmem:[%s4180_s22 + $0x8] sm:$0xf] }
  0x25   : > { %v779_v24 = vrot.slane %v777_v17, 4  ;;  %v2155_v52 = vrot.slane %v2153_v41, 5  ;;  %v2165_v59 = vrot.slane %v2163_v46, 4  ;;  %v2173_v63 = vshrl.u32 %v2134_v38, 16  ;;  %v975_v1 = vld [vmem:[%s4180_s22 + $0x14] sm:$0xf] }
  0x26   : > { %v798_v35 = vrot.slane %v796_v27, 5  ;;  %v802_v45 = vrot.slane %v800_v36, 4  ;;  %v574_v0 = vrot.slane %v532_v43, 5  ;;  %v728_v3 = vld [vmem:[%s4180_s22 + $0xc] sm:$0xf] }
  0x27   : > { %3561 = vmatpush3.bf16.msra.mxu0 %v3929_v20  ;;  %3801 = vmatpush3.bf16.msra.mxu1 %v3928_v19  ;;  %v2385_v19 = vsel %vm4188_vm2, %v2383_v57, %v2384_v54  ;;  %v341_v20 = vrot.slane %v340_v7, 4  ;;  %v533_v54 = vld [vmem:[%s4180_s22 + $0x10] sm:$0xf]  ;;  %v4257_v57 = vrot.slane %v360_v29, 4  ;;  %v2156_v62 = vor.u32 %v2155_v52, %v2152_v51  ;;  %v976_v16 = vld [vmem:[%s4180_s22 + $0x18] sm:$0xf] }
  0x28   : > { %3562 = vmatprep.subr.bf16.mxu0 %v3930_v21  ;;  %3802 = vmatprep.subr.bf16.mxu1 %v3931_v25  ;;  %v786_v21 = vshll.u32 %v760_v11, 16  ;;  %v3933_v55 = vld [vmem:[#allocation2 + $0x8] ss:$12 sps:$4 sm:$0xff]   ;;  %v803_v58 = vor.u32 %v802_v45, %v798_v35  ;;  %v577_v7 = vrot.slane %v533_v54, 5  ;;  %v4271_v11 = vrot.slane %v2169_v49, 5 }
  0x29   : > { %v346_v28 = vsel %vm4239_vm5, %v341_v20, %v345_v5  ;;  %2444 = vst [vmem:[#allocation2 + $0x8] sm:$0xf] %v2382_v13  ;;  %2445 = vst [vmem:[#allocation2 + $0x14] sm:$0xf] %v2385_v19  ;;  %3804 = vmatprep.mubr.bf16.mxu1 %v3933_v55  ;;  %v575_v13 = vsel %vm4188_vm2, %v4215_v48, %v574_v0  ;;  %v576_v15 = vrot.slane %v574_v0, 4 }
  0x2a   : > { %v788_v30 = vrot.slane %v786_v21, 5  ;;  %513 = vst [vmem:[#allocation2 + $0x4] sm:$0xf] %v346_v28  ;;  %v4269_v10 = vrot.slane %v803_v58, 4  ;;  %633 = vst [vmem:[#allocation2 + $0x20] sm:$0xf] %v575_v13 }
  0x2b   : > { %3563 = vmatpush3.bf16.msra.mxu0 %v3932_v33  ;;  %3803 = vmatpush3.bf16.msra.mxu1 %v3931_v25  ;;  %v782_v25 = vrot.slane %v780_v18, 5  ;;  %v356_v33 = vsel %vm4239_vm5, %v351_v23, %v355_v8  ;;  %v1014_v8 = vrot.slane %v975_v1, 5  ;;  %v2157_v18 = vrot.slane %v2156_v62, 4  ;;  %v4280_v19 = vld [vmem:[%s4180_s22 + $0x1c] sm:$0xf] }
  0x2c   : > { %3628 = vmatprep.subr.bf16.mxu1 %v3937_v42  ;;  %3820 = vmatprep.subr.bf16.mxu0 %v4213_v47  ;;  %514 = vst [vmem:[#allocation2 + $0x10] sm:$0xf] %v356_v33  ;;  %v793_v39 = vor.u32 %v792_v31, %v788_v30  ;;  %v2159_v42 = vshll.u32 %v2133_v37, 16  ;;  %v2175_v21 = vrot.slane %v2173_v63, 4  ;;  %v578_v48 = vsel %vm4188_vm2, %v576_v15, %v577_v7  ;;  %v2100_v29 = vld [vmem:[%s4180_s22 + $0x10] sm:$0xf] }
  0x2d   : > { %v783_v34 = vor.u32 %v782_v25, %v779_v24  ;;  %634 = vst [vmem:[#allocation2 + $0x2c] sm:$0xf] %v578_v48  ;;  %v1016_v22 = vrot.slane %v1014_v8, 4  ;;  %v1017_v23 = vrot.slane %v976_v16, 5  ;;  %v4285_v24 = vld [vmem:[%s4180_s22 + $0x20] sm:$0xf]  ;;  %v1015_v33 = vsel %vm4188_vm2, %v4222_v56, %v1014_v8 }
  0x2e   : > { %v794_v50 = vrot.slane %v793_v39, 4  ;;  %v4254_v53 = vrot.slane %v2159_v42, 5  ;;  %v2387_v25 = vrot.slane %v4280_v19, 5  ;;  %v579_v27 = vrot.slane %v577_v7, 4  ;;  %v977_v36 = vld [vmem:[%s4180_s22 + $0x1c] sm:$0xf] }
  0x2f   : > { %v784_v44 = vrot.slane %v783_v34, 4  ;;  %v534_v34 = vld [vmem:[%s4180_s22 + $0x14] sm:$0xf]  ;;  %v4310_v40 = vld [vmem:[%s4180_s22 + $0x20] sm:$0xf]  ;;  %v1020_v41 = vrot.slane %v977_v36, 5  ;;  %v2176_v43 = vor.u32 %v2175_v21, %v4271_v11  ;;  %v1018_v56 = vsel %vm4188_vm2, %v1016_v22, %v1017_v23 }
  0x30   : > { %v799_v5 = vsel %vm4239_vm5, %v794_v50, %v798_v35  ;;  %v2166_v6 = vor.u32 %v2165_v59, %v4254_v53  ;;  %v2162_v32 = vsel %vm4239_vm5, %v2157_v18, %v4254_v53  ;;  %v4302_v35 = vld [vmem:[%s4180_s22 + $0x18] sm:$0xf]  ;;  %v580_v38 = vrot.slane %v534_v34, 5  ;;  %v4321_v53 = vld [vmem:[%s4180_s22 + $0x24] sm:$0xf] }
  0x31   : > { %v789_v61 = vsel %vm4239_vm5, %v784_v44, %v788_v30  ;;  %v4267_v9 = vld [vmem:[#allocation2] sm:$0xff]  ;;  %v2101_v30 = vld [vmem:[%s4180_s22 + $0x14] sm:$0xf]  ;;  %v583_v39 = vrot.slane %v4302_v35, 5  ;;  %v2389_v45 = vrot.slane %v2387_v25, 4  ;;  %v2390_v46 = vrot.slane %v4285_v24, 5 }
  0x32   : > { %743 = vst [vmem:[#allocation2] sm:$0xf] %v727_v60  ;;  %956 = vst [vmem:[#allocation2 + $0x4] sm:$0xf] %v789_v61  ;;  %v2167_v20 = vrot.slane %v2166_v6, 4  ;;  %v581_v51 = vsel %vm4188_vm2, %v579_v27, %v580_v38  ;;  %v582_v52 = vrot.slane %v580_v38, 4  ;;  %v2388_v8 = vsel %vm4188_vm2, %v4229_v4, %v2387_v25 }
  0x33   : > { %v4277_v17 = vld [vmem:[#allocation2 + $0xc] sm:$0xff]  ;;  %v4313_v44 = vld [vmem:[#allocation2 + $0x20] sm:$0xf]  ;;  %635 = vst [vmem:[#allocation2 + $0x38] sm:$0xf] %v581_v51  ;;  %v1019_v58 = vrot.slane %v1017_v23, 4  ;;  %v2391_v16 = vsel %vm4188_vm2, %v2389_v45, %v2390_v46 }
  0x34   : > { %744 = vst [vmem:[#allocation2 + $0xc] sm:$0xf] %v728_v3  ;;  %957 = vst [vmem:[#allocation2 + $0x10] sm:$0xf] %v799_v5  ;;  %v3360_v28 = vcombine.high %v4267_v9, %v4277_v17  ;;  %v3359_v31 = vcombine.low %v4267_v9, %v4277_v17  ;;  %v2172_v37 = vsel %vm4239_vm5, %v2167_v20, %v4271_v11  ;;  %v4323_v54 = vld [vmem:[#allocation2 + $0x2c] sm:$0xf] }
  0x35   : > { %1073 = vst [vmem:[#allocation2 + $0x20] sm:$0xf] %v1015_v33  ;;  %v1022_v59 = vrot.slane %v1020_v41, 4  ;;  %v1023_v60 = vrot.slane %v4310_v40, 5  ;;  %v3947_v61 = vld [vmem:[%s5409_s1 + $0xb0] sm:$0xff]   ;;  %v584_v62 = vsel %vm4188_vm2, %v582_v52, %v583_v39  ;;  %v4336_v3 = vrot.slane %v2176_v43, 4 }
  0x36   : > { %1074 = vst [vmem:[#allocation2 + $0x2c] sm:$0xf] %v1018_v56  ;;  %v4332_v63 = vld [vmem:[%s4180_s22 + $0x28] sm:$0xf]  ;;  %v284_v1 = vld [vmem:[%s4180_s22 + $0xc] sm:$0xf]  ;;  %v1021_v18 = vsel %vm4188_vm2, %v1019_v58, %v1020_v41 }
  0x37   : > { %v283_v0 = vld [vmem:[%s4180_s22 + $0x8] sm:$0xf]  ;;  %636 = vst [vmem:[#allocation2 + $0x44] sm:$0xf] %v584_v62  ;;  %v2393_v5 = vrot.slane %v4321_v53, 5  ;;  %v1024_v19 = vsel %vm4188_vm2, %v1022_v59, %v1023_v60  ;;  %v2392_v20 = vrot.slane %v2390_v46, 4 }
  0x38   : > { %299 = vst [vmem:[#allocation2 + $0x18] sm:$0xf] %v283_v0  ;;  %300 = vst [vmem:[#allocation2 + $0x24] sm:$0xf] %v284_v1  ;;  %v316_v6 = vld [vmem:[%s4180_s22 + $0xc] sm:$0xf] }
  0x39   : > { %v1087_v42 = vld [vmem:[#allocation2] sm:$0xff]  ;;  %v4341_v7 = vld [vmem:[%s4180_s22 + $0x10] sm:$0xf]  ;;  %v363_v11 = vshll.u32 %v316_v6, 16  ;;  %v367_v13 = vshrl.u32 %v316_v6, 16  ;;  %v2396_v48 = vrot.slane %v4332_v63, 5 }
  0x3a   : > { %2116 = vst [vmem:[#allocation2] sm:$0xf] %v2100_v29  ;;  %v373_v15 = vshll.u32 %v4341_v7, 16  ;;  %v762_v21 = vld [vmem:[%s4180_s22 + $0x14] sm:$0xf]  ;;  %v2395_v25 = vrot.slane %v2393_v5, 4 }
  0x3b   : > { %v1089_v49 = vld [vmem:[#allocation2 + $0xc] sm:$0xff]  ;;  %v4358_v4 = vld [vmem:[%s4180_s22 + $0x18] sm:$0xf]  ;;  %v365_v22 = vrot.slane %v363_v11, 5  ;;  %v369_v23 = vrot.slane %v367_v13, 4  ;;  %v806_v24 = vshll.u32 %v762_v21, 16 }
  0x3c   : > { %v3934_v50 = vld [vmem:[#allocation2 + $0x4] ss:$12 sps:$4 sm:$0xff]   ;;  %2117 = vst [vmem:[#allocation2 + $0xc] sm:$0xf] %v2101_v30  ;;  %v3311_v55 = vcombine.low %v1087_v42, %v1089_v49  ;;  %v4364_v27 = vrot.slane %v373_v15, 5  ;;  %v810_v29 = vshrl.u32 %v762_v21, 16 }
  0x3d   : > { %2329 = vst [vmem:[#allocation2 + $0x4] sm:$0xf] %v2162_v32  ;;  %2330 = vst [vmem:[#allocation2 + $0x10] sm:$0xf] %v2172_v37  ;;  %1472 = vmatprep.mubr.bf16.mxu0 %v3934_v50  ;;  %v585_v30 = vrot.slane %v583_v39, 4  ;;  %v3939_v32 = vld [vmem:[%s5409_s1 + $0x38] sm:$0xff]   ;;  %v366_v35 = vsel %vm4239_vm5, %v4257_v57, %v365_v22  ;;  %v370_v36 = vor.u32 %v369_v23, %v365_v22 }
  0x3e   : > { %1473 = vmatmul.mubr.bf16.vlgmr.msra.gmra.mxu0 %v3311_v55  ;;  %v3940_v33 = vld [vmem:[%s5409_s1 + $0x70] sm:$0xff]   ;;  %v4372_v34 = vld [vmem:[#allocation2 + $0x38] sm:$0xf]  ;;  %v4377_v37 = vrot.slane %v806_v24, 5  ;;  %v816_v38 = vshll.u32 %v4358_v4, 16  ;;  %v377_v41 = vshrl.u32 %v4341_v7, 16  ;;  %v2394_v50 = vsel %vm4188_vm2, %v2392_v20, %v2393_v5 }
  0x3f   : > { %3821 = vmatpush3.bf16.msra.mxu0 %v4213_v47  ;;  %v3956_v47 = vld [vmem:[%s5409_s1 + $0xa8] sm:$0xff]   ;;  %1075 = vst [vmem:[#allocation2 + $0x38] sm:$0xf] %v1021_v18  ;;  %515 = vst [vmem:[#allocation2 + $0x1c] sm:$0xf] %v366_v35  ;;  %v812_v42 = vrot.slane %v810_v29, 4 }
  0x40   : > { %3822 = vmatprep.subr.bf16.mxu0 %v3947_v61  ;;  %v3936_v39 = vld [vmem:[#allocation2 + $0x20] ss:$12 sps:$4 sm:$0xff]   ;;  %v4385_v56 = vld [vmem:[#allocation2 + $0x44] sm:$0xf]  ;;  %v371_v45 = vrot.slane %v370_v36, 4  ;;  %v820_v46 = vshrl.u32 %v4358_v4, 16  ;;  %v809_v7 = vsel %vm4239_vm5, %v4269_v10, %v4377_v37 }
  0x41   : > { %2446 = vst [vmem:[#allocation2 + $0x20] sm:$0xf] %v2388_v8  ;;  %2447 = vst [vmem:[#allocation2 + $0x2c] sm:$0xf] %v2391_v16  ;;  %v2135_v49 = vld [vmem:[%s4180_s22 + $0x1c] sm:$0xf]  ;;  %3805 = vmatmul.mubr.bf16.vlgmr.msra.gmra.mxu1 %v3936_v39  ;;  %v813_v51 = vor.u32 %v812_v42, %v4377_v37 }
  0x42   : > { %1076 = vst [vmem:[#allocation2 + $0x44] sm:$0xf] %v1024_v19  ;;  %v4393_v52 = vld [vmem:[%s4180_s22 + $0x20] sm:$0xf]  ;;  %v2179_v53 = vshll.u32 %v2135_v49, 16  ;;  %v2183_v55 = vshrl.u32 %v2135_v49, 16  ;;  %3629 = vmatpush3.bf16.msra.mxu1 %v3939_v32 }
  0x43   : > { %3823 = vmatpush3.bf16.msra.mxu0 %v3947_v61  ;;  %v536_v58 = vld [vmem:[%s4180_s22 + $0x1c] sm:$0xf]  ;;  %v3941_v59 = vld [vmem:[%s5409_s1 + $0x30] sm:$0xff]   ;;  %v376_v61 = vsel %vm4239_vm5, %v371_v45, %v4364_v27  ;;  %v4403_v0 = vrot.slane %v816_v38, 5  ;;  %v2189_v1 = vshll.u32 %v4393_v52, 16  ;;  %3630 = vmatprep.subr.bf16.mxu1 %v3940_v33  ;;  %v3946_v16 = vld [vmem:[%s5409_s1 + $0x68] sm:$0xff]  }
  0x44   : > { %3824 = vmatprep.subr.bf16.mxu0 %v3956_v47  ;;  %v729_v62 = vld [vmem:[%s4180_s22 + $0x10] sm:$0xf]  ;;  %v537_v5 = vld [vmem:[%s4180_s22 + $0x20] sm:$0xf]  ;;  %v586_v6 = vrot.slane %v536_v58, 5  ;;  %v4411_v8 = vrot.slane %v2179_v53, 5 }
  0x45   : > { %516 = vst [vmem:[#allocation2 + $0x28] sm:$0xf] %v376_v61  ;;  %v2185_v11 = vrot.slane %v2183_v55, 4  ;;  %v589_v13 = vrot.slane %v537_v5, 5  ;;  %v979_v15 = vld [vmem:[%s4180_s22 + $0x24] sm:$0xf] }
  0x46   : > { %v814_v18 = vrot.slane %v813_v51, 4  ;;  %v587_v19 = vsel %vm4188_vm2, %v585_v30, %v586_v6  ;;  %v588_v20 = vrot.slane %v586_v6, 4  ;;  %v4420_v21 = vld [vmem:[%s4180_s22 + $0x28] sm:$0xf]  ;;  %v1026_v4 = vrot.slane %v979_v15, 5  ;;  %v3965_v10 = vld [vmem:[%s5409_s1 + $0xa0] sm:$0xff]   ;;  %3631 = vmatpush3.bf16.msra.mxu1 %v3941_v59 }
  0x47   : > { %3825 = vmatpush3.bf16.msra.mxu0 %v3956_v47  ;;  %v2397_v47 = vsel %vm4188_vm2, %v2395_v25, %v2396_v48  ;;  %v2186_v22 = vor.u32 %v2185_v11, %v4411_v8  ;;  %637 = vst [vmem:[#allocation2 + $0x50] sm:$0xf] %v587_v19  ;;  %v1025_v23 = vrot.slane %v1023_v60, 4  ;;  %v4433_v24 = vld [vmem:[%s4180_s22 + $0x2c] sm:$0xf]  ;;  %v4437_v29 = vrot.slane %v2396_v48, 4  ;;  %3632 = vmatprep.subr.bf16.mxu1 %v3946_v16 }
  0x48   : > { %v3948_v30 = vld [vmem:[%s5409_s1 + $0x28] sm:$0xff]   ;;  %v3949_v25 = vld [vmem:[%s5409_s1 + $0x60] sm:$0xff]   ;;  %v4445_v32 = vld [vmem:[#allocation2 + $0x18] sm:$0xff]  ;;  %v4448_v40 = vrot.slane %v2189_v1, 5  ;;  %v590_v60 = vsel %vm4188_vm2, %v588_v20, %v589_v13  ;;  %v4452_v63 = vrot.slane %v377_v41, 4  ;;  %v4454_v48 = vrot.slane %v820_v46, 4  ;;  %3826 = vmatprep.subr.bf16.mxu0 %v3965_v10 }
  0x49   : > { %v730_v33 = vld [vmem:[%s4180_s22 + $0x14] sm:$0xf]  ;;  %745 = vst [vmem:[#allocation2 + $0x18] sm:$0xf] %v729_v62  ;;  %958 = vst [vmem:[#allocation2 + $0x1c] sm:$0xf] %v809_v7  ;;  %v819_v38 = vsel %vm4239_vm5, %v814_v18, %v4403_v0  ;;  %v1027_v51 = vsel %vm4188_vm2, %v1025_v23, %v1026_v4 }
  0x4a   : > { %638 = vst [vmem:[#allocation2 + $0x5c] sm:$0xf] %v590_v60  ;;  %v1028_v35 = vrot.slane %v1026_v4, 4  ;;  %v1029_v36 = vrot.slane %v4420_v21, 5  ;;  %v3942_v37 = vld [vmem:[#allocation2 + $0x38] ss:$12 sps:$4 sm:$0xff]   ;;  %3633 = vmatpush3.bf16.msra.mxu1 %v3948_v30  ;;  %v380_v5 = vor.u32 %v4452_v63, %v4364_v27  ;;  %v2182_v60 = vsel %vm4239_vm5, %v4336_v3, %v4411_v8 }
  0x4b   : > { %3827 = vmatpush3.bf16.msra.mxu0 %v3965_v10  ;;  %v4460_v39 = vrot.slane %v2186_v22, 4  ;;  %v2399_v41 = vrot.slane %v4433_v24, 5  ;;  %v3950_v42 = vld [vmem:[%s5409_s1 + $0x20] sm:$0xff]   ;;  %2448 = vst [vmem:[#allocation2 + $0x38] sm:$0xf] %v2394_v50  ;;  %v3955_v46 = vld [vmem:[%s5409_s1 + $0x58] sm:$0xff]   ;;  %3808 = vmatprep.mubr.bf16.mxu1 %v3942_v37 }
  0x4c   : > { %2449 = vst [vmem:[#allocation2 + $0x44] sm:$0xf] %v2397_v47  ;;  %v4467_v45 = vld [vmem:[%s4180_s22 + $0x30] sm:$0xf]  ;;  %v4472_v49 = vld [vmem:[#allocation2 + $0x24] sm:$0xff]  ;;  %v591_v53 = vrot.slane %v589_v13, 4  ;;  %3634 = vmatprep.subr.bf16.mxu1 %v3949_v25  ;;  %v1030_v61 = vsel %vm4188_vm2, %v1028_v35, %v1029_v36 }
  0x4d   : > { %746 = vst [vmem:[#allocation2 + $0x24] sm:$0xf] %v730_v33  ;;  %959 = vst [vmem:[#allocation2 + $0x28] sm:$0xf] %v819_v38  ;;  %v3363_v50 = vcombine.high %v4445_v32, %v4472_v49  ;;  %v538_v62 = vld [vmem:[%s4180_s22 + $0x24] sm:$0xf]  ;;  %v2192_v63 = vsel %vm4239_vm5, %v4460_v39, %v4448_v40 }
  0x4e   : > { %v4482_v59 = vld [vmem:[#allocation2 + $0x50] sm:$0xf]  ;;  %v4488_v1 = vld [vmem:[%s4180_s22 + $0x28] sm:$0xf]  ;;  %v3957_v6 = vld [vmem:[%s5409_s1 + $0x18] sm:$0xff]   ;;  %v592_v7 = vrot.slane %v538_v62, 5  ;;  %3635 = vmatpush3.bf16.msra.mxu1 %v3950_v42  ;;  %v823_v62 = vor.u32 %v4454_v48, %v4403_v0 }
  0x4f   : > { %1077 = vst [vmem:[#allocation2 + $0x50] sm:$0xf] %v1027_v51  ;;  %v595_v11 = vrot.slane %v4488_v1, 5  ;;  %v981_v13 = vld [vmem:[%s4180_s22 + $0x2c] sm:$0xf]  ;;  %v2193_v19 = vshrl.u32 %v4393_v52, 16  ;;  %3636 = vmatprep.subr.bf16.mxu1 %v3955_v46 }
  0x50   : > { %v4498_v15 = vld [vmem:[%s4180_s22 + $0x30] sm:$0xf]  ;;  %v2102_v16 = vld [vmem:[%s4180_s22 + $0x18] sm:$0xf]  ;;  %v2103_v18 = vld [vmem:[%s4180_s22 + $0x1c] sm:$0xf]  ;;  %v593_v47 = vsel %vm4188_vm2, %v591_v53, %v592_v7 }
  0x51   : > { %v4503_v20 = vld [vmem:[#allocation2 + $0x5c] sm:$0xf]  ;;  %v2401_v27 = vrot.slane %v2399_v41, 4  ;;  %v2402_v21 = vrot.slane %v4467_v45, 5  ;;  %v1032_v4 = vrot.slane %v981_v13, 5  ;;  %v594_v22 = vrot.slane %v592_v7, 4 }
  0x52   : > { %v1091_v10 = vld [vmem:[#allocation2 + $0x18] sm:$0xff]  ;;  %1078 = vst [vmem:[#allocation2 + $0x5c] sm:$0xf] %v1030_v61  ;;  %v1031_v23 = vrot.slane %v1029_v36, 4  ;;  %v4511_v30 = vld [vmem:[%s4180_s22 + $0x34] sm:$0xf]  ;;  %3637 = vmatpush3.bf16.msra.mxu1 %v3957_v6  ;;  %v2400_v7 = vsel %vm4188_vm2, %v4437_v29, %v2399_v41 }
  0x53   : > { %v3958_v25 = vld [vmem:[%s5409_s1 + $0x50] sm:$0xff]   ;;  %639 = vst [vmem:[#allocation2 + $0x68] sm:$0xf] %v593_v47  ;;  %v1035_v35 = vrot.slane %v4498_v15, 5  ;;  %v4528_v36 = vld [vmem:[%s4180_s22 + $0x38] sm:$0xf]  ;;  %v596_v3 = vsel %vm4188_vm2, %v594_v22, %v595_v11  ;;  %v2403_v24 = vsel %vm4188_vm2, %v2401_v27, %v2402_v21 }
  0x54   : > { %v285_v37 = vld [vmem:[%s4180_s22 + $0x10] sm:$0xf]  ;;  %v381_v38 = vrot.slane %v380_v5, 4  ;;  %v286_v8 = vld [vmem:[%s4180_s22 + $0x14] sm:$0xf]  ;;  %v1093_v46 = vld [vmem:[#allocation2 + $0x24] sm:$0xff]  ;;  %3638 = vmatprep.subr.bf16.mxu1 %v3958_v25 }
  0x55   : > { %v3959_v42 = vld [vmem:[%s5409_s1 + $0x10] sm:$0xff]   ;;  %301 = vst [vmem:[#allocation2 + $0x30] sm:$0xf] %v285_v37  ;;  %v4541_v39 = vld [vmem:[%s4180_s22 + $0x18] sm:$0xf]  ;;  %v1034_v53 = vrot.slane %v1032_v4, 4  ;;  %v3314_v13 = vcombine.low %v1091_v10, %v1093_v46  ;;  %v1033_v10 = vsel %vm4188_vm2, %v1031_v23, %v1032_v4 }
  0x56   : > { %v318_v45 = vld [vmem:[%s4180_s22 + $0x14] sm:$0xf]  ;;  %v3943_v51 = vld [vmem:[#allocation2 + $0x1c] ss:$12 sps:$4 sm:$0xff]   ;;  %640 = vst [vmem:[#allocation2 + $0x74] sm:$0xf] %v596_v3  ;;  %3639 = vmatpush3.bf16.msra.mxu1 %v3959_v42 }
  0x57   : > { %302 = vst [vmem:[#allocation2 + $0x3c] sm:$0xf] %v286_v8  ;;  %v383_v61 = vshll.u32 %v318_v45, 16  ;;  %v3971_v5 = vld [vmem:[%s5409_s1 + $0x98] sm:$0xff]   ;;  %2118 = vst [vmem:[#allocation2 + $0x18] sm:$0xf] %v2102_v16  ;;  %1480 = vmatprep.mubr.bf16.mxu0 %v3943_v51 }
  0x58   : > { %2119 = vst [vmem:[#allocation2 + $0x24] sm:$0xf] %v2103_v18  ;;  %2331 = vst [vmem:[#allocation2 + $0x1c] sm:$0xf] %v2182_v60  ;;  %v387_v47 = vshrl.u32 %v318_v45, 16  ;;  %v393_v0 = vshll.u32 %v4541_v39, 16  ;;  %3828 = vmatprep.subr.bf16.mxu0 %v3971_v5  ;;  %1481 = vmatmul.mubr.bf16.gmra.mxu0 %v3314_v13 }
  0x59   : > { %2332 = vst [vmem:[#allocation2 + $0x28] sm:$0xf] %v2192_v63  ;;  %v3964_v48 = vld [vmem:[%s5409_s1 + $0x48] sm:$0xff]   ;;  %v3974_v6 = vld [vmem:[%s5409_s1 + $0x90] sm:$0xff]   ;;  %v2404_v29 = vrot.slane %v2402_v21, 4  ;;  %v2405_v41 = vrot.slane %v4511_v30, 5  ;;  %v1036_v21 = vsel %vm4188_vm2, %v1034_v53, %v1035_v35  ;;  %3829 = vmatpush3.bf16.msra.mxu0 %v3971_v5 }
  0x5a   : > { %v385_v16 = vrot.slane %v383_v61, 5  ;;  %v3966_v18 = vld [vmem:[%s5409_s1 + $0x8] sm:$0xff]   ;;  %v2408_v22 = vrot.slane %v4528_v36, 5  ;;  %v389_v25 = vrot.slane %v387_v47, 4  ;;  %v764_v60 = vld [vmem:[%s4180_s22 + $0x1c] sm:$0xf]  ;;  %3640 = vmatprep.subr.bf16.mxu1 %v3964_v48  ;;  %3830 = vmatprep.subr.bf16.mxu0 %v3974_v6 }
  0x5b   : > { %v4571_v63 = vld [vmem:[%s4180_s22 + $0x20] sm:$0xf]  ;;  %v3945_v27 = vld [vmem:[#allocation2 + $0x50] ss:$12 sps:$4 sm:$0xff]   ;;  %v826_v37 = vshll.u32 %v764_v60, 16  ;;  %v830_v3 = vshrl.u32 %v764_v60, 16  ;;  %v2406_v48 = vsel %vm4188_vm2, %v2404_v29, %v2405_v41  ;;  %3641 = vmatpush3.bf16.msra.mxu1 %v3966_v18 }
  0x5c   : > { %v386_v30 = vsel %vm4239_vm5, %v381_v38, %v385_v16  ;;  %2450 = vst [vmem:[#allocation2 + $0x50] sm:$0xf] %v2400_v7  ;;  %2451 = vst [vmem:[#allocation2 + $0x5c] sm:$0xf] %v2403_v24  ;;  %v4579_v4 = vld [vmem:[#allocation2 + $0x68] sm:$0xf]  ;;  %v390_v23 = vor.u32 %v389_v25, %v385_v16  ;;  %3809 = vmatmul.mubr.bf16.gmra.mxu1 %v3945_v27 }
  0x5d   : > { %v4581_v8 = vrot.slane %v393_v0, 5  ;;  %517 = vst [vmem:[#allocation2 + $0x34] sm:$0xf] %v386_v30  ;;  %v824_v45 = vrot.slane %v823_v62, 4  ;;  %v836_v46 = vshll.u32 %v4571_v63, 16  ;;  %v3967_v38 = vld [vmem:[%s5409_s1 + $0x40] sm:$0xff]   ;;  %3831 = vmatpush3.bf16.msra.mxu0 %v3974_v6 }
  0x5e   : > { %1079 = vst [vmem:[#allocation2 + $0x68] sm:$0xf] %v1033_v10  ;;  %v2407_v42 = vrot.slane %v2405_v41, 4  ;;  %v397_v51 = vshrl.u32 %v4541_v39, 16  ;;  %v828_v53 = vrot.slane %v826_v37, 5  ;;  %v832_v61 = vrot.slane %v830_v3, 4  ;;  %3642 = vmatprep.subr.bf16.mxu1 %v3967_v38 }
  0x5f   : > { %v2137_v5 = vld [vmem:[%s4180_s22 + $0x24] sm:$0xf]  ;;  %v4592_v7 = vld [vmem:[#allocation2 + $0x74] sm:$0xf]  ;;  %v391_v13 = vrot.slane %v390_v23, 4  ;;  %v4594_v47 = vrot.slane %v836_v46, 5 }
  0x60   : > { %v3968_v62 = vld [vmem:[%s5409_s1] sm:$0xff]   ;;  %v4597_v0 = vld [vmem:[%s4180_s22 + $0x28] sm:$0xf]  ;;  %1080 = vst [vmem:[#allocation2 + $0x74] sm:$0xf] %v1036_v21  ;;  %v833_v24 = vor.u32 %v832_v61, %v828_v53  ;;  %v2195_v16 = vrot.slane %v2193_v19, 4  ;;  %v829_v21 = vsel %vm4239_vm5, %v824_v45, %v828_v53 }
  0x61   : > { %v2199_v10 = vshll.u32 %v2137_v5, 16  ;;  %v540_v25 = vld [vmem:[%s4180_s22 + $0x2c] sm:$0xf]  ;;  %v541_v60 = vld [vmem:[%s4180_s22 + $0x30] sm:$0xf]  ;;  %v396_v27 = vsel %vm4239_vm5, %v391_v13, %v4581_v8  ;;  %v2203_v30 = vshrl.u32 %v2137_v5, 16  ;;  %3643 = vmatpush3.bf16.msra.mxu1 %v3968_v62 }
  0x62   : > { %v2209_v29 = vshll.u32 %v4597_v0, 16  ;;  %v983_v41 = vld [vmem:[%s4180_s22 + $0x34] sm:$0xf]  ;;  %v3977_v52 = vld [vmem:[%s5409_s1 + $0x88] sm:$0xff]   ;;  %518 = vst [vmem:[#allocation2 + $0x40] sm:$0xf] %v396_v27  ;;  %v2196_v18 = vor.u32 %v2195_v16, %v4448_v40  ;;  %v2409_v40 = vsel %vm4188_vm2, %v2407_v42, %v2408_v22 }
  0x63   : > { %v731_v19 = vld [vmem:[%s4180_s22 + $0x18] sm:$0xf]  ;;  %v834_v6 = vrot.slane %v833_v24, 4  ;;  %v4617_v37 = vrot.slane %v2199_v10, 5  ;;  %v597_v3 = vrot.slane %v595_v11, 4  ;;  %v3980_v23 = vld [vmem:[%s5409_s1 + $0x80] sm:$0xff]   ;;  %3832 = vmatprep.subr.bf16.mxu0 %v3977_v52 }
  0x64   : > { %v840_v45 = vshrl.u32 %v4571_v63, 16  ;;  %v2205_v46 = vrot.slane %v2203_v30, 4  ;;  %v598_v38 = vrot.slane %v540_v25, 5  ;;  %v601_v53 = vrot.slane %v541_v60, 5  ;;  %v984_v61 = vld [vmem:[%s4180_s22 + $0x38] sm:$0xf]  ;;  %3833 = vmatpush3.bf16.msra.mxu0 %v3977_v52 }
  0x65   : > { %v4630_v5 = vld [vmem:[#allocation2 + $0x30] sm:$0xff]  ;;  %v4632_v1 = vrot.slane %v2209_v29, 5  ;;  %v2213_v11 = vshrl.u32 %v4597_v0, 16  ;;  %v1038_v13 = vrot.slane %v983_v41, 5  ;;  %v4636_v24 = vld [vmem:[%s4180_s22 + $0x3c] sm:$0xf]  ;;  %3834 = vmatprep.subr.bf16.mxu0 %v3980_v23  ;;  %v839_v27 = vsel %vm4239_vm5, %v834_v6, %v4594_v47 }
  0x66   : > { %v732_v16 = vld [vmem:[%s4180_s22 + $0x1c] sm:$0xf]  ;;  %747 = vst [vmem:[#allocation2 + $0x30] sm:$0xf] %v731_v19  ;;  %960 = vst [vmem:[#allocation2 + $0x34] sm:$0xf] %v829_v21  ;;  %v2206_v25 = vor.u32 %v2205_v46, %v4617_v37  ;;  %v599_v42 = vsel %vm4188_vm2, %v597_v3, %v598_v38 }
  0x67   : > { %v4639_v10 = vrot.slane %v2196_v18, 4  ;;  %v600_v60 = vrot.slane %v598_v38, 4  ;;  %641 = vst [vmem:[#allocation2 + $0x80] sm:$0xf] %v599_v42  ;;  %v1037_v62 = vrot.slane %v1035_v35, 4  ;;  %v1041_v30 = vrot.slane %v984_v61, 5 }
  0x68   : > { %v3951_v29 = vld [vmem:[#allocation2 + $0x68] ss:$12 sps:$4 sm:$0xff]   ;;  %v1040_v41 = vrot.slane %v1038_v13, 4  ;;  %v2357_v52 = vld [vmem:[%s4180_s22 + $0x40] sm:$0xf]  ;;  %v2410_v19 = vrot.slane %v2408_v22, 4  ;;  %3835 = vmatpush3.bf16.msra.mxu0 %v3980_v23 }
  0x69   : > { %v602_v21 = vsel %vm4188_vm2, %v600_v60, %v601_v53  ;;  %2452 = vst [vmem:[#allocation2 + $0x68] sm:$0xf] %v2406_v48  ;;  %2453 = vst [vmem:[#allocation2 + $0x74] sm:$0xf] %v2409_v40  ;;  %v2207_v15 = vrot.slane %v2206_v25, 4  ;;  %v2411_v35 = vrot.slane %v4636_v24, 5  ;;  %3812 = vmatprep.mubr.bf16.mxu1 %v3951_v29  ;;  %v1039_v22 = vsel %vm4188_vm2, %v1037_v62, %v1038_v13 }
  0x6a   : > { %642 = vst [vmem:[#allocation2 + $0x8c] sm:$0xf] %v602_v21  ;;  %v4657_v18 = vld [vmem:[#allocation2 + $0x3c] sm:$0xff]  ;;  %v603_v36 = vrot.slane %v601_v53, 4  ;;  %v542_v48 = vld [vmem:[%s4180_s22 + $0x34] sm:$0xf]  ;;  %v1042_v13 = vsel %vm4188_vm2, %v1040_v41, %v1041_v30 }
  0x6b   : > { %748 = vst [vmem:[#allocation2 + $0x3c] sm:$0xf] %v732_v16  ;;  %961 = vst [vmem:[#allocation2 + $0x40] sm:$0xf] %v839_v27  ;;  %v4663_v3 = vld [vmem:[%s4180_s22 + $0x38] sm:$0xf]  ;;  %v2412_v43 = vsel %vm4188_vm2, %v2410_v19, %v2411_v35 }
  0x6c   : > { %v985_v46 = vld [vmem:[%s4180_s22 + $0x3c] sm:$0xf]  ;;  %v2413_v38 = vrot.slane %v2411_v35, 4  ;;  %v2414_v61 = vrot.slane %v2357_v52, 5  ;;  %v604_v23 = vrot.slane %v542_v48, 5  ;;  %v607_v40 = vrot.slane %v4663_v3, 5 }
  0x6d   : > { %v4668_v24 = vld [vmem:[%s4180_s22 + $0x40] sm:$0xf]  ;;  %v1095_v25 = vld [vmem:[#allocation2 + $0x30] sm:$0xff]  ;;  %v2105_v16 = vld [vmem:[%s4180_s22 + $0x24] sm:$0xf]  ;;  %v1044_v60 = vrot.slane %v985_v46, 5 }
  0x6e   : > { %v2104_v53 = vld [vmem:[%s4180_s22 + $0x20] sm:$0xf]  ;;  %v4677_v27 = vld [vmem:[%s4180_s22 + $0x44] sm:$0xf]  ;;  %v605_v62 = vsel %vm4188_vm2, %v603_v36, %v604_v23  ;;  %v606_v29 = vrot.slane %v604_v23, 4  ;;  %v1043_v21 = vrot.slane %v1041_v30, 4  ;;  %v2212_v36 = vsel %vm4239_vm5, %v2207_v15, %v4632_v1 }
  0x6f   : > { %v4672_v42 = vld [vmem:[#allocation2 + $0x80] sm:$0xf]  ;;  %v1047_v52 = vrot.slane %v4668_v24, 5  ;;  %v4683_v48 = vld [vmem:[%s4180_s22 + $0x48] sm:$0xf]  ;;  %v3981_v41 = vld [vmem:[%s5409_s1 + $0x1f8] sm:$0xff]  }
  0x70   : > { %1081 = vst [vmem:[#allocation2 + $0x80] sm:$0xf] %v1039_v22  ;;  %v2202_v22 = vsel %vm4239_vm5, %v4639_v10, %v4617_v37  ;;  %643 = vst [vmem:[#allocation2 + $0x98] sm:$0xf] %v605_v62  ;;  %v4697_v30 = vrot.slane %v2414_v61, 4  ;;  %v2417_v23 = vrot.slane %v4677_v27, 5  ;;  %v608_v33 = vsel %vm4188_vm2, %v606_v29, %v607_v40  ;;  %3708 = vmatprep.subr.bf16.mxu0 %v3981_v41 }
  0x71   : > { %v4695_v46 = vld [vmem:[#allocation2 + $0x8c] sm:$0xf]  ;;  %v287_v6 = vld [vmem:[%s4180_s22 + $0x18] sm:$0xf]  ;;  %v1046_v37 = vrot.slane %v1044_v60, 4  ;;  %v399_v15 = vrot.slane %v397_v51, 4  ;;  %v1045_v51 = vsel %vm4188_vm2, %v1043_v21, %v1044_v60 }
  0x72   : > { %1082 = vst [vmem:[#allocation2 + $0x8c] sm:$0xf] %v1042_v13  ;;  %v288_v10 = vld [vmem:[%s4180_s22 + $0x1c] sm:$0xf]  ;;  %303 = vst [vmem:[#allocation2 + $0x48] sm:$0xf] %v287_v6  ;;  %v2415_v13 = vsel %vm4188_vm2, %v2413_v38, %v2414_v61  ;;  %v3376_v6 = vcombine.low %v4672_v42, %v4695_v46 }
  0x73   : > { %v320_v58 = vld [vmem:[%s4180_s22 + $0x1c] sm:$0xf]  ;;  %v3952_v57 = vld [vmem:[#allocation2 + $0x34] ss:$12 sps:$4 sm:$0xff]   ;;  %644 = vst [vmem:[#allocation2 + $0xa4] sm:$0xf] %v608_v33  ;;  %v400_v19 = vor.u32 %v399_v15, %v4581_v8 }
  0x74   : > { %v1097_v62 = vld [vmem:[#allocation2 + $0x3c] sm:$0xff]  ;;  %304 = vst [vmem:[#allocation2 + $0x54] sm:$0xf] %v288_v10  ;;  %v403_v55 = vshll.u32 %v320_v58, 16  ;;  %2120 = vst [vmem:[#allocation2 + $0x30] sm:$0xf] %v2104_v53  ;;  %1488 = vmatprep.mubr.bf16.mxu0 %v3952_v57  ;;  %v1048_v57 = vsel %vm4188_vm2, %v1046_v37, %v1047_v52 }
  0x75   : > { %v4714_v29 = vld [vmem:[%s4180_s22 + $0x20] sm:$0xf]  ;;  %2121 = vst [vmem:[#allocation2 + $0x3c] sm:$0xf] %v2105_v16  ;;  %2333 = vst [vmem:[#allocation2 + $0x34] sm:$0xf] %v2202_v22  ;;  %v3317_v39 = vcombine.low %v1095_v25, %v1097_v62 }
  0x76   : > { %2334 = vst [vmem:[#allocation2 + $0x40] sm:$0xf] %v2212_v36  ;;  %v407_v33 = vshrl.u32 %v320_v58, 16  ;;  %v2420_v35 = vrot.slane %v4683_v48, 5  ;;  %v405_v38 = vrot.slane %v403_v55, 5  ;;  %v413_v61 = vshll.u32 %v4714_v29, 16 }
  0x77   : > { %v766_v41 = vld [vmem:[%s4180_s22 + $0x24] sm:$0xf]  ;;  %v842_v53 = vrot.slane %v840_v45, 4  ;;  %1489 = vmatmul.mubr.bf16.gmra.mxu0 %v3317_v39  ;;  %v401_v16 = vrot.slane %v400_v19, 4  ;;  %v4727_v25 = vld [vmem:[%s4180_s22 + $0x28] sm:$0xf] }
  0x78   : > { %v409_v22 = vrot.slane %v407_v33, 4  ;;  %v846_v36 = vshll.u32 %v766_v41, 16  ;;  %v850_v60 = vshrl.u32 %v766_v41, 16  ;;  %v2419_v55 = vrot.slane %v2417_v23, 4  ;;  %v4741_v8 = vld [vmem:[%s5409_s1 + $0x238] sm:$0xff]   ;;  %v4000_v42 = vld [vmem:[%s5409_s1 + $0x188] sm:$0xff]  }
  0x79   : > { %v4735_v58 = vrot.slane %v413_v61, 5  ;;  %v843_v63 = vor.u32 %v842_v53, %v4594_v47  ;;  %v4743_v45 = vld [vmem:[#allocation2 + $0x98] sm:$0xf]  ;;  %v406_v21 = vsel %vm4239_vm5, %v401_v16, %v405_v38  ;;  %v3954_v62 = vld [vmem:[#allocation2 + $0x80] ss:$12 sps:$4 sm:$0xff]   ;;  %v856_v47 = vshll.u32 %v4727_v25, 16  ;;  %3852 = vmatprep.subr.bf16.mxu1 %v4741_v8 }
  0x7a   : > { %v410_v10 = vor.u32 %v409_v22, %v405_v38  ;;  %v848_v15 = vrot.slane %v846_v36, 5  ;;  %v852_v37 = vrot.slane %v850_v60, 4  ;;  %1083 = vst [vmem:[#allocation2 + $0x98] sm:$0xf] %v1045_v51  ;;  %519 = vst [vmem:[#allocation2 + $0x4c] sm:$0xf] %v406_v21  ;;  %3813 = vmatmul.mubr.bf16.gmra.mxu1 %v3954_v62  ;;  %v2418_v51 = vsel %vm4188_vm2, %v4697_v30, %v2417_v23 }
  0x7b   : > { %2454 = vst [vmem:[#allocation2 + $0x80] sm:$0xf] %v2412_v43  ;;  %2455 = vst [vmem:[#allocation2 + $0x8c] sm:$0xf] %v2415_v13  ;;  %v4749_v39 = vld [vmem:[#allocation2 + $0xa4] sm:$0xf]  ;;  %v2421_v0 = vsel %vm4188_vm2, %v2419_v55, %v2420_v35 }
  0x7c   : > { %v411_v19 = vrot.slane %v410_v10, 4  ;;  %v844_v33 = vrot.slane %v843_v63, 4  ;;  %v853_v38 = vor.u32 %v852_v37, %v848_v15  ;;  %v2215_v61 = vrot.slane %v2213_v11, 4  ;;  %1084 = vst [vmem:[#allocation2 + $0xa4] sm:$0xf] %v1048_v57 }
  0x7d   : > { %v2139_v43 = vld [vmem:[%s4180_s22 + $0x2c] sm:$0xf]  ;;  %v4760_v13 = vld [vmem:[%s4180_s22 + $0x30] sm:$0xf]  ;;  %v544_v41 = vld [vmem:[%s4180_s22 + $0x3c] sm:$0xf] }
  0x7e   : > { %v416_v11 = vsel %vm4239_vm5, %v411_v19, %v4735_v58  ;;  %v733_v27 = vld [vmem:[%s4180_s22 + $0x20] sm:$0xf]  ;;  %v2216_v30 = vor.u32 %v2215_v61, %v4632_v1  ;;  %v2219_v23 = vshll.u32 %v2139_v43, 16  ;;  %v4775_v22 = vrot.slane %v856_v47, 5  ;;  %v987_v55 = vld [vmem:[%s4180_s22 + $0x44] sm:$0xf] }
  0x7f   : > { %v545_v16 = vld [vmem:[%s4180_s22 + $0x40] sm:$0x1]  ;;  %520 = vst [vmem:[#allocation2 + $0x58] sm:$0xf] %v416_v11  ;;  %v2223_v36 = vshrl.u32 %v2139_v43, 16  ;;  %v2229_v60 = vshll.u32 %v4760_v13, 16  ;;  %v849_v63 = vsel %vm4239_vm5, %v844_v33, %v848_v15 }
  0x80   : > { %v609_v57 = vrot.slane %v607_v40, 4  ;;  %v854_v21 = vrot.slane %v853_v38, 4  ;;  %v4783_v10 = vrot.slane %v2219_v23, 5  ;;  %v610_v1 = vrot.slane %v544_v41, 5  ;;  %v988_v37 = vld [vmem:[%s4180_s22 + $0x48] sm:$0x1] }
  0x81   : > { %v417_v62 = vshrl.u32 %v4714_v29, 16  ;;  %v860_v47 = vshrl.u32 %v4727_v25, 16  ;;  %v2225_v19 = vrot.slane %v2223_v36, 4  ;;  %v613_v61 = vrot.slane %v545_v16, 5  ;;  %v2360_v43 = vld [vmem:[%s4180_s22 + $0x4c] sm:$0xf] }
  0x82   : > { %v4789_v11 = vld [vmem:[#allocation2 + $0x48] sm:$0xff]  ;;  %v734_v3 = vld [vmem:[%s4180_s22 + $0x24] sm:$0xf]  ;;  %v4792_v40 = vrot.slane %v2216_v30, 4  ;;  %v611_v15 = vsel %vm4188_vm2, %v609_v57, %v610_v1  ;;  %v612_v33 = vrot.slane %v610_v1, 4  ;;  %v1050_v38 = vrot.slane %v987_v55, 5 }
  0x83   : > { %749 = vst [vmem:[#allocation2 + $0x48] sm:$0xf] %v733_v27  ;;  %962 = vst [vmem:[#allocation2 + $0x4c] sm:$0xf] %v849_v63  ;;  %v2226_v41 = vor.u32 %v2225_v19, %v4783_v10  ;;  %v4797_v29 = vrot.slane %v2229_v60, 5  ;;  %v1049_v23 = vrot.slane %v1047_v52, 4  ;;  %v859_v30 = vsel %vm4239_vm5, %v854_v21, %v4775_v22 }
  0x84   : > { %645 = vst [vmem:[#allocation2 + $0xb0] sm:$0xf] %v611_v15  ;;  %v1053_v16 = vrot.slane %v988_v37, 5  ;;  %v3960_v36 = vld [vmem:[#allocation2 + $0x98] ss:$12 sps:$4 sm:$0xff]   ;;  %v614_v27 = vsel %vm4188_vm2, %v612_v33, %v613_v61  ;;  %v2422_v57 = vrot.slane %v2420_v35, 4 }
  0x85   : > { %v2423_v60 = vrot.slane %v2360_v43, 5  ;;  %2456 = vst [vmem:[#allocation2 + $0x98] sm:$0xf] %v2418_v51  ;;  %2457 = vst [vmem:[#allocation2 + $0xa4] sm:$0xf] %v2421_v0  ;;  %v2227_v24 = vrot.slane %v2226_v41, 4  ;;  %3816 = vmatprep.mubr.bf16.mxu1 %v3960_v36  ;;  %v1051_v48 = vsel %vm4188_vm2, %v1049_v23, %v1050_v38 }
  0x86   : > { %646 = vst [vmem:[#allocation2 + $0xbc] sm:$0xf] %v614_v27  ;;  %v1052_v52 = vrot.slane %v1050_v38, 4  ;;  %v4808_v55 = vld [vmem:[#allocation2 + $0x54] sm:$0xff]  ;;  %v2361_v63 = vld [vmem:[%s4180_s22 + $0x50] sm:$0x1] }
  0x87   : > { %v419_v21 = vrot.slane %v417_v62, 4  ;;  %750 = vst [vmem:[#allocation2 + $0x54] sm:$0xf] %v734_v3  ;;  %963 = vst [vmem:[#allocation2 + $0x58] sm:$0xf] %v859_v30  ;;  %v2425_v41 = vrot.slane %v2423_v60, 4  ;;  %v2222_v30 = vsel %vm4239_vm5, %v4792_v40, %v4783_v10 }
  0x88   : > { %v289_v35 = vld [vmem:[%s4180_s22 + $0x20] sm:$0xf]  ;;  %v290_v0 = vld [vmem:[%s4180_s22 + $0x24] sm:$0xf]  ;;  %v4818_v37 = vld [vmem:[%s4180_s22 + $0x28] sm:$0xf]  ;;  %v1054_v62 = vsel %vm4188_vm2, %v1052_v52, %v1053_v16  ;;  %v2232_v16 = vsel %vm4239_vm5, %v2227_v24, %v4797_v29 }
  0x89   : > { %v420_v51 = vor.u32 %v419_v21, %v4735_v58  ;;  %305 = vst [vmem:[#allocation2 + $0x60] sm:$0xf] %v289_v35  ;;  %v322_v1 = vld [vmem:[%s4180_s22 + $0x24] sm:$0xf]  ;;  %v2106_v19 = vld [vmem:[%s4180_s22 + $0x28] sm:$0xf] }
  0x8a   : > { %v2107_v61 = vld [vmem:[%s4180_s22 + $0x2c] sm:$0xf]  ;;  %306 = vst [vmem:[#allocation2 + $0x6c] sm:$0xf] %v290_v0  ;;  %v423_v15 = vshll.u32 %v322_v1, 16  ;;  %v427_v33 = vshrl.u32 %v322_v1, 16 }
  0x8b   : > { %v4822_v43 = vld [vmem:[#allocation2 + $0xb0] sm:$0xf]  ;;  %v421_v3 = vrot.slane %v420_v51, 4  ;;  %v1099_v38 = vld [vmem:[#allocation2 + $0x48] sm:$0xff]  ;;  %v2233_v58 = vshrl.u32 %v4760_v13, 16  ;;  %v2426_v23 = vrot.slane %v2361_v63, 5  ;;  %v2424_v13 = vsel %vm4188_vm2, %v2422_v57, %v2423_v60 }
  0x8c   : > { %1085 = vst [vmem:[#allocation2 + $0xb0] sm:$0xf] %v1051_v48  ;;  %v433_v36 = vshll.u32 %v4818_v37, 16  ;;  %v425_v52 = vrot.slane %v423_v15, 5  ;;  %v429_v21 = vrot.slane %v427_v33, 4  ;;  %v862_v48 = vrot.slane %v860_v47, 4 }
  0x8d   : > { %v4835_v27 = vld [vmem:[#allocation2 + $0xbc] sm:$0xf]  ;;  %v768_v35 = vld [vmem:[%s4180_s22 + $0x2c] sm:$0xf]  ;;  %v769_v63 = vld [vmem:[%s4180_s22 + $0x30] sm:$0xf] }
  0x8e   : > { %1086 = vst [vmem:[#allocation2 + $0xbc] sm:$0xf] %v1054_v62  ;;  %v866_v51 = vshll.u32 %v768_v35, 16  ;;  %v870_v0 = vshrl.u32 %v768_v35, 16  ;;  %v1101_v10 = vld [vmem:[#allocation2 + $0x54] sm:$0xff]  ;;  %v426_v24 = vsel %vm4239_vm5, %v421_v3, %v425_v52  ;;  %v430_v1 = vor.u32 %v429_v21, %v425_v52 }
  0x8f   : > { %v3961_v40 = vld [vmem:[#allocation2 + $0x4c] ss:$12 sps:$4 sm:$0xff]   ;;  %v4845_v15 = vrot.slane %v433_v36, 5  ;;  %v876_v62 = vshll.u32 %v769_v63, 16  ;;  %2122 = vst [vmem:[#allocation2 + $0x48] sm:$0xf] %v2106_v19  ;;  %v3320_v57 = vcombine.low %v1099_v38, %v1101_v10  ;;  %v863_v25 = vor.u32 %v862_v48, %v4775_v22 }
  0x90   : > { %2123 = vst [vmem:[#allocation2 + $0x54] sm:$0xf] %v2107_v61  ;;  %2335 = vst [vmem:[#allocation2 + $0x4c] sm:$0xf] %v2222_v30  ;;  %v868_v47 = vrot.slane %v866_v51, 5  ;;  %v872_v60 = vrot.slane %v870_v0, 4  ;;  %1496 = vmatprep.mubr.bf16.mxu0 %v3961_v40  ;;  %v2427_v3 = vsel %vm4188_vm2, %v2425_v41, %v2426_v23 }
  0x91   : > { %2336 = vst [vmem:[#allocation2 + $0x58] sm:$0xf] %v2232_v16  ;;  %521 = vst [vmem:[#allocation2 + $0x64] sm:$0xf] %v426_v24  ;;  %v431_v33 = vrot.slane %v430_v1, 4  ;;  %v437_v36 = vshrl.u32 %v4818_v37, 16  ;;  %1497 = vmatmul.mubr.bf16.gmra.mxu0 %v3320_v57 }
  0x92   : > { %v2141_v52 = vld [vmem:[%s4180_s22 + $0x34] sm:$0xf]  ;;  %v4853_v19 = vld [vmem:[%s4180_s22 + $0x38] sm:$0xf]  ;;  %v864_v38 = vrot.slane %v863_v25, 4  ;;  %v873_v22 = vor.u32 %v872_v60, %v868_v47  ;;  %v2235_v30 = vrot.slane %v2233_v58, 4 }
  0x93   : > { %v2239_v16 = vshll.u32 %v2141_v52, 16  ;;  %v436_v26 = vsel %vm4239_vm5, %v431_v33, %v4845_v15  ;;  %v735_v41 = vld [vmem:[%s4180_s22 + $0x28] sm:$0xf]  ;;  %v878_v23 = vrot.slane %v876_v62, 5  ;;  %v880_v37 = vshrl.u32 %v769_v63, 16 }
  0x94   : > { %v2243_v21 = vshrl.u32 %v2141_v52, 16  ;;  %522 = vst [vmem:[#allocation2 + $0x70] sm:$0xf] %v436_v26  ;;  %v2249_v48 = vshll.u32 %v4853_v19, 16  ;;  %v291_v51 = vld [vmem:[%s4180_s22 + $0x28] sm:$0xf]  ;;  %v869_v58 = vsel %vm4239_vm5, %v864_v38, %v868_v47  ;;  %v2236_v63 = vor.u32 %v2235_v30, %v4797_v29 }
  0x95   : > { %v4861_v35 = vrot.slane %v2239_v16, 5  ;;  %v3963_v0 = vld [vmem:[#allocation2 + $0xb0] ss:$12 sps:$4 sm:$0xff]   ;;  %v874_v10 = vrot.slane %v873_v22, 4  ;;  %307 = vst [vmem:[#allocation2 + $0x78] sm:$0xf] %v291_v51 }
  0x96   : > { %v2245_v40 = vrot.slane %v2243_v21, 4  ;;  %2458 = vst [vmem:[#allocation2 + $0xb0] sm:$0xf] %v2424_v13  ;;  %2459 = vst [vmem:[#allocation2 + $0xbc] sm:$0xf] %v2427_v3  ;;  %v2253_v24 = vshrl.u32 %v4853_v19, 16  ;;  %3817 = vmatmul.mubr.bf16.gmra.mxu1 %v3963_v0 }
  0x97   : > { %v292_v1 = vld [vmem:[%s4180_s22 + $0x2c] sm:$0xf]  ;;  %v439_v57 = vrot.slane %v437_v36, 4  ;;  %v4874_v60 = vld [vmem:[%s4180_s22 + $0x30] sm:$0xf]  ;;  %v882_v52 = vrot.slane %v880_v37, 4  ;;  %1938 = vmatprep.mubr.bf16.mxu1 %v3360_v28  ;;  %v879_v38 = vsel %vm4239_vm5, %v874_v10, %v878_v23 }
  0x98   : > { %v324_v62 = vld [vmem:[%s4180_s22 + $0x2c] sm:$0xf]  ;;  %v4871_v25 = vld [vmem:[#allocation2 + $0x60] sm:$0xff]  ;;  %308 = vst [vmem:[#allocation2 + $0x84] sm:$0xf] %v292_v1  ;;  %v2246_v29 = vor.u32 %v2245_v40, %v4861_v35  ;;  %v4880_v13 = vrot.slane %v2249_v48, 5 }
  0x99   : > { %v443_v47 = vshll.u32 %v324_v62, 16  ;;  %v447_v33 = vshrl.u32 %v324_v62, 16  ;;  %751 = vst [vmem:[#allocation2 + $0x60] sm:$0xf] %v735_v41  ;;  %964 = vst [vmem:[#allocation2 + $0x64] sm:$0xf] %v869_v58  ;;  %v440_v3 = vor.u32 %v439_v57, %v4845_v15  ;;  %v883_v26 = vor.u32 %v882_v52, %v878_v23 }
  0x9a   : > { %v453_v36 = vshll.u32 %v4874_v60, 16  ;;  %v736_v19 = vld [vmem:[%s4180_s22 + $0x2c] sm:$0xf]  ;;  %v770_v16 = vld [vmem:[%s4180_s22 + $0x34] sm:$0xf]  ;;  %v4888_v37 = vrot.slane %v2236_v63, 4 }
  0x9b   : > { %v445_v22 = vrot.slane %v443_v47, 5  ;;  %v449_v30 = vrot.slane %v447_v33, 4  ;;  %v441_v28 = vrot.slane %v440_v3, 4  ;;  %v4891_v41 = vld [vmem:[%s4180_s22 + $0x38] sm:$0xf]  ;;  %v886_v21 = vshll.u32 %v770_v16, 16 }
  0x9c   : > { %v890_v48 = vshrl.u32 %v770_v16, 16  ;;  %v4893_v51 = vld [vmem:[#allocation2 + $0x6c] sm:$0xff]  ;;  %v4895_v0 = vrot.slane %v453_v36, 5  ;;  %v457_v58 = vshrl.u32 %v4874_v60, 16  ;;  %v896_v10 = vshll.u32 %v4891_v41, 16 }
  0x9d   : > { %v450_v15 = vor.u32 %v449_v30, %v445_v22  ;;  %752 = vst [vmem:[#allocation2 + $0x6c] sm:$0xf] %v736_v19  ;;  %965 = vst [vmem:[#allocation2 + $0x70] sm:$0xf] %v879_v38  ;;  %v2247_v23 = vrot.slane %v2246_v29, 4  ;;  %v446_v40 = vsel %vm4239_vm5, %v441_v28, %v445_v22  ;;  %v4901_v63 = vrot.slane %v886_v21, 5 }
  0x9e   : > { %v892_v1 = vrot.slane %v890_v48, 4  ;;  %v3986_v62 = vld [vmem:[%s5409_s1 + $0x230] sm:$0xff]   ;;  %523 = vst [vmem:[#allocation2 + $0x7c] sm:$0xf] %v446_v40  ;;  %v884_v60 = vrot.slane %v883_v26, 4  ;;  %v2255_v29 = vrot.slane %v2253_v24, 4  ;;  %v3366_v36 = vcombine.high %v4630_v5, %v4657_v18  ;;  %1939 = vmatmul.mubr.bf16.vlgmr.msra.gmra.mxu1 %v3359_v31 }
  0x9f   : > { %v451_v57 = vrot.slane %v450_v15, 4  ;;  %v2143_v47 = vld [vmem:[%s4180_s22 + $0x3c] sm:$0xf]  ;;  %v4908_v33 = vld [vmem:[%s4180_s22 + $0x40] sm:$0xf]  ;;  %v2242_v30 = vsel %vm4239_vm5, %v4888_v37, %v4861_v35  ;;  %v4925_v16 = vrot.slane %v896_v10, 5  ;;  %v2252_v35 = vsel %vm4239_vm5, %v2247_v23, %v4880_v13  ;;  %1946 = vmatprep.mubr.bf16.mxu1 %v3363_v50  ;;  %3853 = vmatpush3.bf16.msra.mxu1 %v4741_v8 }
  0xa0   : > { %v893_v52 = vor.u32 %v892_v1, %v4901_v63  ;;  %v2259_v3 = vshll.u32 %v2143_v47, 16  ;;  %v1103_v19 = vld [vmem:[#allocation2 + $0x60] sm:$0xff]  ;;  %v2108_v38 = vld [vmem:[%s4180_s22 + $0x30] sm:$0xf]  ;;  %v2109_v22 = vld [vmem:[%s4180_s22 + $0x34] sm:$0xf]  ;;  %v2256_v9 = vor.u32 %v2255_v29, %v4880_v13  ;;  %3854 = vmatprep.subr.bf16.mxu1 %v3986_v62  ;;  %v889_v13 = vsel %vm4239_vm5, %v884_v60, %v4901_v63 }
  0xa1   : > { %v456_v24 = vsel %vm4239_vm5, %v451_v57, %v4895_v0  ;;  %v2263_v26 = vshrl.u32 %v2143_v47, 16  ;;  %v293_v28 = vld [vmem:[%s4180_s22 + $0x30] sm:$0xf]  ;;  %v4931_v21 = vld [vmem:[%s5409_s1 + $0x228] sm:$0xff]   ;;  %v2269_v31 = vshll.u32 %v4908_v33, 16  ;;  %v459_v50 = vrot.slane %v457_v58, 4 }
  0xa2   : > { %524 = vst [vmem:[#allocation2 + $0x88] sm:$0xf] %v456_v24  ;;  %v4940_v17 = vrot.slane %v2259_v3, 5  ;;  %v294_v37 = vld [vmem:[%s4180_s22 + $0x34] sm:$0xf]  ;;  %v894_v15 = vrot.slane %v893_v52, 4 }
  0xa3   : > { %309 = vst [vmem:[#allocation2 + $0x90] sm:$0xf] %v293_v28  ;;  %v326_v48 = vld [vmem:[%s4180_s22 + $0x34] sm:$0xf]  ;;  %v2265_v10 = vrot.slane %v2263_v26, 4  ;;  %v900_v57 = vshrl.u32 %v4891_v41, 16  ;;  %v460_v58 = vor.u32 %v459_v50, %v4895_v0  ;;  %3855 = vmatpush3.bf16.msra.mxu1 %v3986_v62 }
  0xa4   : > { %310 = vst [vmem:[#allocation2 + $0x9c] sm:$0xf] %v294_v37  ;;  %v4947_v23 = vld [vmem:[%s4180_s22 + $0x38] sm:$0xf]  ;;  %v463_v40 = vshll.u32 %v326_v48, 16  ;;  %v467_v47 = vshrl.u32 %v326_v48, 16  ;;  %3856 = vmatprep.subr.bf16.mxu1 %v4931_v21 }
  0xa5   : > { %v737_v1 = vld [vmem:[%s4180_s22 + $0x30] sm:$0xf]  ;;  %v473_v29 = vshll.u32 %v4947_v23, 16  ;;  %v738_v52 = vld [vmem:[%s4180_s22 + $0x34] sm:$0xf]  ;;  %v2266_v24 = vor.u32 %v2265_v10, %v4940_v17  ;;  %v2273_v26 = vshrl.u32 %v4908_v33, 16  ;;  %v899_v33 = vsel %vm4239_vm5, %v894_v15, %v4925_v16 }
  0xa6   : > { %v1105_v3 = vld [vmem:[#allocation2 + $0x6c] sm:$0xff]  ;;  %v465_v28 = vrot.slane %v463_v40, 5  ;;  %2124 = vst [vmem:[#allocation2 + $0x60] sm:$0xf] %v2108_v38  ;;  %v4959_v63 = vld [vmem:[#allocation2 + $0x78] sm:$0xff]  ;;  %v4961_v60 = vrot.slane %v2256_v9, 4  ;;  %v5417_v40 = vcombine.low %v4445_v32, %v4472_v49 }
  0xa7   : > { %v3969_v8 = vld [vmem:[#allocation2 + $0x64] ss:$12 sps:$4 sm:$0xff]   ;;  %2125 = vst [vmem:[#allocation2 + $0x6c] sm:$0xf] %v2109_v22  ;;  %v3323_v41 = vcombine.low %v1103_v19, %v1105_v3  ;;  %v4963_v37 = vrot.slane %v2269_v31, 5  ;;  %v469_v48 = vrot.slane %v467_v47, 4  ;;  %3857 = vmatpush3.bf16.msra.mxu1 %v4931_v21  ;;  %v3369_v21 = vcombine.high %v4789_v11, %v4808_v55 }
  0xa8   : > { %2337 = vst [vmem:[#allocation2 + $0x64] sm:$0xf] %v2242_v30  ;;  %2338 = vst [vmem:[#allocation2 + $0x70] sm:$0xf] %v2252_v35  ;;  %v3992_v0 = vld [vmem:[%s5409_s1 + $0x220] sm:$0xff]   ;;  %1504 = vmatprep.mubr.bf16.mxu0 %v3969_v8  ;;  %v461_v19 = vrot.slane %v460_v58, 4  ;;  %v3365_v35 = vcombine.low %v4630_v5, %v4657_v18  ;;  %1947 = vmatmul.mubr.bf16.gmra.mxu1 %v5417_v40 }
  0xa9   : > { %753 = vst [vmem:[#allocation2 + $0x78] sm:$0xf] %v737_v1  ;;  %966 = vst [vmem:[#allocation2 + $0x7c] sm:$0xf] %v889_v13  ;;  %v4971_v38 = vrot.slane %v473_v29, 5  ;;  %1505 = vmatmul.mubr.bf16.gmra.mxu0 %v3323_v41  ;;  %v470_v62 = vor.u32 %v469_v48, %v465_v28  ;;  %v902_v9 = vrot.slane %v900_v57, 4  ;;  %1954 = vmatprep.mubr.bf16.mxu1 %v3366_v36 }
  0xaa   : > { %v772_v22 = vld [vmem:[%s4180_s22 + $0x3c] sm:$0xf]  ;;  %v773_v30 = vld [vmem:[%s4180_s22 + $0x40] sm:$0xf]  ;;  %v4978_v50 = vld [vmem:[#allocation2 + $0x84] sm:$0xff]  ;;  %v4980_v15 = vrot.slane %v2266_v24, 4  ;;  %v466_v1 = vsel %vm4239_vm5, %v461_v19, %v465_v28  ;;  %3858 = vmatprep.subr.bf16.mxu1 %v3992_v0 }
  0xab   : > { %v906_v31 = vshll.u32 %v772_v22, 16  ;;  %v910_v10 = vshrl.u32 %v772_v22, 16  ;;  %v477_v13 = vshrl.u32 %v4947_v23, 16  ;;  %v916_v47 = vshll.u32 %v773_v30, 16  ;;  %754 = vst [vmem:[#allocation2 + $0x84] sm:$0xf] %v738_v52  ;;  %3859 = vmatpush3.bf16.msra.mxu1 %v3992_v0 }
  0xac   : > { %967 = vst [vmem:[#allocation2 + $0x88] sm:$0xf] %v899_v33  ;;  %v471_v57 = vrot.slane %v470_v62, 4  ;;  %525 = vst [vmem:[#allocation2 + $0x94] sm:$0xf] %v466_v1  ;;  %v903_v29 = vor.u32 %v902_v9, %v4925_v16  ;;  %v3995_v23 = vld [vmem:[%s5409_s1 + $0x218] sm:$0xff]   ;;  %v3368_v9 = vcombine.low %v4789_v11, %v4808_v55 }
  0xad   : > { %v908_v32 = vrot.slane %v906_v31, 5  ;;  %v912_v49 = vrot.slane %v910_v10, 4  ;;  %v2145_v3 = vld [vmem:[%s4180_s22 + $0x44] sm:$0xf]  ;;  %v920_v8 = vshrl.u32 %v773_v30, 16  ;;  %v2275_v36 = vrot.slane %v2273_v26, 4  ;;  %3860 = vmatprep.subr.bf16.mxu1 %v3995_v23 }
  0xae   : > { %v4998_v52 = vld [vmem:[%s4180_s22 + $0x48] sm:$0xf]  ;;  %v2279_v24 = vshll.u32 %v2145_v3, 16  ;;  %v2283_v58 = vshrl.u32 %v2145_v3, 16  ;;  %v476_v16 = vsel %vm4239_vm5, %v471_v57, %v4971_v38  ;;  %v904_v28 = vrot.slane %v903_v29, 4  ;;  %v3998_v57 = vld [vmem:[%s5409_s1 + $0x210] sm:$0xff]  }
  0xaf   : > { %v913_v41 = vor.u32 %v912_v49, %v908_v32  ;;  %v2110_v48 = vld [vmem:[%s4180_s22 + $0x38] sm:$0xf]  ;;  %v2111_v33 = vld [vmem:[%s4180_s22 + $0x3c] sm:$0xf]  ;;  %526 = vst [vmem:[#allocation2 + $0xa0] sm:$0xf] %v476_v16  ;;  %v2262_v31 = vsel %vm4239_vm5, %v4961_v60, %v4940_v17  ;;  %v2272_v49 = vsel %vm4239_vm5, %v4980_v15, %v4963_v37  ;;  %v2276_v60 = vor.u32 %v2275_v36, %v4963_v37 }
  0xb0   : > { %v739_v19 = vld [vmem:[%s4180_s22 + $0x38] sm:$0xf]  ;;  %v5008_v22 = vrot.slane %v916_v47, 5  ;;  %v5010_v26 = vrot.slane %v2279_v24, 5  ;;  %v2285_v30 = vrot.slane %v2283_v58, 4  ;;  %v2289_v40 = vshll.u32 %v4998_v52, 16  ;;  %1955 = vmatmul.mubr.bf16.gmra.mxu1 %v3365_v35 }
  0xb1   : > { %v295_v62 = vld [vmem:[%s4180_s22 + $0x38] sm:$0xf]  ;;  %v914_v10 = vrot.slane %v913_v41, 4  ;;  %v296_v1 = vld [vmem:[%s4180_s22 + $0x3c] sm:$0xf]  ;;  %v479_v47 = vrot.slane %v477_v13, 4  ;;  %v909_v17 = vsel %vm4239_vm5, %v904_v28, %v908_v32  ;;  %1962 = vmatprep.mubr.bf16.mxu1 %v3369_v21  ;;  %3861 = vmatpush3.bf16.msra.mxu1 %v3995_v23 }
  0xb2   : > { %311 = vst [vmem:[#allocation2 + $0xa8] sm:$0xf] %v295_v62  ;;  %v1107_v29 = vld [vmem:[#allocation2 + $0x78] sm:$0xff]  ;;  %312 = vst [vmem:[#allocation2 + $0xb4] sm:$0xf] %v296_v1  ;;  %v922_v13 = vrot.slane %v920_v8, 4  ;;  %v2286_v32 = vor.u32 %v2285_v30, %v5010_v26  ;;  %3862 = vmatprep.subr.bf16.mxu1 %v3998_v57 }
  0xb3   : > { %v328_v3 = vld [vmem:[%s4180_s22 + $0x3c] sm:$0xf]  ;;  %v329_v24 = vld [vmem:[%s4180_s22 + $0x40] sm:$0x1]  ;;  %v2293_v58 = vshrl.u32 %v4998_v52, 16  ;;  %v480_v16 = vor.u32 %v479_v47, %v4971_v38  ;;  %v1109_v61 = vld [vmem:[#allocation2 + $0x84] sm:$0xff]  ;;  %v919_v37 = vsel %vm4239_vm5, %v914_v10, %v5008_v22 }
  0xb4   : > { %v740_v0 = vld [vmem:[%s4180_s22 + $0x3c] sm:$0xf]  ;;  %v483_v41 = vshll.u32 %v328_v3, 16  ;;  %v487_v62 = vshrl.u32 %v328_v3, 16  ;;  %v5036_v15 = vld [vmem:[#allocation2 + $0x90] sm:$0xff]  ;;  %v493_v8 = vshll.u32 %v329_v24, 16  ;;  %v923_v38 = vor.u32 %v922_v13, %v5008_v22 }
  0xb5   : > { %v3972_v53 = vld [vmem:[#allocation2 + $0x7c] ss:$12 sps:$4 sm:$0xff]   ;;  %2126 = vst [vmem:[#allocation2 + $0x78] sm:$0xf] %v2110_v48  ;;  %2127 = vst [vmem:[#allocation2 + $0x84] sm:$0xf] %v2111_v33  ;;  %v3326_v52 = vcombine.low %v1107_v29, %v1109_v61  ;;  %v3372_v48 = vcombine.high %v4871_v25, %v4893_v51  ;;  %3863 = vmatpush3.bf16.msra.mxu1 %v3998_v57 }
  0xb6   : > { %2339 = vst [vmem:[#allocation2 + $0x7c] sm:$0xf] %v2262_v31  ;;  %2340 = vst [vmem:[#allocation2 + $0x88] sm:$0xf] %v2272_v49  ;;  %v481_v36 = vrot.slane %v480_v16, 4  ;;  %v485_v28 = vrot.slane %v483_v41, 5  ;;  %1512 = vmatprep.mubr.bf16.mxu0 %v3972_v53 }
  0xb7   : > { %755 = vst [vmem:[#allocation2 + $0x90] sm:$0xf] %v739_v19  ;;  %968 = vst [vmem:[#allocation2 + $0x94] sm:$0xf] %v909_v17  ;;  %v489_v10 = vrot.slane %v487_v62, 4  ;;  %v2277_v5 = vrot.slane %v2276_v60, 4  ;;  %1513 = vmatmul.mubr.bf16.gmra.mxu0 %v3326_v52 }
  0xb8   : > { %v774_v30 = vld [vmem:[%s4180_s22 + $0x44] sm:$0xf]  ;;  %v2291_v18 = vrot.slane %v2289_v40, 5  ;;  %v775_v35 = vld [vmem:[%s4180_s22 + $0x48] sm:$0x1]  ;;  %v5053_v21 = vld [vmem:[#allocation2 + $0x9c] sm:$0xff]  ;;  %v486_v53 = vsel %vm4239_vm5, %v481_v36, %v485_v28  ;;  %1963 = vmatmul.mubr.bf16.gmra.mxu1 %v3368_v9 }
  0xb9   : > { %v926_v1 = vshll.u32 %v774_v30, 16  ;;  %v4001_v61 = vld [vmem:[%s5409_s1 + $0x208] sm:$0xff]   ;;  %v490_v23 = vor.u32 %v489_v10, %v485_v28  ;;  %v495_v33 = vrot.slane %v493_v8, 5  ;;  %v930_v19 = vshrl.u32 %v774_v30, 16  ;;  %756 = vst [vmem:[#allocation2 + $0x9c] sm:$0xf] %v740_v0  ;;  %1970 = vmatprep.mubr.bf16.mxu1 %v3372_v48 }
  0xba   : > { %969 = vst [vmem:[#allocation2 + $0xa0] sm:$0xf] %v919_v37  ;;  %v2287_v22 = vrot.slane %v2286_v32, 4  ;;  %527 = vst [vmem:[#allocation2 + $0xac] sm:$0xf] %v486_v53  ;;  %v936_v40 = vshll.u32 %v775_v35, 16  ;;  %3864 = vmatprep.subr.bf16.mxu1 %v4001_v61  ;;  %v2282_v57 = vsel %vm4239_vm5, %v2277_v5, %v5010_v26  ;;  %v3377_v14 = vcombine.low %v5036_v15, %v5053_v21 }
  0xbb   : > { %v928_v31 = vrot.slane %v926_v1, 5  ;;  %v2147_v47 = vld [vmem:[%s4180_s22 + $0x4c] sm:$0xf]  ;;  %v2295_v29 = vrot.slane %v2293_v58, 4  ;;  %v491_v49 = vrot.slane %v490_v23, 4  ;;  %v924_v17 = vrot.slane %v923_v38, 4  ;;  %3865 = vmatpush3.bf16.msra.mxu1 %v4001_v61 }
  0xbc   : > { %v932_v60 = vrot.slane %v930_v19, 4  ;;  %v2148_v3 = vld [vmem:[%s4180_s22 + $0x50] sm:$0x1]  ;;  %v2299_v24 = vshll.u32 %v2147_v47, 16  ;;  %v2303_v13 = vshrl.u32 %v2147_v47, 16  ;;  %v938_v58 = vrot.slane %v936_v40, 5 }
  0xbd   : > { %v2112_v16 = vld [vmem:[%s4180_s22 + $0x40] sm:$0xf]  ;;  %v2113_v0 = vld [vmem:[%s4180_s22 + $0x44] sm:$0xf]  ;;  %v496_v41 = vsel %vm4239_vm5, %v491_v49, %v495_v33  ;;  %v2296_v32 = vor.u32 %v2295_v29, %v2291_v18  ;;  %v2309_v36 = vshll.u32 %v2148_v3, 16  ;;  %v2292_v28 = vsel %vm4239_vm5, %v2287_v22, %v2291_v18  ;;  %v3982_v3 = vld [vmem:[%s5409_s1 + $0x1b8] sm:$0xff]  }
  0xbe   : > { %v741_v62 = vld [vmem:[%s4180_s22 + $0x40] sm:$0xf]  ;;  %v933_v37 = vor.u32 %v932_v60, %v928_v31  ;;  %v2301_v8 = vrot.slane %v2299_v24, 5  ;;  %v1111_v52 = vld [vmem:[#allocation2 + $0x90] sm:$0xff]  ;;  %528 = vst [vmem:[#allocation2 + $0xb8] sm:$0xf] %v496_v41  ;;  %v929_v10 = vsel %vm4239_vm5, %v924_v17, %v928_v31  ;;  %v3371_v18 = vcombine.low %v4871_v25, %v4893_v51 }
  0xbf   : > { %v2305_v38 = vrot.slane %v2303_v13, 4  ;;  %v4004_v35 = vld [vmem:[%s5409_s1 + $0x200] sm:$0xff]   ;;  %v2297_v53 = vrot.slane %v2296_v32, 4  ;;  %2128 = vst [vmem:[#allocation2 + $0x90] sm:$0xf] %v2112_v16  ;;  %v2311_v5 = vrot.slane %v2309_v36, 5  ;;  %v3375_v61 = vcombine.high %v4959_v63, %v4978_v50 }
  0xc0   : > { %v934_v30 = vrot.slane %v933_v37, 4  ;;  %v742_v9 = vld [vmem:[%s4180_s22 + $0x44] sm:$0xf]  ;;  %3866 = vmatprep.subr.bf16.mxu1 %v4004_v35  ;;  %1971 = vmatmul.mubr.bf16.gmra.mxu1 %v3371_v18  ;;  %v2114_v31 = vld [vmem:[%s4180_s22 + $0x48] sm:$0xf]  ;;  %v3374_v25 = vcombine.low %v4959_v63, %v4978_v50  ;;  %v3378_v29 = vcombine.high %v5036_v15, %v5053_v21  ;;  %v5418_v63 = vcombine.low %v4225_v2, %v4233_v12  ;;  %v3984_v24 = vld [vmem:[%s5409_s1 + $0x1f0] sm:$0xff]  }
  0xc1   : > { %v1113_v1 = vld [vmem:[#allocation2 + $0x9c] sm:$0xff]  ;;  %v675_v55 = vld [vmem:[#allocation2 + $0xa8] sm:$0xff]  ;;  %v2306_v23 = vor.u32 %v2305_v38, %v2301_v8  ;;  %3867 = vmatpush3.bf16.msra.mxu1 %v4004_v35  ;;  %1978 = vmatprep.mubr.bf16.mxu1 %v3375_v61  ;;  %v2302_v51 = vsel %vm4239_vm5, %v2297_v53, %v2301_v8  ;;  %v5419_v13 = vcombine.low %v4313_v44, %v4323_v54  ;;  %v3985_v2 = vld [vmem:[%s5409_s1 + $0x1b0] sm:$0xff]  }
  0xc2   : > { %v3975_v11 = vld [vmem:[#allocation2 + $0x94] ss:$12 sps:$4 sm:$0xff]   ;;  %2129 = vst [vmem:[#allocation2 + $0x9c] sm:$0xf] %v2113_v0  ;;  %v3329_v26 = vcombine.low %v1111_v52, %v1113_v1  ;;  %757 = vst [vmem:[#allocation2 + $0xa8] sm:$0xf] %v741_v62  ;;  %v939_v48 = vsel %vm4239_vm5, %v934_v30, %v938_v58  ;;  %v5420_v12 = vcombine.low %v4372_v34, %v4385_v56 }
  0xc3   : > { %2341 = vst [vmem:[#allocation2 + $0x94] sm:$0xf] %v2282_v57  ;;  %2342 = vst [vmem:[#allocation2 + $0xa0] sm:$0xf] %v2292_v28  ;;  %1520 = vmatprep.mubr.bf16.mxu0 %v3975_v11  ;;  %v2307_v19 = vrot.slane %v2306_v23, 4  ;;  %v3987_v15 = vld [vmem:[%s5409_s1 + $0x1e8] sm:$0xff]   ;;  %v5421_v34 = vcombine.low %v4482_v59, %v4503_v20  ;;  %v5422_v0 = vcombine.low %v4579_v4, %v4592_v7 }
  0xc4   : > { %970 = vst [vmem:[#allocation2 + $0xac] sm:$0xf] %v929_v10  ;;  %1521 = vmatmul.mubr.bf16.gmra.mxu0 %v3329_v26  ;;  %v2115_v40 = vld [vmem:[%s4180_s22 + $0x4c] sm:$0xf]  ;;  %v4008_v16 = vld [vmem:[#allocation2 + $0x8] ss:$12 sps:$4 sm:$0xff]   ;;  %v5423_v7 = vcombine.low %v4743_v45, %v4749_v39  ;;  %v5424_v45 = vcombine.low %v4822_v43, %v4835_v27 }
  0xc5   : > { %v677_v33 = vld [vmem:[#allocation2 + $0xb4] sm:$0xff]  ;;  %v2312_v47 = vsel %vm4239_vm5, %v2307_v19, %v2311_v5  ;;  %v3988_v44 = vld [vmem:[%s5409_s1 + $0x1a8] sm:$0xff]   ;;  %v3990_v54 = vld [vmem:[%s5409_s1 + $0x1e0] sm:$0xff]  }
  0xc6   : > { %758 = vst [vmem:[#allocation2 + $0xb4] sm:$0xf] %v742_v9  ;;  %971 = vst [vmem:[#allocation2 + $0xb8] sm:$0xf] %v939_v48  ;;  %v3381_v50 = vcombine.high %v675_v55, %v677_v33  ;;  %v3380_v21 = vcombine.low %v675_v55, %v677_v33  ;;  %v3991_v56 = vld [vmem:[%s5409_s1 + $0x1a0] sm:$0xff]   ;;  %v3993_v41 = vld [vmem:[%s5409_s1 + $0x1d8] sm:$0xff]  }
  0xc7   : > { %v4009_v62 = vld [vmem:[#allocation2 + $0x20] ss:$12 sps:$4 sm:$0xff]   ;;  %v4016_v37 = vld [vmem:[#allocation2 + $0x38] ss:$12 sps:$4 sm:$0xff]   ;;  %v3996_v20 = vld [vmem:[%s5409_s1 + $0x1d0] sm:$0xff]  }
  0xc8   : > { %1979 = vmatmul.mubr.bf16.gmra.mxu1 %v3374_v25  ;;  %v3994_v59 = vld [vmem:[%s5409_s1 + $0x198] sm:$0xff]   ;;  %v3997_v4 = vld [vmem:[%s5409_s1 + $0x190] sm:$0xff]   ;;  %v3999_v32 = vld [vmem:[%s5409_s1 + $0x1c8] sm:$0xff]  }
  0xc9   : > { %1986 = vmatprep.mubr.bf16.mxu1 %v3378_v29  ;;  %v4017_v8 = vld [vmem:[#allocation2 + $0x50] ss:$12 sps:$4 sm:$0xff]   ;;  %v4024_v52 = vld [vmem:[#allocation2 + $0x68] ss:$12 sps:$4 sm:$0xff]   ;;  %v4003_v39 = vld [vmem:[%s5409_s1 + $0x180] sm:$0xff]  }
  0xca   : > { %v4007_v46 = vld [vmem:[#allocation2 + $0x4] ss:$12 sps:$4 sm:$0xff]   ;;  %v4025_v58 = vld [vmem:[#allocation2 + $0x80] ss:$12 sps:$4 sm:$0xff]   ;;  %v4010_v57 = vld [vmem:[#allocation2 + $0x1c] ss:$12 sps:$4 sm:$0xff]  }
  0xcb   : > { %v1115_v22 = vld [vmem:[#allocation2 + $0xa8] sm:$0xff]  ;;  %v4032_v38 = vld [vmem:[#allocation2 + $0x98] ss:$12 sps:$4 sm:$0xff]   ;;  %v4033_v28 = vld [vmem:[#allocation2 + $0xb0] ss:$12 sps:$4 sm:$0xff]  }
  0xcc   : > { %2130 = vst [vmem:[#allocation2 + $0xa8] sm:$0xf] %v2114_v31  ;;  %v4005_v36 = vld [vmem:[#allocation2] ss:$12 sps:$4 sm:$0xff]   ;;  %v4012_v10 = vld [vmem:[#allocation2 + $0x18] ss:$12 sps:$4 sm:$0xff]  }
  0xcd   : > { %v1117_v49 = vld [vmem:[#allocation2 + $0xb4] sm:$0xff]  ;;  %v4015_v27 = vld [vmem:[#allocation2 + $0x30] ss:$12 sps:$4 sm:$0xff]   ;;  %v4023_v18 = vld [vmem:[#allocation2 + $0x60] ss:$12 sps:$4 sm:$0xff]  }
  0xce   : > { %v3978_v17 = vld [vmem:[#allocation2 + $0xac] ss:$12 sps:$4 sm:$0xff]   ;;  %2131 = vst [vmem:[#allocation2 + $0xb4] sm:$0xf] %v2115_v40  ;;  %v3332_v60 = vcombine.low %v1115_v22, %v1117_v49  ;;  %v4013_v43 = vld [vmem:[#allocation2 + $0x34] ss:$12 sps:$4 sm:$0xff]  }
  0xcf   : > { %2343 = vst [vmem:[#allocation2 + $0xac] sm:$0xf] %v2302_v51  ;;  %2344 = vst [vmem:[#allocation2 + $0xb8] sm:$0xf] %v2312_v47  ;;  %1528 = vmatprep.mubr.bf16.mxu0 %v3978_v17  ;;  %v4018_v30 = vld [vmem:[#allocation2 + $0x4c] ss:$12 sps:$4 sm:$0xff]  }
  0xd0   : > { %1529 = vmatmul.mubr.bf16.gmra.mxu0 %v3332_v60  ;;  %1987 = vmatmul.mubr.bf16.gmra.mxu1 %v3377_v14  ;;  %v4020_v1 = vld [vmem:[#allocation2 + $0x48] ss:$12 sps:$4 sm:$0xff]   ;;  %v4021_v11 = vld [vmem:[#allocation2 + $0x64] ss:$12 sps:$4 sm:$0xff]  }
  0xd1   : > { %3836 = vmatprep.mubr.bf16.mxu0 %v5418_v63  ;;  %1994 = vmatprep.mubr.bf16.mxu1 %v3381_v50  ;;  %v4026_v48 = vld [vmem:[#allocation2 + $0x7c] ss:$12 sps:$4 sm:$0xff]   ;;  %v4028_v40 = vld [vmem:[#allocation2 + $0x78] ss:$12 sps:$4 sm:$0xff]   ;;  %v4029_v25 = vld [vmem:[#allocation2 + $0x94] ss:$12 sps:$4 sm:$0xff]  }
  0xd2   : > { %v4031_v51 = vld [vmem:[#allocation2 + $0x90] ss:$12 sps:$4 sm:$0xff]  }
  0xd5   : > { %v4036_v63 = vld [vmem:[#allocation2 + $0xa8] ss:$12 sps:$4 sm:$0xff]  }
  0xd6   : > { %v4034_v47 = vld [vmem:[#allocation2 + $0xac] ss:$12 sps:$4 sm:$0xff]  }
  0xd8   : > { %3837 = vmatmul.mubr.bf16.vlgmr.msra.gmra.mxu0 %v5419_v13  ;;  %1995 = vmatmul.mubr.bf16.gmra.mxu1 %v3380_v21 }
  0xd9   : > { %3709 = vmatpush3.bf16.msra.mxu0 %v3982_v3  ;;  %3840 = vmatprep.mubr.bf16.mxu0 %v5420_v12 }
  0xda   : > { %3710 = vmatprep.subr.bf16.mxu0 %v3984_v24  ;;  %3868 = vmatprep.mubr.bf16.mxu1 %v4008_v16 }
  0xdd   : > { %3711 = vmatpush3.bf16.msra.mxu0 %v3985_v2 }
  0xde   : > { %3712 = vmatprep.subr.bf16.mxu0 %v3987_v15 }
  0xe0   : > { %3841 = vmatmul.mubr.bf16.gmra.mxu0 %v5421_v34  ;;  %3869 = vmatmul.mubr.bf16.vlgmr.msra.gmra.mxu1 %v4009_v62 }
  0xe1   : > { %3713 = vmatpush3.bf16.msra.mxu0 %v3988_v44  ;;  %3844 = vmatprep.mubr.bf16.mxu0 %v5422_v0 }
  0xe2   : > { %3714 = vmatprep.subr.bf16.mxu0 %v3990_v54  ;;  %3872 = vmatprep.mubr.bf16.mxu1 %v4016_v37 }
  0xe5   : > { %3715 = vmatpush3.bf16.msra.mxu0 %v3991_v56 }
  0xe6   : > { %3716 = vmatprep.subr.bf16.mxu0 %v3993_v41 }
  0xe8   : > { %3845 = vmatmul.mubr.bf16.gmra.mxu0 %v3376_v6  ;;  %v4002_v6 = vld [vmem:[%s5409_s1 + $0x1c0] sm:$0xff]   ;;  %3873 = vmatmul.mubr.bf16.gmra.mxu1 %v4017_v8 }
  0xe9   : > { %3717 = vmatpush3.bf16.msra.mxu0 %v3994_v59  ;;  %3848 = vmatprep.mubr.bf16.mxu0 %v5423_v7 }
  0xea   : > { %3718 = vmatprep.subr.bf16.mxu0 %v3996_v20  ;;  %3876 = vmatprep.mubr.bf16.mxu1 %v4024_v52 }
  0xed   : > { %3719 = vmatpush3.bf16.msra.mxu0 %v3997_v4 }
  0xee   : > { %3720 = vmatprep.subr.bf16.mxu0 %v3999_v32 }
  0xf0   : > { %3849 = vmatmul.mubr.bf16.gmra.mxu0 %v5424_v45  ;;  %3877 = vmatmul.mubr.bf16.gmra.mxu1 %v4025_v58 }
  0xf1   : > { %3721 = vmatpush3.bf16.msra.mxu0 %v4000_v42  ;;  %2845 = vmatprep.mubr.bf16.mxu0 %v4007_v46 }
  0xf2   : > { %3722 = vmatprep.subr.bf16.mxu0 %v4002_v6  ;;  %3880 = vmatprep.mubr.bf16.mxu1 %v4032_v38 }
  0xf5   : > { %3723 = vmatpush3.bf16.msra.mxu0 %v4003_v39 }
  0xf8   : > { %2846 = vmatmul.mubr.bf16.vlgmr.msra.gmra.mxu0 %v4005_v36  ;;  %3881 = vmatmul.mubr.bf16.gmra.mxu1 %v4033_v28 }
  0xf9   : > { %2853 = vmatprep.mubr.bf16.mxu0 %v4010_v57 }
  0xfe   : > { %v3564_v35 = vpop.f32.mrf.mxu0 }
 0x100   : > { %2854 = vmatmul.mubr.bf16.gmra.mxu0 %v4012_v10  ;;  %v3565_v55 = vpop.f32.mrf.mxu0 }
 0x101   : > { %2861 = vmatprep.mubr.bf16.mxu0 %v4013_v43  ;;  %v3566_v9 = vadd.f32 %v3565_v55, %v3564_v35  ;;  %v3806_v5 = vpop.f32.mrf.mxu1 }
 0x102   : > { %v3567_v53 = vpop.f32.mrf.mxu0 }
 0x103   : > { %v1571_v61 = vpop.f32.mrf.mxu1 }
 0x104   : > { %v3568_v23 = vpop.f32.mrf.mxu0  ;;  %v5165_v33 = vadd.f32 %v3566_v9, %v1571_v61 }
 0x105   : > { %v3569_v26 = vadd.f32 %v3568_v23, %v3567_v53  ;;  %v3807_v19 = vpop.f32.mrf.mxu1 }
 0x107   : > { %v1574_v22 = vpop.f32.mrf.mxu1 }
 0x108   : > { %2862 = vmatmul.mubr.bf16.gmra.mxu0 %v4015_v27  ;;  %v5167_v31 = vadd.f32 %v3569_v26, %v1574_v22 }
 0x109   : > { %2869 = vmatprep.mubr.bf16.mxu0 %v4018_v30 }
 0x110   : > { %2870 = vmatmul.mubr.bf16.gmra.mxu0 %v4020_v1 }
 0x111   : > { %2877 = vmatprep.mubr.bf16.mxu0 %v4021_v11 }
 0x118   : > { %2878 = vmatmul.mubr.bf16.gmra.mxu0 %v4023_v18  ;;  %v3570_v29 = vpop.f32.mrf.mxu0 }
 0x119   : > { %2885 = vmatprep.mubr.bf16.mxu0 %v4026_v48 }
 0x11a   : > { %v3571_v49 = vpop.f32.mrf.mxu0 }
 0x11b   : > { %v3572_v17 = vadd.f32 %v3571_v49, %v3570_v29 }
 0x11c   : > { %v3573_v60 = vpop.f32.mrf.mxu0  ;;  %v3810_v13 = vpop.f32.mrf.mxu1 }
 0x11d   : > { %v5169_v14 = vadd.f32 %v3806_v5, %v3572_v17 }
 0x11e   : > { %v3574_v50 = vpop.f32.mrf.mxu0  ;;  %v1587_v2 = vpop.f32.mrf.mxu1 }
 0x11f   : > { %v3575_v3 = vadd.f32 %v3574_v50, %v3573_v60 }
 0x120   : > { %2886 = vmatmul.mubr.bf16.gmra.mxu0 %v4028_v40  ;;  %v3811_v16 = vpop.f32.mrf.mxu1 }
 0x121   : > { %2893 = vmatprep.mubr.bf16.mxu0 %v4029_v25  ;;  %v5171_v24 = vadd.f32 %v3807_v19, %v3575_v3 }
 0x122   : > { %v1590_v0 = vpop.f32.mrf.mxu1 }
 0x128   : > { %2894 = vmatmul.mubr.bf16.gmra.mxu0 %v4031_v51 }
 0x129   : > { %2901 = vmatprep.mubr.bf16.mxu0 %v4034_v47 }
 0x130   : > { %2902 = vmatmul.mubr.bf16.gmra.mxu0 %v4036_v63 }
 0x137   : > { %v3576_v12 = vpop.f32.mrf.mxu0 }
 0x139   : > { %v3577_v15 = vpop.f32.mrf.mxu0 }
 0x13a   : > { %v3578_v21 = vadd.f32 %v3577_v15, %v3576_v12  ;;  %v3814_v62 = vpop.f32.mrf.mxu1 }
 0x13b   : > { %v3579_v44 = vpop.f32.mrf.mxu0 }
 0x13c   : > { %v5173_v54 = vadd.f32 %v3578_v21, %v1587_v2  ;;  %v1603_v37 = vpop.f32.mrf.mxu1 }
 0x13d   : > { %v3580_v34 = vpop.f32.mrf.mxu0 }
 0x13e   : > { %v3581_v56 = vadd.f32 %v3580_v34, %v3579_v44  ;;  %v3815_v59 = vpop.f32.mrf.mxu1 }
 0x140   : > { %v5175_v41 = vadd.f32 %v3581_v56, %v1590_v0  ;;  %v1606_v4 = vpop.f32.mrf.mxu1 }
 0x151   : > { %v3582_v20 = vpop.f32.mrf.mxu0 }
 0x153   : > { %v3583_v7 = vpop.f32.mrf.mxu0 }
 0x154   : > { %v3584_v32 = vadd.f32 %v3583_v7, %v3582_v20 }
 0x155   : > { %v3585_v8 = vpop.f32.mrf.mxu0 }
 0x156   : > { %v3818_v52 = vpop.f32.mrf.mxu1  ;;  %v5177_v42 = vadd.f32 %v3810_v13, %v3584_v32 }
 0x157   : > { %v3586_v46 = vpop.f32.mrf.mxu0 }
 0x158   : > { %v1619_v6 = vpop.f32.mrf.mxu1  ;;  %v3587_v45 = vadd.f32 %v3586_v46, %v3585_v8 }
 0x15a   : > { %v3819_v39 = vpop.f32.mrf.mxu1  ;;  %v5179_v58 = vadd.f32 %v3811_v16, %v3587_v45 }
 0x15c   : > { %v1622_v38 = vpop.f32.mrf.mxu1 }
 0x15e   : > { %v5181_v36 = vpop.f32.mrf.mxu1 }
 0x160   : > { %v5183_v57 = vpop.f32.mrf.mxu1 }
 0x162   : > { %v5185_v28 = vpop.f32.mrf.mxu1 }
 0x164   : > { %v5187_v10 = vpop.f32.mrf.mxu1 }
 0x168   : > { %v5189_v27 = vpop.f32.mrf.mxu1 }
 0x169   : > { %v3588_v43 = vpop.f32.mrf.mxu0 }
 0x16a   : > { %v5191_v1 = vpop.f32.mrf.mxu1 }
 0x16b   : > { %v3589_v30 = vpop.f32.mrf.mxu0 }
 0x16c   : > { %v3590_v35 = vadd.f32 %v3589_v30, %v3588_v43  ;;  %v5195_v9 = vpop.f32.mrf.mxu1 }
 0x16d   : > { %v3591_v11 = vpop.f32.mrf.mxu0 }
 0x16e   : > { %v5193_v55 = vadd.f32 %v3590_v35, %v1603_v37  ;;  %v5197_v26 = vpop.f32.mrf.mxu1 }
 0x16f   : > { %v3592_v53 = vpop.f32.mrf.mxu0 }
 0x170   : > { %v3593_v23 = vadd.f32 %v3592_v53, %v3591_v11  ;;  %v5201_v18 = vpop.f32.mrf.mxu1 }
 0x172   : > { %v5199_v5 = vadd.f32 %v3593_v23, %v1606_v4  ;;  %v5203_v48 = vpop.f32.mrf.mxu1 }
 0x174   : > { %v5205_v19 = vpop.f32.mrf.mxu1 }
 0x176   : > { %v5207_v25 = vpop.f32.mrf.mxu1 }
 0x177   : > { %v3594_v61 = vpop.f32.mrf.mxu0 }
 0x178   : > { %v5211_v29 = vpop.f32.mrf.mxu1 }
 0x179   : > { %v3595_v22 = vpop.f32.mrf.mxu0 }
 0x17a   : > { %v3596_v40 = vadd.f32 %v3595_v22, %v3594_v61  ;;  %v5213_v60 = vpop.f32.mrf.mxu1 }
 0x17b   : > { %v3597_v51 = vpop.f32.mrf.mxu0 }
 0x17c   : > { %v5209_v47 = vadd.f32 %v3814_v62, %v3596_v40  ;;  %v5217_v50 = vpop.f32.mrf.mxu1 }
 0x17d   : > { %v3598_v49 = vpop.f32.mrf.mxu0 }
 0x17e   : > { %v3599_v17 = vadd.f32 %v3598_v49, %v3597_v51  ;;  %v5219_v13 = vpop.f32.mrf.mxu1 }
 0x180   : > { %v5215_v63 = vadd.f32 %v3815_v59, %v3599_v17  ;;  %v5221_v12 = vpop.f32.mrf.mxu1 }
 0x182   : > { %5425 = vst [vmem:[#allocation3_spill] sm:$0xff] %v5215_v63  ;;  %v5223_v16 = vpop.f32.mrf.mxu1 }
 0x184   : > { %v3600_v3 = vpop.f32.mrf.mxu0  ;;  %v5227_v56 = vpop.f32.mrf.mxu1 }
 0x186   : > { %v3601_v2 = vpop.f32.mrf.mxu0  ;;  %v5229_v62 = vpop.f32.mrf.mxu1 }
 0x187   : > { %v3602_v15 = vadd.f32 %v3601_v2, %v3600_v3 }
 0x188   : > { %v3603_v21 = vpop.f32.mrf.mxu0  ;;  %v5233_v59 = vpop.f32.mrf.mxu1 }
 0x189   : > { %v5225_v44 = vadd.f32 %v3602_v15, %v1619_v6 }
 0x18a   : > { %v3604_v34 = vpop.f32.mrf.mxu0  ;;  %v5235_v4 = vpop.f32.mrf.mxu1 }
 0x18b   : > { %5426 = vst [vmem:[#allocation4_spill] sm:$0xff] %v5225_v44  ;;  %v3605_v0 = vadd.f32 %v3604_v34, %v3603_v21 }
 0x18c   : > { %v5237_v32 = vpop.f32.mrf.mxu1 }
 0x18d   : > { %v5231_v37 = vadd.f32 %v3605_v0, %v1622_v38 }
 0x18e   : > { %v5239_v6 = vpop.f32.mrf.mxu1 }
 0x18f   : > { %5427 = vst [vmem:[#allocation5_spill] sm:$0xff] %v5231_v37 }
 0x190   : > { %v3606_v20 = vpop.f32.mrf.mxu0  ;;  %v5241_v30 = vpop.f32.mrf.mxu1 }
 0x192   : > { %v3607_v7 = vpop.f32.mrf.mxu0  ;;  %v5245_v38 = vpop.f32.mrf.mxu1 }
 0x193   : > { %v3608_v8 = vadd.f32 %v3607_v7, %v3606_v20  ;;  %5428 = vst [vmem:[#allocation6_spill] sm:$0xff] %v5245_v38 }
 0x194   : > { %v3609_v46 = vpop.f32.mrf.mxu0  ;;  %v5247_v61 = vpop.f32.mrf.mxu1 }
 0x195   : > { %v1628_v45 = vadd.f32 %v3818_v52, %v3608_v8  ;;  %5429 = vst [vmem:[#allocation7_spill] sm:$0xff] %v5247_v61 }
 0x196   : > { %v3610_v43 = vpop.f32.mrf.mxu0  ;;  %v5251_v40 = vpop.f32.mrf.mxu1 }
 0x197   : > { %v3611_v35 = vadd.f32 %v3610_v43, %v3609_v46  ;;  %5430 = vst [vmem:[#allocation8_spill] sm:$0xff] %v5251_v40 }
 0x198   : > { %v5243_v11 = vpop.f32.mrf.mxu0  ;;  %v3686_v49 = vpop.f32.mrf.mxu1 }
 0x199   : > { %v1631_v53 = vadd.f32 %v3819_v39, %v3611_v35 }
 0x19a   : > { %v2037_v23 = vpop.f32.mrf.mxu0  ;;  %v3687_v3 = vpop.f32.mrf.mxu1 }
 0x19b   : > { %v3688_v34 = vadd.f32 %v3687_v3, %v3686_v49 }
 0x19c   : > { %v5249_v22 = vpop.f32.mrf.mxu0  ;;  %v3689_v21 = vpop.f32.mrf.mxu1 }
 0x19d   : > { %v1997_v8 = vadd.f32 %v3688_v34, %v1628_v45  ;;  %v3646_v45 = vadd.f32 %v5183_v57, %v5181_v36  ;;  %v3652_v57 = vadd.f32 %v5191_v1, %v5189_v27 }
 0x19e   : > { %v2040_v51 = vpop.f32.mrf.mxu0  ;;  %v3690_v20 = vpop.f32.mrf.mxu1 }
 0x19f   : > { %v3691_v46 = vadd.f32 %v3690_v20, %v3689_v21  ;;  %v1949_v27 = vadd.f32 %v3652_v57, %v5169_v14 }
 0x1a0   : > { %v5253_v17 = vpop.f32.mrf.mxu0  ;;  %v3870_v44 = vpop.f32.mrf.mxu1 }
 0x1a1   : > { %v2000_v40 = vadd.f32 %v3691_v46, %v1631_v53  ;;  %v3510_v46 = vld [vmem:[%s5283_s14] sm:$0xff]   ;;  %v2046_v14 = vadd.f32 %v5243_v11, %v1949_v27 }
 0x1a2   : > { %v5255_v52 = vpop.f32.mrf.mxu0  ;;  %v2944_v3 = vpop.f32.mrf.mxu1  ;;  %v3512_v1 = vunpack.c.h.bf16 %v3510_v46 }
 0x1a4   : > { %v5257_v2 = vpop.f32.mrf.mxu0  ;;  %v3871_v34 = vpop.f32.mrf.mxu1 }
 0x1a6   : > { %v5259_v15 = vpop.f32.mrf.mxu0 }
 0x1a8   : > { %v5261_v39 = vpop.f32.mrf.mxu0 }
 0x1aa   : > { %v5263_v0 = vpop.f32.mrf.mxu0 }
 0x1ac   : > { %v5265_v7 = vpop.f32.mrf.mxu0 }
 0x1ae   : > { %v5267_v43 = vpop.f32.mrf.mxu0 }
 0x1b0   : > { %v3850_v35 = vpop.f32.mrf.mxu0 }
 0x1b1   : > { %v5269_v37 = vadd.f32 %v3850_v35, %v1997_v8 }
 0x1b2   : > { %v5271_v61 = vpop.f32.mrf.mxu0 }
 0x1b3   : > { %5431 = vst [vmem:[#allocation9_spill] sm:$0xff] %v5269_v37  ;;  %5432 = vst [vmem:[#allocation10_spill] sm:$0xff] %v5271_v61  ;;  %v3655_v61 = vadd.f32 %v5197_v26, %v5195_v9  ;;  %v3658_v9 = vadd.f32 %v5203_v48, %v5201_v18 }
 0x1b4   : > { %v3851_v63 = vpop.f32.mrf.mxu0 }
 0x1b5   : > { %v5273_v38 = vadd.f32 %v3851_v63, %v2000_v40  ;;  %v3649_v63 = vadd.f32 %v5187_v10, %v5185_v28  ;;  %v1941_v40 = vadd.f32 %v3646_v45, %v5165_v33  ;;  %v3511_v33 = vunpack.c.l.bf16 %v3510_v46 }
 0x1b6   : > { %v5275_v49 = vpop.f32.mrf.mxu0  ;;  %v1957_v18 = vadd.f32 %v3658_v9, %v5173_v54  ;;  %v3664_v54 = vadd.f32 %v5213_v60, %v5211_v29 }
 0x1b7   : > { %5433 = vst [vmem:[#allocation11_spill] sm:$0xff] %v5273_v38  ;;  %5434 = vst [vmem:[#allocation12_spill] sm:$0xff] %v5275_v49  ;;  %v2038_v35 = vadd.f32 %v2037_v23, %v1941_v40  ;;  %v5294_v38 = vld [vmem:[%s5410_s2] ss:$0 sm:$0xff]  ;;  %v2947_v49 = vpop.f32.mrf.mxu1  ;;  %v1944_v28 = vadd.f32 %v3649_v63, %v5167_v31 }
 0x1b8   : > { %v3724_v21 = vpop.f32.mrf.mxu0  ;;  %v1965_v29 = vadd.f32 %v3664_v54, %v5177_v42 }
 0x1ba   : > { %v3725_v53 = vpop.f32.mrf.mxu0 }
 0x1bb   : > { %v3726_v20 = vadd.f32 %v3725_v53, %v3724_v21  ;;  %v2041_v53 = vadd.f32 %v2040_v51, %v1944_v28  ;;  %v1952_v28 = vadd.f32 %v3655_v61, %v5171_v24  ;;  %v3661_v24 = vadd.f32 %v5207_v25, %v5205_v19 }
 0x1bc   : > { %v3727_v8 = vpop.f32.mrf.mxu0 }
 0x1bd   : > { %v2945_v36 = vadd.f32 %v3726_v20, %v2944_v3  ;;  %v5300_v20 = vpop.f32.mrf.mxu1  ;;  %v2049_v11 = vadd.f32 %v5249_v22, %v1952_v28  ;;  %v2054_v22 = vadd.f32 %v5255_v52, %v1957_v18  ;;  %v1960_v19 = vadd.f32 %v3661_v24, %v5175_v41 }
 0x1be   : > { %v3728_v37 = vpop.f32.mrf.mxu0  ;;  %v3667_v41 = vadd.f32 %v5219_v13, %v5217_v50  ;;  %v3670_v18 = vadd.f32 %v5223_v16, %v5221_v12 }
 0x1bf   : > { %v3007_v10 = vadd.f32 %v2945_v36, %v2038_v35  ;;  %v3729_v45 = vadd.f32 %v3728_v37, %v3727_v8  ;;  %v3541_v36 = vld [vmem:[%s5283_s14 + $0x8] sm:$0xff]   ;;  %v2960_v57 = vpop.f32.mrf.mxu1  ;;  %v2057_v52 = vadd.f32 %v5259_v15, %v1960_v19 }
 0x1c0   : > { %v3730_v21 = vpop.f32.mrf.mxu0  ;;  %v3515_v26 = vunpack.c.l.bf16 %v3541_v36  ;;  %v3516_v48 = vunpack.c.h.bf16 %v3541_v36  ;;  %v1968_v13 = vadd.f32 %v3667_v41, %v5179_v58  ;;  %v1973_v12 = vadd.f32 %v3670_v18, %v5193_v55 }
 0x1c1   : > { %v3030_v23 = vadd.f32 %v5294_v38, %v3007_v10  ;;  %v2948_v3 = vadd.f32 %v3729_v45, %v2947_v49  ;;  %v3875_v27 = vpop.f32.mrf.mxu1  ;;  %v3673_v58 = vadd.f32 %v5229_v62, %v5227_v56  ;;  %v3676_v55 = vadd.f32 %v5235_v4, %v5233_v59 }
 0x1c2   : > { %v3731_v40 = vpop.f32.mrf.mxu0 }
 0x1c3   : > { %v3078_v31 = vadd.f32 %v3511_v33, %v3030_v23  ;;  %v3008_v63 = vadd.f32 %v2948_v3, %v2041_v53  ;;  %v3732_v35 = vadd.f32 %v3731_v40, %v3730_v21  ;;  %v1976_v56 = vadd.f32 %v3673_v58, %v5199_v5 }
 0x1c4   : > { %v3733_v37 = vpop.f32.mrf.mxu0  ;;  %v1981_v59 = vadd.f32 %v3676_v55, %v5209_v47  ;;  %v3679_v5 = vadd.f32 %v5239_v6, %v5237_v32  ;;  %v5436_v6 = vld [vmem:[#allocation3_spill] sm:$0xff]  ;;  %v5441_v55 = vld [vmem:[#allocation5_spill] sm:$0xff] }
 0x1c5   : > { %v3094_v51 = vmax.f32 %v3078_v31, 0.0  ;;  %v3031_v49 = vadd.f32 %v5294_v38, %v3008_v63  ;;  %v2953_v8 = vadd.f32 %v3870_v44, %v3732_v35  ;;  %v3542_v31 = vld [vmem:[%s5283_s14 + $0x10] sm:$0xff]  }
 0x1c6   : > { %v3734_v46 = vpop.f32.mrf.mxu0  ;;  %v3519_v36 = vunpack.c.l.bf16 %v3542_v31  ;;  %v3520_v60 = vunpack.c.h.bf16 %v3542_v31 }
 0x1c7   : > { %3110 = vst [vmem:[%s5308_s15] sm:$0xff] %v3094_v51  ;;  %v3079_v10 = vadd.f32 %v3512_v1, %v3031_v49  ;;  %v3009_v33 = vadd.f32 %v2953_v8, %v2046_v14  ;;  %v3735_v45 = vadd.f32 %v3734_v46, %v3733_v37  ;;  %v2963_v51 = vpop.f32.mrf.mxu1 }
 0x1c8   : > { %v3736_v21 = vpop.f32.mrf.mxu0 }
 0x1c9   : > { %v3095_v53 = vmax.f32 %v3079_v10, 0.0  ;;  %v3032_v44 = vadd.f32 %v5294_v38, %v3009_v33  ;;  %v2956_v23 = vadd.f32 %v3871_v34, %v3735_v45  ;;  %v5332_v10 = vpop.f32.mrf.mxu1 }
 0x1ca   : > { %v3737_v3 = vpop.f32.mrf.mxu0 }
 0x1cb   : > { %3111 = vst [vmem:[%s5308_s15 + $0x8] sm:$0xff] %v3095_v53  ;;  %v3080_v61 = vadd.f32 %v3515_v26, %v3032_v44  ;;  %v3010_v1 = vadd.f32 %v2956_v23, %v2049_v11  ;;  %v3738_v40 = vadd.f32 %v3737_v3, %v3736_v21  ;;  %v3543_v11 = vld [vmem:[%s5283_s14 + $0x18] sm:$0xff]   ;;  %v2062_v53 = vadd.f32 %v5253_v17, %v1965_v29  ;;  %v2976_v50 = vpop.f32.mrf.mxu1 }
 0x1cc   : > { %v3739_v63 = vpop.f32.mrf.mxu0  ;;  %v3524_v16 = vunpack.c.h.bf16 %v3543_v11 }
 0x1cd   : > { %v3096_v35 = vmax.f32 %v3080_v61, 0.0  ;;  %v3033_v34 = vadd.f32 %v5294_v38, %v3010_v1  ;;  %v2961_v37 = vadd.f32 %v3738_v40, %v2960_v57  ;;  %v2065_v40 = vadd.f32 %v5257_v2, %v1968_v13 }
 0x1ce   : > { %v3740_v14 = vpop.f32.mrf.mxu0  ;;  %v2070_v2 = vadd.f32 %v5263_v0, %v1973_v12  ;;  %v2073_v0 = vadd.f32 %v5267_v43, %v1976_v56  ;;  %v5439_v12 = vld [vmem:[#allocation8_spill] sm:$0xff] }
 0x1cf   : > { %3112 = vst [vmem:[%s5308_s15 + $0x10] sm:$0xff] %v3096_v35  ;;  %v3081_v25 = vadd.f32 %v3516_v48, %v3033_v34  ;;  %v3011_v49 = vadd.f32 %v2961_v37, %v2054_v22  ;;  %v3741_v8 = vadd.f32 %v3740_v14, %v3739_v63  ;;  %v3523_v48 = vunpack.c.l.bf16 %v3543_v11  ;;  %v3879_v35 = vpop.f32.mrf.mxu1 }
 0x1d0   : > { %v3742_v9 = vpop.f32.mrf.mxu0  ;;  %v2078_v11 = vadd.f32 %v5261_v39, %v1981_v59 }
 0x1d1   : > { %v3097_v26 = vmax.f32 %v3081_v25, 0.0  ;;  %v3034_v46 = vadd.f32 %v5294_v38, %v3011_v49  ;;  %v2964_v57 = vadd.f32 %v3741_v8, %v2963_v51  ;;  %v2979_v8 = vpop.f32.mrf.mxu1 }
 0x1d2   : > { %v3743_v28 = vpop.f32.mrf.mxu0 }
 0x1d3   : > { %3113 = vst [vmem:[%s5308_s15 + $0x18] sm:$0xff] %v3097_v26  ;;  %v3082_v33 = vadd.f32 %v3519_v36, %v3034_v46  ;;  %v3012_v45 = vadd.f32 %v2964_v57, %v2057_v52  ;;  %v3744_v21 = vadd.f32 %v3743_v28, %v3742_v9  ;;  %v3544_v36 = vld [vmem:[%s5283_s14 + $0x20] sm:$0xff]   ;;  %v5361_v28 = vpop.f32.mrf.mxu1 }
 0x1d4   : > { %v3745_v15 = vpop.f32.mrf.mxu0  ;;  %v3527_v25 = vunpack.c.l.bf16 %v3544_v36  ;;  %v3528_v4 = vunpack.c.h.bf16 %v3544_v36 }
 0x1d5   : > { %v3098_v44 = vmax.f32 %v3082_v33, 0.0  ;;  %v3035_v23 = vadd.f32 %v5294_v38, %v3012_v45  ;;  %v2969_v42 = vadd.f32 %v5300_v20, %v3744_v21  ;;  %v3545_v21 = vld [vmem:[%s5283_s14 + $0x28] sm:$0xff]   ;;  %v2992_v32 = vpop.f32.mrf.mxu1 }
 0x1d6   : > { %v3746_v3 = vpop.f32.mrf.mxu0 }
 0x1d7   : > { %3114 = vst [vmem:[%s5308_s15 + $0x20] sm:$0xff] %v3098_v44  ;;  %v3083_v24 = vadd.f32 %v3520_v60, %v3035_v23  ;;  %v3013_v61 = vadd.f32 %v2969_v42, %v2062_v53  ;;  %v3747_v1 = vadd.f32 %v3746_v3, %v3745_v15  ;;  %v5435_v44 = vld [vmem:[#allocation6_spill] sm:$0xff]  ;;  %v3531_v42 = vunpack.c.l.bf16 %v3545_v21 }
 0x1d8   : > { %v3748_v17 = vpop.f32.mrf.mxu0  ;;  %v3682_v23 = vadd.f32 %v5435_v44, %v5241_v30 }
 0x1d9   : > { %v3099_v31 = vmax.f32 %v3083_v24, 0.0  ;;  %v3036_v20 = vadd.f32 %v5294_v38, %v3013_v61  ;;  %v2972_v63 = vadd.f32 %v3875_v27, %v3747_v1 }
 0x1da   : > { %v3749_v22 = vpop.f32.mrf.mxu0 }
 0x1db   : > { %3115 = vst [vmem:[%s5308_s15 + $0x28] sm:$0xff] %v3099_v31  ;;  %v3084_v34 = vadd.f32 %v3523_v48, %v3036_v20  ;;  %v3014_v37 = vadd.f32 %v2972_v63, %v2065_v40  ;;  %v3750_v54 = vadd.f32 %v3749_v22, %v3748_v17  ;;  %v1984_v48 = vadd.f32 %v3679_v5, %v5436_v6  ;;  %v5437_v17 = vld [vmem:[#allocation4_spill] sm:$0xff]  ;;  %v3883_v20 = vpop.f32.mrf.mxu1  ;;  %v5438_v63 = vld [vmem:[#allocation7_spill] sm:$0xff]  ;;  %v3547_v5 = vld [vmem:[%s5283_s14 + $0x38] sm:$0xff]  }
 0x1dc   : > { %v3751_v14 = vpop.f32.mrf.mxu0  ;;  %v1989_v30 = vadd.f32 %v3682_v23, %v5437_v17  ;;  %v3532_v40 = vunpack.c.h.bf16 %v3545_v21  ;;  %v5444_v6 = vld [vmem:[#allocation11_spill] sm:$0xff] }
 0x1dd   : > { %v3100_v51 = vmax.f32 %v3084_v34, 0.0  ;;  %v3037_v27 = vadd.f32 %v5294_v38, %v3014_v37  ;;  %v2977_v19 = vadd.f32 %v3750_v54, %v2976_v50  ;;  %v2081_v24 = vadd.f32 %v5265_v7, %v1984_v48  ;;  %v3546_v37 = vld [vmem:[%s5283_s14 + $0x30] sm:$0xff]   ;;  %v5440_v7 = vld [vmem:[#allocation10_spill] sm:$0xff] }
 0x1de   : > { %v3752_v49 = vpop.f32.mrf.mxu0  ;;  %v2086_v36 = vadd.f32 %v5440_v7, %v1989_v30 }
 0x1df   : > { %3116 = vst [vmem:[%s5308_s15 + $0x30] sm:$0xff] %v3100_v51  ;;  %v3085_v62 = vadd.f32 %v3524_v16, %v3037_v27  ;;  %v3015_v9 = vadd.f32 %v2977_v19, %v2070_v2  ;;  %v3753_v52 = vadd.f32 %v3752_v49, %v3751_v14  ;;  %v3685_v16 = vadd.f32 %v5439_v12, %v5438_v63  ;;  %v2995_v19 = vpop.f32.mrf.mxu1 }
 0x1e0   : > { %v3754_v26 = vpop.f32.mrf.mxu0  ;;  %v3535_v51 = vunpack.c.l.bf16 %v3546_v37 }
 0x1e1   : > { %v3101_v46 = vmax.f32 %v3085_v62, 0.0  ;;  %v3038_v57 = vadd.f32 %v5294_v38, %v3015_v9  ;;  %v2980_v29 = vadd.f32 %v3753_v52, %v2979_v8  ;;  %v5442_v9 = vld [vmem:[#allocation12_spill] sm:$0xff] }
 0x1e2   : > { %v3755_v60 = vpop.f32.mrf.mxu0 }
 0x1e3   : > { %3117 = vst [vmem:[%s5308_s15 + $0x38] sm:$0xff] %v3101_v46  ;;  %v3086_v41 = vadd.f32 %v3527_v25, %v3038_v57  ;;  %v3016_v33 = vadd.f32 %v2980_v29, %v2073_v0  ;;  %v3756_v45 = vadd.f32 %v3755_v60, %v3754_v26  ;;  %v1992_v25 = vadd.f32 %v3685_v16, %v5441_v55 }
 0x1e4   : > { %v3757_v43 = vpop.f32.mrf.mxu0 }
 0x1e5   : > { %v3102_v15 = vmax.f32 %v3086_v41, 0.0  ;;  %v3039_v53 = vadd.f32 %v5294_v38, %v3016_v33  ;;  %v2985_v47 = vadd.f32 %v5332_v10, %v3756_v45  ;;  %v2089_v52 = vadd.f32 %v5442_v9, %v1992_v25 }
 0x1e6   : > { %v3758_v18 = vpop.f32.mrf.mxu0 }
 0x1e7   : > { %3118 = vst [vmem:[%s5308_s15 + $0x40] sm:$0xff] %v3102_v15  ;;  %v3087_v3 = vadd.f32 %v3528_v4, %v3039_v53  ;;  %v3017_v50 = vadd.f32 %v2985_v47, %v2078_v11  ;;  %v3759_v13 = vadd.f32 %v3758_v18, %v3757_v43  ;;  %v3536_v4 = vunpack.c.h.bf16 %v3546_v37  ;;  %v5443_v15 = vld [vmem:[#allocation9_spill] sm:$0xff] }
 0x1e8   : > { %v3760_v39 = vpop.f32.mrf.mxu0  ;;  %v3539_v47 = vunpack.c.l.bf16 %v3547_v5 }
 0x1e9   : > { %v3103_v61 = vmax.f32 %v3087_v3, 0.0  ;;  %v3040_v10 = vadd.f32 %v5294_v38, %v3017_v50  ;;  %v2988_v1 = vadd.f32 %v3879_v35, %v3759_v13  ;;  %v3540_v3 = vunpack.c.h.bf16 %v3547_v5 }
 0x1ea   : > { %v3761_v31 = vpop.f32.mrf.mxu0 }
 0x1eb   : > { %3119 = vst [vmem:[%s5308_s15 + $0x48] sm:$0xff] %v3103_v61  ;;  %v3088_v22 = vadd.f32 %v3531_v42, %v3040_v10  ;;  %v3018_v58 = vadd.f32 %v2988_v1, %v2081_v24  ;;  %v3762_v34 = vadd.f32 %v3761_v31, %v3760_v39 }
 0x1ec   : > { %v3763_v54 = vpop.f32.mrf.mxu0 }
 0x1ed   : > { %v3104_v14 = vmax.f32 %v3088_v22, 0.0  ;;  %v3041_v35 = vadd.f32 %v5294_v38, %v3018_v58  ;;  %v2993_v2 = vadd.f32 %v3762_v34, %v2992_v32 }
 0x1ee   : > { %v3764_v27 = vpop.f32.mrf.mxu0 }
 0x1ef   : > { %3120 = vst [vmem:[%s5308_s15 + $0x50] sm:$0xff] %v3104_v14  ;;  %v3089_v49 = vadd.f32 %v3532_v40, %v3041_v35  ;;  %v3019_v8 = vadd.f32 %v2993_v2, %v2086_v36  ;;  %v3765_v56 = vadd.f32 %v3764_v27, %v3763_v54 }
 0x1f0   : > { %v3766_v62 = vpop.f32.mrf.mxu0 }
 0x1f1   : > { %v3105_v26 = vmax.f32 %v3089_v49, 0.0  ;;  %v3042_v0 = vadd.f32 %v5294_v38, %v3019_v8  ;;  %v2996_v46 = vadd.f32 %v3765_v56, %v2995_v19 }
 0x1f2   : > { %v3767_v57 = vpop.f32.mrf.mxu0 }
 0x1f3   : > { %3121 = vst [vmem:[%s5308_s15 + $0x58] sm:$0xff] %v3105_v26  ;;  %v3090_v29 = vadd.f32 %v3535_v51, %v3042_v0  ;;  %v3020_v59 = vadd.f32 %v2996_v46, %v2089_v52  ;;  %v3768_v60 = vadd.f32 %v3767_v57, %v3766_v62 }
 0x1f4   : > { %v3769_v41 = vpop.f32.mrf.mxu0 }
 0x1f5   : > { %v3106_v33 = vmax.f32 %v3090_v29, 0.0  ;;  %v3043_v45 = vadd.f32 %v5294_v38, %v3020_v59  ;;  %v3001_v21 = vadd.f32 %v5361_v28, %v3768_v60 }
 0x1f6   : > { %v3770_v43 = vpop.f32.mrf.mxu0 }
 0x1f7   : > { %3122 = vst [vmem:[%s5308_s15 + $0x60] sm:$0xff] %v3106_v33  ;;  %v3091_v11 = vadd.f32 %v3536_v4, %v3043_v45  ;;  %v3021_v53 = vadd.f32 %v3001_v21, %v5443_v15  ;;  %v3771_v44 = vadd.f32 %v3770_v43, %v3769_v41 }
 0x1f9   : > { %v3107_v23 = vmax.f32 %v3091_v11, 0.0  ;;  %v3044_v42 = vadd.f32 %v5294_v38, %v3021_v53  ;;  %v3004_v18 = vadd.f32 %v3883_v20, %v3771_v44 }
 0x1fb   : > { %3123 = vst [vmem:[%s5308_s15 + $0x68] sm:$0xff] %v3107_v23  ;;  %v3092_v32 = vadd.f32 %v3539_v47, %v3044_v42  ;;  %v3022_v48 = vadd.f32 %v3004_v18, %v5444_v6 }
 0x1fd   : > { %v3108_v50 = vmax.f32 %v3092_v32, 0.0  ;;  %v3045_v28 = vadd.f32 %v5294_v38, %v3022_v48 }
 0x1ff   : > { %3124 = vst [vmem:[%s5308_s15 + $0x70] sm:$0xff] %v3108_v50  ;;  %v3093_v13 = vadd.f32 %v3540_v3, %v3045_v28 }
 0x201   : > { %v3109_v39 = vmax.f32 %v3093_v13, 0.0 }
 0x203   : > { %3125 = vst [vmem:[%s5308_s15 + $0x78] sm:$0xff] %v3109_v39 }
 0x204 PF: > { %s14_s17 = sadd.s32 1, %s4059_s17   ;;  %s5445_s15 = smov %s4055_s16 }
 0x205   : > { %p11_p5 = scmp.ge.s32.totalorder %s14_s17, 4   ;;  %s5446_s16 = smov %s5448_s18 }
 0x207   :  { %13 = sbr.rel (!%p11_p5) target bundleno = 2 (0x2), region = 77 }

// kernel: basic_block_forward.3
= control target key start
LH: loop header
LB: loop body
LE: loop exit
PB: predicated region body
PF: predicated region fallthrough
CT: control target
= control target key end

     0   :  { %s4857_s12 = smov 0   ;;  %s4859_s13 = smov 0   ;;  %s6316_s0 = inlined_call_operand.vmem [shape: bf16[2,4,160,128], index: 0, kind: input, shape index: {}]   ;;  %s6317_s1 = inlined_call_operand.vmem [shape: bf16[3,384,128], index: 1, kind: input, shape index: {}]   ;;  %s6318_s2 = inlined_call_operand.vmem [shape: f32[1,128], index: 2, kind: input, shape index: {}]   ;;  %s6319_s3 = inlined_call_operand.vmem [shape: bf16[2,176,128], index: 3, kind: output, shape index: {}]  }
   0x1   :  { %s4861_s14 = smov 0  }
   0x2 LB: > { %s25_s15 = sadd.s32 1, %s4830_s13  ;;  %p3909_p0 = scmp.ge.s32.totalorder %s4834_s14, 1  ;;  %s4834_s14 = sphi %s4861_s14, %s13_s14   ;;  %s4830_s13 = sphi %s4859_s13, %s6338_s13   ;;  %s4826_s12 = sphi %s4857_s12, %s6337_s12  }
   0x3   : > { %p27_p1 = scmp.ge.s32.totalorder %s25_s15, 2  ;;  %p168_p2 = scmp.lt.s32.totalorder %s4834_s14, 3 }
   0x5   : > { %s6340_s15 = smov (%p27_p1, %s25_s15), 0  ;;  %p169_p3 = pnand %p3909_p0, %p168_p2 }
   0x6   : > { %p202_p4 = scmp.lt.s32.totalorder (!%p169_p3), %s4826_s12, 1 }
   0x7   : > { %172 = sbr.rel (%p169_p3) target bundleno = 550 (0x226), region = 32 }
   0xc   : > { %v4683_v0 = vld [vmem:[%s6317_s1 + $0x138] sm:$0xff]   ;;  %v4686_v3 = vld [vmem:[%s6317_s1 + $0x130] sm:$0xff]   ;;  %v4689_v6 = vld [vmem:[%s6317_s1 + $0x128] sm:$0xff]   ;;  %s6342_s12 = smov (!%p202_p4, %s4826_s12), 1  ;;  %vm274_vm0 = vsmask.f32 3328 }
   0xd   : > { %v4684_v1 = vld [vmem:[%s6317_s1 + $0xf8] sm:$0xff]   ;;  %4320 = vmatprep.subr.bf16.mxu0 %v4683_v0  ;;  %v4687_v4 = vld [vmem:[%s6317_s1 + $0xf0] sm:$0xff]   ;;  %v4690_v7 = vld [vmem:[%s6317_s1 + $0xe8] sm:$0xff]   ;;  %s4656_s25 = smul.u32 320, %s6342_s12  ;;  %vm275_vm1 = vsmask.f32 7440 }
   0xe   : > { %v4685_v2 = vld [vmem:[%s6317_s1 + $0x178] sm:$0xff]   ;;  %4321 = vmatpush3.bf16.msra.mxu0 %v4684_v1  ;;  %v4688_v5 = vld [vmem:[%s6317_s1 + $0x170] sm:$0xff]   ;;  %v4691_v8 = vld [vmem:[%s6317_s1 + $0x168] sm:$0xff]   ;;  %s4657_s30 = smul.u32 88, %s6342_s12  ;;  %vm3793_vm3 = vcmask 1040384   ;;  %vm3772_vm7 = vcmask 1043456  }
   0xf   : > { %4560 = vmatprep.subr.bf16.mxu1 %v4685_v2  ;;  %4322 = vmatprep.subr.bf16.mxu0 %v4686_v3  ;;  %v4692_v9 = vld [vmem:[%s6317_s1 + $0x120] sm:$0xff]   ;;  %v4695_v12 = vld [vmem:[%s6317_s1 + $0x118] sm:$0xff]   ;;  %v4698_v15 = vld [vmem:[%s6317_s1 + $0x110] sm:$0xff]   ;;  %s4945_s9 = scalar_lea.vmem %s6316_s0, %s4656_s25  ;;  %vm3609_vm4 = vsmask.f32 256 }
  0x10   : > { %4561 = vmatpush3.bf16.msra.mxu1 %v4685_v2  ;;  %v4693_v10 = vld [vmem:[%s6317_s1 + $0xe0] sm:$0xff]   ;;  %v4697_v13 = vld [vmem:[%s6317_s1 + $0x158] sm:$0xff]   ;;  %v4700_v16 = vld [vmem:[%s6317_s1 + $0x150] sm:$0xff]   ;;  %s6134_s6 = scalar_lea.vmem %s6319_s3, %s4657_s30  ;;  %vm3610_vm6 = vsmask.f32 4368 }
  0x11   : > { %4562 = vmatprep.subr.bf16.mxu1 %v4688_v5  ;;  %v4694_v11 = vld [vmem:[%s6317_s1 + $0x160] sm:$0xff]   ;;  %v4696_v14 = vld [vmem:[%s6317_s1 + $0xd8] sm:$0xff]   ;;  %v4699_v17 = vld [vmem:[%s6317_s1 + $0xd0] sm:$0xff]   ;;  %vm3773_vm8 = vsmask.f32 7938 }
  0x12   : > { %4323 = vmatpush3.bf16.msra.mxu0 %v4687_v4  ;;  %v4701_v18 = vld [vmem:[%s6317_s1 + $0x108] sm:$0xff]   ;;  %v4704_v21 = vld [vmem:[%s6317_s1 + $0x100] sm:$0xff]   ;;  %v3912_v22 = vld [vmem:[%s4945_s9 + $0xf0] sm:$0xf] }
  0x13   : > { %4324 = vmatprep.subr.bf16.mxu0 %v4689_v6  ;;  %v4702_v19 = vld [vmem:[%s6317_s1 + $0xc8] sm:$0xff]   ;;  %v3913_v23 = vld [vmem:[%s4945_s9 + $0xf4] sm:$0xf]  ;;  %v3928_v24 = vld [vmem:[%s4945_s9 + $0xa0] sm:$0xf] }
  0x14   : > { %4563 = vmatpush3.bf16.msra.mxu1 %v4688_v5  ;;  %v4703_v20 = vld [vmem:[%s6317_s1 + $0x148] sm:$0xff]   ;;  %240 = vst [vmem:[#allocation2] sm:$0xf] %v3912_v22  ;;  %241 = vst [vmem:[#allocation2 + $0xc] sm:$0xf] %v3913_v23  ;;  %v4706_v27 = vld [vmem:[%s6317_s1 + $0x140] sm:$0xff]  }
  0x15   : > { %4564 = vmatprep.subr.bf16.mxu1 %v4691_v8  ;;  %v3929_v25 = vld [vmem:[%s4945_s9 + $0xa4] sm:$0xf]  ;;  %v3930_v26 = vld [vmem:[%s4945_s9 + $0xa8] sm:$0xf]  ;;  %v278_v28 = vshrl.u32 %v3928_v24, 16  ;;  %v281_v29 = vshll.u32 %v3928_v24, 16  ;;  %vm4977_vm2 = vmor %vm274_vm0, %vm275_vm1 }
  0x16   : > { %4325 = vmatpush3.bf16.msra.mxu0 %v4690_v7  ;;  %v287_v30 = vshll.u32 %v3929_v25, 16  ;;  %v4705_v31 = vld [vmem:[%s6317_s1 + $0xc0] sm:$0xff]   ;;  %v291_v32 = vshrl.u32 %v3929_v25, 16  ;;  %v297_v33 = vshll.u32 %v3930_v26, 16  ;;  %v301_v34 = vshrl.u32 %v3930_v26, 16  ;;  %v4967_v38 = vld [vmem:[%s6317_s1 + $0xb8] sm:$0xff]   ;;  %vm3794_vm5 = vmand %vm3793_vm3, %vm3609_vm4 }
  0x17   : > { %4326 = vmatprep.subr.bf16.mxu0 %v4692_v9  ;;  %v280_v35 = vrot.slane %v278_v28, 4  ;;  %v283_v36 = vrot.slane %v281_v29, 5  ;;  %v799_v41 = vld [vmem:[%s4945_s9 + $0x8] sm:$0xf]  ;;  %v4712_v42 = vld [vmem:[%s6317_s1 + $0x78] sm:$0xff]   ;;  %vm6218_vm9 = vmor %vm3609_vm4, %vm3610_vm6 }
  0x18   : > { %4565 = vmatpush3.bf16.msra.mxu1 %v4691_v8  ;;  %v289_v37 = vrot.slane %v287_v30, 5  ;;  %v293_v39 = vrot.slane %v291_v32, 4  ;;  %v303_v40 = vrot.slane %v301_v34, 4  ;;  %v800_v44 = vld [vmem:[%s4945_s9 + $0xc] sm:$0xf]  ;;  %v817_v46 = vshrl.u32 %v799_v41, 16  ;;  %vm3774_vm10 = vmand %vm3772_vm7, %vm3773_vm8 }
  0x19   : > { %4566 = vmatprep.subr.bf16.mxu1 %v4694_v11  ;;  %v284_v43 = vor.u32 %v283_v36, %v280_v35  ;;  %v801_v45 = vld [vmem:[%s4945_s9 + $0x10] sm:$0xf]  ;;  %v820_v47 = vshll.u32 %v799_v41, 16  ;;  %v299_v50 = vrot.slane %v297_v33, 5  ;;  %v826_v51 = vshll.u32 %v800_v44, 16 }
  0x1a   : > { %4327 = vmatpush3.bf16.msra.mxu0 %v4693_v10  ;;  %v294_v49 = vor.u32 %v293_v39, %v289_v37  ;;  %v830_v52 = vshrl.u32 %v800_v44, 16  ;;  %v819_v54 = vrot.slane %v817_v46, 4  ;;  %v836_v56 = vshll.u32 %v801_v45, 16  ;;  %v4155_v57 = vld [vmem:[%s4945_s9 + $0xa8] sm:$0xf] }
  0x1b   : > { %4328 = vmatprep.subr.bf16.mxu0 %v4695_v12  ;;  %v285_v53 = vrot.slane %v284_v43, 4  ;;  %v822_v55 = vrot.slane %v820_v47, 5  ;;  %v304_v59 = vor.u32 %v303_v40, %v299_v50  ;;  %v828_v60 = vrot.slane %v826_v51, 5  ;;  %v4156_v62 = vld [vmem:[%s4945_s9 + $0xac] sm:$0xf] }
  0x1c   : > { %4567 = vmatpush3.bf16.msra.mxu1 %v4694_v11  ;;  %v295_v58 = vrot.slane %v294_v49, 4  ;;  %v832_v61 = vrot.slane %v830_v52, 4  ;;  %v838_v1 = vrot.slane %v836_v56, 5  ;;  %v840_v2 = vshrl.u32 %v801_v45, 16  ;;  %v4157_v3 = vld [vmem:[%s4945_s9 + $0xb0] sm:$0xf] }
  0x1d   : > { %4568 = vmatprep.subr.bf16.mxu1 %v4697_v13  ;;  %v290_v63 = vsel %vm4977_vm2, %v285_v53, %v289_v37  ;;  %v823_v0 = vor.u32 %v822_v55, %v819_v54  ;;  %v2288_v6 = vshrl.u32 %v4155_v57, 16  ;;  %v2291_v7 = vshll.u32 %v4155_v57, 16  ;;  %v3963_v22 = vld [vmem:[%s4945_s9 + $0x5c] sm:$0xf]  ;;  %v3978_v32 = vld [vmem:[%s4945_s9 + $0x58] sm:$0xf] }
  0x1e   : > { %4329 = vmatpush3.bf16.msra.mxu0 %v4696_v14  ;;  %v300_v4 = vsel %vm4977_vm2, %v295_v58, %v299_v50  ;;  %457 = vst [vmem:[#allocation2 + $0x4] sm:$0xf] %v290_v63  ;;  %v833_v5 = vor.u32 %v832_v61, %v828_v60  ;;  %v842_v9 = vrot.slane %v840_v2, 4  ;;  %v2297_v10 = vshll.u32 %v4156_v62, 16  ;;  %v3979_v37 = vld [vmem:[%s4945_s9 + $0x5c] sm:$0xf] }
  0x1f   : > { %4330 = vmatprep.subr.bf16.mxu0 %v4698_v15  ;;  %458 = vst [vmem:[#allocation2 + $0x10] sm:$0xf] %v300_v4  ;;  %v824_v8 = vrot.slane %v823_v0, 4  ;;  %v2301_v11 = vshrl.u32 %v4156_v62, 16  ;;  %v2293_v14 = vrot.slane %v2291_v7, 5  ;;  %v2307_v15 = vshll.u32 %v4157_v3, 16 }
  0x20   : > { %4569 = vmatpush3.bf16.msra.mxu1 %v4697_v13  ;;  %v834_v12 = vrot.slane %v833_v5, 4  ;;  %v2290_v13 = vrot.slane %v2288_v6, 4  ;;  %v843_v24 = vor.u32 %v842_v9, %v838_v1  ;;  %v2311_v26 = vshrl.u32 %v4157_v3, 16  ;;  %v3980_v54 = vld [vmem:[%s4945_s9 + $0x60] sm:$0xf] }
  0x21   : > { %4570 = vmatprep.subr.bf16.mxu1 %v4700_v16  ;;  %v829_v23 = vsel %vm4977_vm2, %v824_v8, %v828_v60  ;;  %v5006_v34 = vrot.slane %v2307_v15, 5  ;;  %v1030_v57 = vshrl.u32 %v3978_v32, 16  ;;  %v1033_v58 = vshll.u32 %v3978_v32, 16  ;;  %v4172_v63 = vld [vmem:[%s4945_s9 + $0xf8] sm:$0xf] }
  0x22   : > { %4331 = vmatpush3.bf16.msra.mxu0 %v4699_v17  ;;  %v4990_v17 = vrot.slane %v304_v59, 4  ;;  %v2294_v25 = vor.u32 %v2293_v14, %v2290_v13  ;;  %v839_v28 = vsel %vm4977_vm2, %v834_v12, %v838_v1  ;;  %v5013_v45 = vrot.slane %v843_v24, 4  ;;  %v4139_v0 = vld [vmem:[%s4945_s9 + $0xf8] sm:$0xf]  ;;  %v4140_v1 = vld [vmem:[%s4945_s9 + $0xfc] sm:$0xf] }
  0x23   : > { %4332 = vmatprep.subr.bf16.mxu0 %v4701_v18  ;;  %v3962_v18 = vld [vmem:[%s4945_s9 + $0x58] sm:$0xf]  ;;  %v5015_v46 = vrot.slane %v2311_v26, 4  ;;  %v1039_v61 = vshll.u32 %v3979_v37, 16  ;;  %v1043_v62 = vshrl.u32 %v3979_v37, 16  ;;  %v1032_v3 = vrot.slane %v1030_v57, 4 }
  0x24   : > { %4571 = vmatpush3.bf16.msra.mxu1 %v4700_v16  ;;  %v3945_v16 = vld [vmem:[%s4945_s9 + $0xf0] sm:$0xf]  ;;  %v5004_v33 = vrot.slane %v2294_v25, 4  ;;  %v1035_v4 = vrot.slane %v1033_v58, 5  ;;  %v1049_v5 = vshll.u32 %v3980_v54, 16  ;;  %v1053_v15 = vshrl.u32 %v3980_v54, 16 }
  0x25   : > { %4572 = vmatprep.subr.bf16.mxu1 %v4703_v20  ;;  %v491_v30 = vshrl.u32 %v3945_v16, 16  ;;  %v5009_v39 = vld [vmem:[#allocation2] sm:$0xff]  ;;  %v4173_v6 = vld [vmem:[%s4945_s9 + $0xfc] sm:$0xf]  ;;  %v1041_v9 = vrot.slane %v1039_v61, 5 }
  0x26   : > { %4333 = vmatpush3.bf16.msra.mxu0 %v4702_v19  ;;  %v4993_v19 = vrot.slane %v2297_v10, 5  ;;  %v5011_v44 = vld [vmem:[#allocation2 + $0xc] sm:$0xff]  ;;  %783 = vst [vmem:[#allocation2] sm:$0xf] %v3962_v18  ;;  %996 = vst [vmem:[#allocation2 + $0x4] sm:$0xf] %v829_v23  ;;  %v1036_v13 = vor.u32 %v1035_v4, %v1032_v3 }
  0x27   : > { %4334 = vmatprep.subr.bf16.mxu0 %v4704_v21  ;;  %v3946_v21 = vld [vmem:[%s4945_s9 + $0xf4] sm:$0xf]  ;;  %v493_v41 = vrot.slane %v491_v30, 4  ;;  %784 = vst [vmem:[#allocation2 + $0xc] sm:$0xf] %v3963_v22  ;;  %v1045_v10 = vrot.slane %v1043_v62, 4 }
  0x28   : > { %4573 = vmatpush3.bf16.msra.mxu1 %v4703_v20  ;;  %v2303_v20 = vrot.slane %v2301_v11, 4  ;;  %v500_v35 = vshll.u32 %v3946_v21, 16  ;;  %v504_v36 = vshrl.u32 %v3946_v21, 16  ;;  %997 = vst [vmem:[#allocation2 + $0x10] sm:$0xf] %v839_v28  ;;  %v2300_v50 = vsel %vm4977_vm2, %v5004_v33, %v4993_v19 }
  0x29   : > { %4574 = vmatprep.subr.bf16.mxu1 %v4706_v27  ;;  %v4174_v11 = vld [vmem:[%s4945_s9 + $0x100] sm:$0xf]  ;;  %v1051_v14 = vrot.slane %v1049_v5, 5  ;;  %v2504_v21 = vshll.u32 %v4172_v63, 16  ;;  %v3948_v22 = vld [vmem:[%s4945_s9 + $0xfc] sm:$0xf] }
  0x2a   : > { %4335 = vmatpush3.bf16.msra.mxu0 %v4705_v31  ;;  %v2304_v29 = vor.u32 %v2303_v20, %v4993_v19  ;;  %v494_v31 = vshll.u32 %v3945_v16, 16  ;;  %v502_v47 = vrot.slane %v500_v35, 5  ;;  %v506_v49 = vrot.slane %v504_v36, 4  ;;  %v5038_v32 = vld [vmem:[%s4945_s9 + $0x100] sm:$0xf] }
  0x2b   : > { %4592 = vmatprep.subr.bf16.mxu0 %v4967_v38  ;;  %v1046_v19 = vor.u32 %v1045_v10, %v1041_v9  ;;  %v2501_v20 = vshrl.u32 %v4172_v63, 16  ;;  %v1037_v25 = vrot.slane %v1036_v13, 4  ;;  %v1055_v26 = vrot.slane %v1053_v15, 4  ;;  %v3981_v33 = vld [vmem:[%s4945_s9 + $0x64] sm:$0xf] }
  0x2c   : > { %4575 = vmatpush3.bf16.msra.mxu1 %v4706_v27  ;;  %v3947_v27 = vld [vmem:[%s4945_s9 + $0xf8] sm:$0xf]  ;;  %v2305_v40 = vrot.slane %v2304_v29, 4  ;;  %v507_v56 = vor.u32 %v506_v49, %v502_v47  ;;  %v2506_v30 = vrot.slane %v2504_v21, 5  ;;  %v2314_v35 = vor.u32 %v5015_v46, %v5006_v34  ;;  %v4719_v46 = vld [vmem:[%s6317_s1 + $0xb0] sm:$0xff]  }
  0x2d   : > { %4400 = vmatprep.subr.bf16.mxu1 %v4712_v42  ;;  %v496_v42 = vrot.slane %v494_v31, 5  ;;  %v510_v43 = vshll.u32 %v3947_v27, 16  ;;  %v514_v53 = vshrl.u32 %v3947_v27, 16  ;;  %v1225_v16 = vld [vmem:[#allocation2] sm:$0xff]  ;;  %v2510_v27 = vshll.u32 %v4173_v6, 16 }
  0x2e   : > { %v2310_v55 = vsel %vm4977_vm2, %v2305_v40, %v5006_v34  ;;  %v508_v2 = vrot.slane %v507_v56, 4  ;;  %2254 = vst [vmem:[#allocation2] sm:$0xf] %v4139_v0  ;;  %v1047_v28 = vrot.slane %v1046_v19, 4  ;;  %v2503_v29 = vrot.slane %v2501_v20, 4 }
  0x2f   : > { %v497_v51 = vor.u32 %v496_v42, %v493_v41  ;;  %v512_v52 = vrot.slane %v510_v43, 5  ;;  %v516_v60 = vrot.slane %v514_v53, 4  ;;  %v1227_v23 = vld [vmem:[#allocation2 + $0xc] sm:$0xff]  ;;  %v2514_v31 = vshrl.u32 %v4173_v6, 16  ;;  %v3914_v49 = vld [vmem:[%s4945_s9 + $0xf8] sm:$0xf] }
  0x30   : > { %v4707_v24 = vld [vmem:[#allocation2 + $0x4] ss:$12 sps:$4 sm:$0xff]   ;;  %2255 = vst [vmem:[#allocation2 + $0xc] sm:$0xf] %v4140_v1  ;;  %v1042_v36 = vsel %vm4977_vm2, %v1037_v25, %v1041_v9  ;;  %v5045_v37 = vrot.slane %v2510_v27, 5  ;;  %v2520_v40 = vshll.u32 %v4174_v11, 16  ;;  %v1056_v41 = vor.u32 %v1055_v26, %v1051_v14 }
  0x31   : > { %v498_v59 = vrot.slane %v497_v51, 4  ;;  %v517_v8 = vor.u32 %v516_v60, %v512_v52  ;;  %v513_v12 = vsel %vm4977_vm2, %v508_v2, %v512_v52  ;;  %2467 = vst [vmem:[#allocation2 + $0x4] sm:$0xf] %v2300_v50  ;;  %2468 = vst [vmem:[#allocation2 + $0x10] sm:$0xf] %v2310_v55  ;;  %1610 = vmatprep.mubr.bf16.mxu0 %v4707_v24  ;;  %v2516_v43 = vrot.slane %v2514_v31, 4 }
  0x32   : > { %671 = vst [vmem:[#allocation2 + $0x14] sm:$0xf] %v513_v12  ;;  %v2507_v42 = vor.u32 %v2506_v30, %v2503_v29  ;;  %v3915_v50 = vld [vmem:[%s4945_s9 + $0xfc] sm:$0xf]  ;;  %v1052_v51 = vsel %vm4977_vm2, %v1047_v28, %v1051_v14  ;;  %v5051_v52 = vrot.slane %v2520_v40, 5  ;;  %v4043_v53 = vcombine.low %v1225_v16, %v1227_v23 }
  0x33   : > { %v503_v7 = vsel %vm4977_vm2, %v498_v59, %v502_v47  ;;  %v5034_v18 = vrot.slane %v517_v8, 4  ;;  %v2524_v47 = vshrl.u32 %v4174_v11, 16  ;;  %v520_v54 = vshll.u32 %v3948_v22, 16  ;;  %v5054_v34 = vld [vmem:[%s4945_s9 + $0x68] sm:$0xf] }
  0x34   : > { %670 = vst [vmem:[#allocation2 + $0x8] sm:$0xf] %v503_v7  ;;  %242 = vst [vmem:[#allocation2 + $0x18] sm:$0xf] %v3914_v49  ;;  %v2508_v56 = vrot.slane %v2507_v42, 4  ;;  %v2517_v57 = vor.u32 %v2516_v43, %v5045_v37  ;;  %v524_v59 = vshrl.u32 %v3948_v22, 16  ;;  %1611 = vmatmul.mubr.bf16.vlgmr.msra.gmra.mxu0 %v4043_v53 }
  0x35   : > { %243 = vst [vmem:[#allocation2 + $0x24] sm:$0xf] %v3915_v50  ;;  %v2526_v58 = vrot.slane %v2524_v47, 4  ;;  %v5062_v60 = vrot.slane %v2314_v35, 4  ;;  %v522_v62 = vrot.slane %v520_v54, 5  ;;  %v530_v63 = vshll.u32 %v5038_v32, 16  ;;  %4593 = vmatpush3.bf16.msra.mxu0 %v4967_v38 }
  0x36   : > { %v1059_v0 = vshll.u32 %v3981_v33, 16  ;;  %v1057_v1 = vrot.slane %v1056_v41, 4  ;;  %v2518_v2 = vrot.slane %v2517_v57, 4  ;;  %v526_v4 = vrot.slane %v524_v59, 4  ;;  %v4175_v5 = vld [vmem:[%s4945_s9 + $0x104] sm:$0xf]  ;;  %4594 = vmatprep.subr.bf16.mxu0 %v4719_v46 }
  0x37   : > { %v2527_v3 = vor.u32 %v2526_v58, %v5051_v52  ;;  %v523_v6 = vsel %vm4977_vm2, %v5034_v18, %v522_v62  ;;  %v534_v7 = vshrl.u32 %v5038_v32, 16  ;;  %v1063_v9 = vshrl.u32 %v3981_v33, 16  ;;  %v5075_v10 = vld [vmem:[%s4945_s9 + $0x108] sm:$0xf]  ;;  %v3931_v15 = vld [vmem:[%s4945_s9 + $0xac] sm:$0xf] }
  0x38   : > { %v1061_v8 = vrot.slane %v1059_v0, 5  ;;  %v4728_v11 = vld [vmem:[%s6317_s1 + $0xa8] sm:$0xff]   ;;  %v2513_v38 = vsel %vm4977_vm2, %v2508_v56, %v5045_v37  ;;  %v527_v12 = vor.u32 %v526_v4, %v522_v62  ;;  %v5083_v13 = vrot.slane %v530_v63, 5  ;;  %672 = vst [vmem:[#allocation2 + $0x20] sm:$0xf] %v523_v6 }
  0x39   : > { %v5064_v61 = vld [vmem:[#allocation2 + $0x14] sm:$0xf]  ;;  %v1069_v14 = vshll.u32 %v5054_v34, 16  ;;  %v2523_v16 = vsel %vm4977_vm2, %v2518_v2, %v5051_v52  ;;  %v5090_v18 = vrot.slane %v2527_v3, 4  ;;  %v1065_v19 = vrot.slane %v1063_v9, 4  ;;  %4595 = vmatpush3.bf16.msra.mxu0 %v4719_v46  ;;  %v4737_v2 = vld [vmem:[%s6317_s1 + $0xa0] sm:$0xff]  }
  0x3a   : > { %1210 = vst [vmem:[#allocation2 + $0x14] sm:$0xf] %v1052_v51  ;;  %v2530_v20 = vshll.u32 %v4175_v5, 16  ;;  %v5093_v21 = vld [vmem:[%s4945_s9 + $0xb0] sm:$0xf]  ;;  %v528_v22 = vrot.slane %v527_v12, 4  ;;  %4596 = vmatprep.subr.bf16.mxu0 %v4728_v11  ;;  %v1062_v41 = vsel %vm4977_vm2, %v1057_v1, %v1061_v8 }
  0x3b   : > { %v5059_v55 = vld [vmem:[#allocation2 + $0x8] sm:$0xf]  ;;  %v1073_v23 = vshrl.u32 %v5054_v34, 16  ;;  %v2534_v24 = vshrl.u32 %v4175_v5, 16  ;;  %v2540_v25 = vshll.u32 %v5075_v10, 16  ;;  %v1066_v27 = vor.u32 %v1065_v19, %v1061_v8 }
  0x3c   : > { %1209 = vst [vmem:[#allocation2 + $0x8] sm:$0xf] %v1042_v36  ;;  %v802_v26 = vld [vmem:[%s4945_s9 + $0x14] sm:$0xf]  ;;  %v5098_v28 = vrot.slane %v1069_v14, 5  ;;  %v5100_v29 = vrot.slane %v2530_v20, 5  ;;  %v533_v33 = vsel %vm4977_vm2, %v528_v22, %v5083_v13 }
  0x3d   : > { %v307_v30 = vshll.u32 %v3931_v15, 16  ;;  %v5103_v31 = vld [vmem:[%s4945_s9 + $0x18] sm:$0xf]  ;;  %v2536_v35 = vrot.slane %v2534_v24, 4  ;;  %v2544_v36 = vshrl.u32 %v5075_v10, 16  ;;  %v311_v37 = vshrl.u32 %v3931_v15, 16  ;;  %4597 = vmatpush3.bf16.msra.mxu0 %v4728_v11 }
  0x3e   : > { %673 = vst [vmem:[#allocation2 + $0x2c] sm:$0xf] %v533_v33  ;;  %v5111_v42 = vrot.slane %v2540_v25, 5  ;;  %v1067_v49 = vrot.slane %v1066_v27, 4  ;;  %v317_v52 = vshll.u32 %v5093_v21, 16  ;;  %v2533_v46 = vsel %vm4977_vm2, %v5090_v18, %v5100_v29  ;;  %4598 = vmatprep.subr.bf16.mxu0 %v4737_v2  ;;  %v4748_v10 = vld [vmem:[%s6317_s1 + $0x90] sm:$0xff]  }
  0x3f   : > { %v309_v43 = vrot.slane %v307_v30, 5  ;;  %v2537_v50 = vor.u32 %v2536_v35, %v5100_v29  ;;  %v313_v51 = vrot.slane %v311_v37, 4  ;;  %v4158_v53 = vld [vmem:[%s4945_s9 + $0xb4] sm:$0xf]  ;;  %v5118_v54 = vld [vmem:[#allocation2 + $0x20] sm:$0xf] }
  0x40   : > { %v846_v57 = vshll.u32 %v802_v26, 16  ;;  %v850_v58 = vshrl.u32 %v802_v26, 16  ;;  %1211 = vst [vmem:[#allocation2 + $0x20] sm:$0xf] %v1062_v41  ;;  %v5129_v63 = vrot.slane %v317_v52, 5  ;;  %v856_v0 = vshll.u32 %v5103_v31, 16 }
  0x41   : > { %v310_v56 = vsel %vm4977_vm2, %v4990_v17, %v309_v43  ;;  %v5127_v59 = vrot.slane %v2537_v50, 4  ;;  %v314_v62 = vor.u32 %v313_v51, %v309_v43  ;;  %v5133_v1 = vld [vmem:[%s4945_s9 + $0xb8] sm:$0xf]  ;;  %v321_v17 = vshrl.u32 %v5093_v21, 16  ;;  %v3964_v12 = vld [vmem:[%s4945_s9 + $0x60] sm:$0xf]  ;;  %4599 = vmatpush3.bf16.msra.mxu0 %v4737_v2 }
  0x42   : > { %459 = vst [vmem:[#allocation2 + $0x1c] sm:$0xf] %v310_v56  ;;  %v848_v3 = vrot.slane %v846_v57, 5  ;;  %v852_v4 = vrot.slane %v850_v58, 4  ;;  %v2317_v5 = vshll.u32 %v4158_v53, 16  ;;  %v1072_v6 = vsel %vm4977_vm2, %v1067_v49, %v5098_v28 }
  0x43   : > { %v4709_v40 = vld [vmem:[#allocation2 + $0x8] ss:$12 sps:$4 sm:$0xff]   ;;  %v315_v8 = vrot.slane %v314_v62, 4  ;;  %v860_v9 = vshrl.u32 %v5103_v31, 16  ;;  %v2321_v11 = vshrl.u32 %v4158_v53, 16  ;;  %v5145_v15 = vrot.slane %v856_v0, 5 }
  0x44   : > { %2680 = vst [vmem:[#allocation2 + $0x8] sm:$0xf] %v2513_v38  ;;  %2681 = vst [vmem:[#allocation2 + $0x14] sm:$0xf] %v2523_v16  ;;  %4576 = vmatprep.mubr.bf16.mxu1 %v4709_v40  ;;  %v3950_v38 = vld [vmem:[%s4945_s9 + $0x104] sm:$0xf]  ;;  %v853_v14 = vor.u32 %v852_v4, %v848_v3  ;;  %v2543_v24 = vsel %vm4977_vm2, %v5127_v59, %v5111_v42  ;;  %v849_v33 = vsel %vm4977_vm2, %v5013_v45, %v848_v3 }
  0x45   : > { %v5147_v16 = vrot.slane %v2317_v5, 5  ;;  %v2327_v19 = vshll.u32 %v5133_v1, 16  ;;  %v5151_v20 = vld [vmem:[%s4945_s9 + $0x108] sm:$0xf]  ;;  %v5153_v22 = vld [vmem:[#allocation2 + $0x2c] sm:$0xf]  ;;  %v320_v25 = vsel %vm4977_vm2, %v315_v8, %v5129_v63 }
  0x46   : > { %v2323_v26 = vrot.slane %v2321_v11, 4  ;;  %v536_v27 = vrot.slane %v534_v7, 4  ;;  %v3983_v30 = vld [vmem:[%s4945_s9 + $0x6c] sm:$0xf]  ;;  %1212 = vst [vmem:[#allocation2 + $0x2c] sm:$0xf] %v1072_v6 }
  0x47   : > { %460 = vst [vmem:[#allocation2 + $0x28] sm:$0xf] %v320_v25  ;;  %v854_v35 = vrot.slane %v853_v14, 4  ;;  %v2331_v37 = vshrl.u32 %v5133_v1, 16  ;;  %v540_v40 = vshll.u32 %v3950_v38, 16  ;;  %v544_v49 = vshrl.u32 %v3950_v38, 16 }
  0x48   : > { %v2324_v41 = vor.u32 %v2323_v26, %v5147_v16  ;;  %v537_v43 = vor.u32 %v536_v27, %v5083_v13  ;;  %v550_v32 = vshll.u32 %v5151_v20, 16  ;;  %v5173_v7 = vld [vmem:[%s4945_s9 + $0x70] sm:$0xf]  ;;  %v5180_v45 = vrot.slane %v2327_v19, 5  ;;  %v3965_v56 = vld [vmem:[%s4945_s9 + $0x64] sm:$0xf] }
  0x49   : > { %v5175_v50 = vld [vmem:[#allocation2 + $0x18] sm:$0xff]  ;;  %v859_v51 = vsel %vm4977_vm2, %v854_v35, %v5145_v15  ;;  %v542_v52 = vrot.slane %v540_v40, 5  ;;  %v1075_v53 = vrot.slane %v1073_v23, 4  ;;  %v546_v58 = vrot.slane %v544_v49, 4  ;;  %v4177_v3 = vld [vmem:[%s4945_s9 + $0x10c] sm:$0xf] }
  0x4a   : > { %785 = vst [vmem:[#allocation2 + $0x18] sm:$0xf] %v3964_v12  ;;  %998 = vst [vmem:[#allocation2 + $0x1c] sm:$0xf] %v849_v33  ;;  %v5185_v13 = vrot.slane %v2324_v41, 4  ;;  %v538_v57 = vrot.slane %v537_v43, 4 }
  0x4b   : > { %v554_v59 = vshrl.u32 %v5151_v20, 16  ;;  %v4713_v62 = vld [vmem:[%s6317_s1 + $0x38] sm:$0xff]   ;;  %v1076_v0 = vor.u32 %v1075_v53, %v5098_v28  ;;  %v1079_v2 = vshll.u32 %v3983_v30, 16  ;;  %v1083_v34 = vshrl.u32 %v3983_v30, 16  ;;  %v4714_v4 = vld [vmem:[%s6317_s1 + $0x70] sm:$0xff]   ;;  %v4741_v1 = vld [vmem:[%s6317_s1 + $0x40] sm:$0xff]  }
  0x4c   : > { %v1089_v23 = vshll.u32 %v5173_v7, 16  ;;  %v543_v5 = vsel %vm4977_vm2, %v538_v57, %v542_v52  ;;  %v547_v6 = vor.u32 %v546_v58, %v542_v52  ;;  %v5199_v8 = vrot.slane %v550_v32, 5  ;;  %v5203_v28 = vld [vmem:[%s4945_s9 + $0x110] sm:$0xf]  ;;  %v4745_v38 = vld [vmem:[%s6317_s1 + $0x98] sm:$0xff]  }
  0x4d   : > { %v1093_v11 = vshrl.u32 %v5173_v7, 16  ;;  %674 = vst [vmem:[#allocation2 + $0x38] sm:$0xf] %v543_v5  ;;  %v1077_v12 = vrot.slane %v1076_v0, 4  ;;  %v1081_v14 = vrot.slane %v1079_v2, 5  ;;  %v1085_v19 = vrot.slane %v1083_v34, 4  ;;  %4600 = vmatprep.subr.bf16.mxu0 %v4745_v38 }
  0x4e   : > { %v5208_v20 = vrot.slane %v1089_v23, 5  ;;  %v3952_v25 = vld [vmem:[%s4945_s9 + $0x10c] sm:$0xf]  ;;  %v5211_v27 = vld [vmem:[#allocation2 + $0x24] sm:$0xff]  ;;  %v2320_v30 = vsel %vm4977_vm2, %v5062_v60, %v5147_v16  ;;  %v2330_v33 = vsel %vm4977_vm2, %v5185_v13, %v5180_v45  ;;  %v548_v35 = vrot.slane %v547_v6, 4  ;;  %v4715_v43 = vld [vmem:[%s6317_s1 + $0x30] sm:$0xff]   ;;  %4601 = vmatpush3.bf16.msra.mxu0 %v4745_v38 }
  0x4f   : > { %v4711_v26 = vld [vmem:[#allocation2 + $0x20] ss:$12 sps:$4 sm:$0xff]   ;;  %v5222_v40 = vld [vmem:[%s4945_s9 + $0x110] sm:$0xf]  ;;  %786 = vst [vmem:[#allocation2 + $0x24] sm:$0xf] %v3965_v56  ;;  %v1082_v49 = vsel %vm4977_vm2, %v1077_v12, %v1081_v14  ;;  %v1086_v32 = vor.u32 %v1085_v19, %v1081_v14  ;;  %4602 = vmatprep.subr.bf16.mxu0 %v4748_v10 }
  0x50   : > { %2682 = vst [vmem:[#allocation2 + $0x20] sm:$0xf] %v2533_v46  ;;  %2683 = vst [vmem:[#allocation2 + $0x2c] sm:$0xf] %v2543_v24  ;;  %v2546_v52 = vrot.slane %v2544_v36, 4  ;;  %v2550_v53 = vshll.u32 %v4177_v3, 16  ;;  %4577 = vmatmul.mubr.bf16.vlgmr.msra.gmra.mxu1 %v4711_v26  ;;  %v553_v18 = vsel %vm4977_vm2, %v548_v35, %v5199_v8 }
  0x51   : > { %999 = vst [vmem:[#allocation2 + $0x28] sm:$0xf] %v859_v51  ;;  %v2554_v29 = vshrl.u32 %v4177_v3, 16  ;;  %v2560_v46 = vshll.u32 %v5203_v28, 16  ;;  %v2564_v24 = vshrl.u32 %v5203_v28, 16  ;;  %4401 = vmatpush3.bf16.msra.mxu1 %v4713_v62  ;;  %v5246_v36 = vrot.slane %v1086_v32, 4 }
  0x52   : > { %675 = vst [vmem:[#allocation2 + $0x44] sm:$0xf] %v553_v18  ;;  %v2547_v51 = vor.u32 %v2546_v52, %v5111_v42  ;;  %v5249_v56 = vrot.slane %v2550_v53, 5  ;;  %v556_v57 = vrot.slane %v554_v59, 4  ;;  %v3985_v58 = vld [vmem:[%s4945_s9 + $0x74] sm:$0xf]  ;;  %4402 = vmatprep.subr.bf16.mxu1 %v4714_v4  ;;  %4603 = vmatpush3.bf16.msra.mxu0 %v4748_v10 }
  0x53   : > { %v4721_v0 = vld [vmem:[%s6317_s1 + $0x68] sm:$0xff]   ;;  %v1229_v2 = vld [vmem:[#allocation2 + $0x18] sm:$0xff]  ;;  %v4141_v34 = vld [vmem:[%s4945_s9 + $0x100] sm:$0xf]  ;;  %v2556_v3 = vrot.slane %v2554_v29, 4  ;;  %v5257_v62 = vrot.slane %v2560_v46, 5  ;;  %v1092_v42 = vsel %vm4977_vm2, %v5246_v36, %v5208_v20 }
  0x54   : > { %v4142_v23 = vld [vmem:[%s4945_s9 + $0x104] sm:$0xf]  ;;  %v560_v5 = vshll.u32 %v3952_v25, 16  ;;  %v564_v6 = vshrl.u32 %v3952_v25, 16  ;;  %v5260_v38 = vld [vmem:[%s4945_s9 + $0x78] sm:$0xf]  ;;  %v557_v4 = vor.u32 %v556_v57, %v5199_v8 }
  0x55   : > { %v5266_v59 = vrot.slane %v2547_v51, 4  ;;  %v570_v12 = vshll.u32 %v5222_v40, 16  ;;  %v4722_v14 = vld [vmem:[%s6317_s1 + $0x28] sm:$0xff]   ;;  %v5273_v19 = vld [vmem:[#allocation2 + $0x38] sm:$0xf]  ;;  %v2557_v25 = vor.u32 %v2556_v3, %v5249_v56  ;;  %v574_v32 = vshrl.u32 %v5222_v40, 16  ;;  %4403 = vmatpush3.bf16.msra.mxu1 %v4715_v43 }
  0x56   : > { %v562_v26 = vrot.slane %v560_v5, 5  ;;  %v566_v35 = vrot.slane %v564_v6, 4  ;;  %v4723_v8 = vld [vmem:[%s6317_s1 + $0x60] sm:$0xff]   ;;  %v4751_v52 = vld [vmem:[%s6317_s1 + $0x88] sm:$0xff]   ;;  %1213 = vst [vmem:[#allocation2 + $0x38] sm:$0xf] %v1082_v49  ;;  %4404 = vmatprep.subr.bf16.mxu1 %v4721_v0 }
  0x57   : > { %v2553_v53 = vsel %vm4977_vm2, %v5266_v59, %v5249_v56  ;;  %v558_v18 = vrot.slane %v557_v4, 4  ;;  %v5287_v29 = vrot.slane %v570_v12, 5  ;;  %v1095_v46 = vrot.slane %v1093_v11, 4  ;;  %v4179_v10 = vld [vmem:[%s4945_s9 + $0x114] sm:$0xf]  ;;  %4604 = vmatprep.subr.bf16.mxu0 %v4751_v52  ;;  %v4724_v12 = vld [vmem:[%s6317_s1 + $0x20] sm:$0xff]  }
  0x58   : > { %v1231_v36 = vld [vmem:[#allocation2 + $0x24] sm:$0xff]  ;;  %v5292_v57 = vrot.slane %v2557_v25, 4  ;;  %v567_v43 = vor.u32 %v566_v35, %v562_v26  ;;  %v1099_v49 = vshll.u32 %v3985_v58, 16  ;;  %v1103_v3 = vshrl.u32 %v3985_v58, 16  ;;  %v5295_v5 = vld [vmem:[%s4945_s9 + $0x118] sm:$0xf]  ;;  %4605 = vmatpush3.bf16.msra.mxu0 %v4751_v52 }
  0x59   : > { %v4716_v51 = vld [vmem:[#allocation2 + $0x1c] ss:$12 sps:$4 sm:$0xff]   ;;  %2256 = vst [vmem:[#allocation2 + $0x18] sm:$0xf] %v4141_v34  ;;  %2257 = vst [vmem:[#allocation2 + $0x24] sm:$0xf] %v4142_v23  ;;  %v4046_v7 = vcombine.low %v1229_v2, %v1231_v36  ;;  %v563_v11 = vsel %vm4977_vm2, %v558_v18, %v562_v26  ;;  %v1096_v58 = vor.u32 %v1095_v46, %v5208_v20  ;;  %4405 = vmatpush3.bf16.msra.mxu1 %v4722_v14 }
  0x5a   : > { %2469 = vst [vmem:[#allocation2 + $0x1c] sm:$0xf] %v2320_v30  ;;  %2470 = vst [vmem:[#allocation2 + $0x28] sm:$0xf] %v2330_v33  ;;  %v1109_v0 = vshll.u32 %v5260_v38, 16  ;;  %1618 = vmatprep.mubr.bf16.mxu0 %v4716_v51  ;;  %v2563_v16 = vsel %vm4977_vm2, %v5292_v57, %v5257_v62  ;;  %v568_v13 = vrot.slane %v567_v43, 4  ;;  %4406 = vmatprep.subr.bf16.mxu1 %v4723_v8 }
  0x5b   : > { %v3916_v34 = vld [vmem:[%s4945_s9 + $0x100] sm:$0xf]  ;;  %v3917_v23 = vld [vmem:[%s4945_s9 + $0x104] sm:$0xf]  ;;  %676 = vst [vmem:[#allocation2 + $0x50] sm:$0xf] %v563_v11  ;;  %1619 = vmatmul.mubr.bf16.gmra.mxu0 %v4046_v7 }
  0x5c   : > { %v5313_v60 = vld [vmem:[#allocation2 + $0x44] sm:$0xf]  ;;  %v1101_v30 = vrot.slane %v1099_v49, 5  ;;  %v1105_v33 = vrot.slane %v1103_v3, 4  ;;  %244 = vst [vmem:[#allocation2 + $0x30] sm:$0xf] %v3916_v34  ;;  %v573_v25 = vsel %vm4977_vm2, %v568_v13, %v5287_v29 }
  0x5d   : > { %245 = vst [vmem:[#allocation2 + $0x3c] sm:$0xf] %v3917_v23  ;;  %1214 = vst [vmem:[#allocation2 + $0x44] sm:$0xf] %v1092_v42  ;;  %v1097_v20 = vrot.slane %v1096_v58, 4  ;;  %v5319_v2 = vrot.slane %v1109_v0, 5  ;;  %4407 = vmatpush3.bf16.msra.mxu1 %v4724_v12 }
  0x5e   : > { %v1113_v6 = vshrl.u32 %v5260_v38, 16  ;;  %v2566_v4 = vrot.slane %v2564_v24, 4  ;;  %v1106_v42 = vor.u32 %v1105_v33, %v1101_v30  ;;  %v2570_v26 = vshll.u32 %v4179_v10, 16  ;;  %v3933_v52 = vld [vmem:[%s4945_s9 + $0xb4] sm:$0xf]  ;;  %v4730_v28 = vld [vmem:[%s6317_s1 + $0x58] sm:$0xff]  }
  0x5f   : > { %v2574_v35 = vshrl.u32 %v4179_v10, 16  ;;  %677 = vst [vmem:[#allocation2 + $0x5c] sm:$0xf] %v573_v25  ;;  %v1102_v24 = vsel %vm4977_vm2, %v1097_v20, %v1101_v30  ;;  %v2580_v18 = vshll.u32 %v5295_v5, 16  ;;  %v2584_v46 = vshrl.u32 %v5295_v5, 16  ;;  %v4731_v7 = vld [vmem:[%s6317_s1 + $0x18] sm:$0xff]   ;;  %4408 = vmatprep.subr.bf16.mxu1 %v4730_v28 }
  0x60   : > { %v2567_v14 = vor.u32 %v2566_v4, %v5257_v62  ;;  %v5340_v36 = vld [vmem:[%s4945_s9 + $0xb8] sm:$0xf]  ;;  %v1107_v10 = vrot.slane %v1106_v42, 4  ;;  %v5342_v8 = vrot.slane %v2570_v26, 5  ;;  %v323_v57 = vrot.slane %v321_v17, 4  ;;  %v4732_v11 = vld [vmem:[%s6317_s1 + $0x50] sm:$0xff]  }
  0x61   : > { %v2576_v51 = vrot.slane %v2574_v35, 4  ;;  %v5348_v49 = vrot.slane %v2580_v18, 5  ;;  %v327_v62 = vshll.u32 %v3933_v52, 16  ;;  %v331_v3 = vshrl.u32 %v3933_v52, 16  ;;  %v804_v34 = vld [vmem:[%s4945_s9 + $0x1c] sm:$0xf]  ;;  %4409 = vmatpush3.bf16.msra.mxu1 %v4731_v7 }
  0x62   : > { %v5346_v43 = vrot.slane %v2567_v14, 4  ;;  %v1112_v21 = vsel %vm4977_vm2, %v1107_v10, %v5319_v2  ;;  %v324_v58 = vor.u32 %v323_v57, %v5129_v63  ;;  %v337_v0 = vshll.u32 %v5340_v36, 16  ;;  %v5364_v23 = vld [vmem:[%s4945_s9 + $0x20] sm:$0xf]  ;;  %v5369_v30 = vld [vmem:[#allocation2 + $0x50] sm:$0xf]  ;;  %4410 = vmatprep.subr.bf16.mxu1 %v4732_v11 }
  0x63   : > { %v2577_v17 = vor.u32 %v2576_v51, %v5342_v8  ;;  %v4754_v13 = vld [vmem:[%s6317_s1 + $0x80] sm:$0xff]   ;;  %v329_v20 = vrot.slane %v327_v62, 5  ;;  %v333_v4 = vrot.slane %v331_v3, 4  ;;  %v341_v63 = vshrl.u32 %v5340_v36, 16  ;;  %v4733_v12 = vld [vmem:[%s6317_s1 + $0x10] sm:$0xff]   ;;  %v4755_v25 = vld [vmem:[%s6317_s1 + $0x1f8] sm:$0xff]  }
  0x64   : > { %v2573_v33 = vsel %vm4977_vm2, %v5346_v43, %v5342_v8  ;;  %v4718_v42 = vld [vmem:[#allocation2 + $0x38] ss:$12 sps:$4 sm:$0xff]   ;;  %1215 = vst [vmem:[#allocation2 + $0x50] sm:$0xf] %v1102_v24  ;;  %v325_v35 = vrot.slane %v324_v58, 4  ;;  %v4739_v52 = vld [vmem:[%s6317_s1 + $0x48] sm:$0xff]   ;;  %4606 = vmatprep.subr.bf16.mxu0 %v4754_v13 }
  0x65   : > { %v5382_v26 = vrot.slane %v2577_v17, 4  ;;  %2684 = vst [vmem:[#allocation2 + $0x38] sm:$0xf] %v2553_v53  ;;  %2685 = vst [vmem:[#allocation2 + $0x44] sm:$0xf] %v2563_v16  ;;  %v334_v24 = vor.u32 %v333_v4, %v329_v20  ;;  %v5396_v18 = vrot.slane %v337_v0, 5  ;;  %4607 = vmatpush3.bf16.msra.mxu0 %v4754_v13  ;;  %4580 = vmatprep.mubr.bf16.mxu1 %v4718_v42 }
  0x66   : > { %v862_v10 = vrot.slane %v860_v9, 4  ;;  %v866_v51 = vshll.u32 %v804_v34, 16  ;;  %v4160_v57 = vld [vmem:[%s4945_s9 + $0xbc] sm:$0xf]  ;;  %v330_v59 = vsel %vm4977_vm2, %v325_v35, %v329_v20  ;;  %v870_v53 = vshrl.u32 %v804_v34, 16  ;;  %4480 = vmatprep.subr.bf16.mxu0 %v4755_v25  ;;  %v4740_v11 = vld [vmem:[%s6317_s1 + $0x8] sm:$0xff]   ;;  %4411 = vmatpush3.bf16.msra.mxu1 %v4733_v12 }
  0x67   : > { %v5401_v62 = vld [vmem:[#allocation2 + $0x5c] sm:$0xf]  ;;  %v2583_v56 = vsel %vm4977_vm2, %v5382_v26, %v5348_v49  ;;  %v876_v16 = vshll.u32 %v5364_v23, 16  ;;  %v5411_v31 = vld [vmem:[%s4945_s9 + $0xc0] sm:$0xf]  ;;  %v335_v9 = vrot.slane %v334_v24, 4  ;;  %4412 = vmatprep.subr.bf16.mxu1 %v4739_v52 }
  0x68   : > { %1216 = vst [vmem:[#allocation2 + $0x5c] sm:$0xf] %v1112_v21  ;;  %461 = vst [vmem:[#allocation2 + $0x34] sm:$0xf] %v330_v59  ;;  %v863_v3 = vor.u32 %v862_v10, %v5145_v15  ;;  %v868_v7 = vrot.slane %v866_v51, 5  ;;  %v880_v17 = vshrl.u32 %v5364_v23, 16 }
  0x69   : > { %v872_v58 = vrot.slane %v870_v53, 4  ;;  %v5415_v0 = vrot.slane %v876_v16, 5  ;;  %v2333_v34 = vrot.slane %v2331_v37, 4  ;;  %v2337_v13 = vshll.u32 %v4160_v57, 16  ;;  %v3954_v25 = vld [vmem:[%s4945_s9 + $0x114] sm:$0xf] }
  0x6a   : > { %v340_v15 = vsel %vm4977_vm2, %v335_v9, %v5396_v18  ;;  %v864_v21 = vrot.slane %v863_v3, 4  ;;  %v2341_v20 = vshrl.u32 %v4160_v57, 16  ;;  %v2347_v4 = vshll.u32 %v5411_v31, 16  ;;  %v3966_v37 = vld [vmem:[%s4945_s9 + $0x68] sm:$0xf]  ;;  %4413 = vmatpush3.bf16.msra.mxu1 %v4740_v11 }
  0x6b   : > { %462 = vst [vmem:[#allocation2 + $0x40] sm:$0xf] %v340_v15  ;;  %v873_v42 = vor.u32 %v872_v58, %v868_v7  ;;  %v2334_v26 = vor.u32 %v2333_v34, %v5180_v45  ;;  %v5432_v35 = vrot.slane %v2337_v13, 5  ;;  %v2351_v24 = vshrl.u32 %v5411_v31, 16  ;;  %v5436_v10 = vld [vmem:[%s4945_s9 + $0x118] sm:$0xf]  ;;  %4414 = vmatprep.subr.bf16.mxu1 %v4741_v1 }
  0x6c   : > { %v869_v12 = vsel %vm4977_vm2, %v864_v21, %v868_v7  ;;  %v2343_v51 = vrot.slane %v2341_v20, 4  ;;  %v5440_v57 = vrot.slane %v2347_v4, 5  ;;  %v576_v59 = vrot.slane %v574_v32, 4  ;;  %v3987_v53 = vld [vmem:[%s4945_s9 + $0x7c] sm:$0xf]  ;;  %v4742_v45 = vld [vmem:[%s6317_s1] sm:$0xff]  }
  0x6d   : > { %v874_v16 = vrot.slane %v873_v42, 4  ;;  %v5448_v9 = vrot.slane %v2334_v26, 4  ;;  %v580_v3 = vshll.u32 %v3954_v25, 16  ;;  %v584_v58 = vshrl.u32 %v3954_v25, 16  ;;  %v5451_v52 = vld [vmem:[%s4945_s9 + $0x80] sm:$0xf] }
  0x6e   : > { %v4757_v7 = vld [vmem:[%s6317_s1 + $0x238] sm:$0xff]   ;;  %v2344_v40 = vor.u32 %v2343_v51, %v5432_v35  ;;  %v577_v32 = vor.u32 %v576_v59, %v5287_v29  ;;  %v590_v34 = vshll.u32 %v5436_v10, 16  ;;  %v594_v13 = vshrl.u32 %v5436_v10, 16  ;;  %v3967_v11 = vld [vmem:[%s4945_s9 + $0x6c] sm:$0xf]  ;;  %4415 = vmatpush3.bf16.msra.mxu1 %v4742_v45 }
  0x6f   : > { %v4720_v15 = vld [vmem:[#allocation2 + $0x50] ss:$12 sps:$4 sm:$0xff]   ;;  %v879_v20 = vsel %vm4977_vm2, %v874_v16, %v5415_v0  ;;  %v2340_v4 = vsel %vm4977_vm2, %v5448_v9, %v5432_v35  ;;  %v582_v25 = vrot.slane %v580_v3, 5  ;;  %v586_v10 = vrot.slane %v584_v58, 4  ;;  %4624 = vmatprep.subr.bf16.mxu1 %v4757_v7  ;;  %v5504_v45 = vld [vmem:[%s4945_s9 + $0x120] sm:$0xf] }
  0x70   : > { %v5460_v21 = vld [vmem:[#allocation2 + $0x30] sm:$0xff]  ;;  %2686 = vst [vmem:[#allocation2 + $0x50] sm:$0xf] %v2573_v33  ;;  %2687 = vst [vmem:[#allocation2 + $0x5c] sm:$0xf] %v2583_v56  ;;  %v5477_v42 = vrot.slane %v2344_v40, 4  ;;  %4581 = vmatmul.mubr.bf16.gmra.mxu1 %v4720_v15 }
  0x71   : > { %787 = vst [vmem:[#allocation2 + $0x30] sm:$0xf] %v3966_v37  ;;  %1000 = vst [vmem:[#allocation2 + $0x34] sm:$0xf] %v869_v12  ;;  %v578_v26 = vrot.slane %v577_v32, 4  ;;  %v5479_v1 = vrot.slane %v590_v34, 5  ;;  %v587_v12 = vor.u32 %v586_v10, %v582_v25 }
  0x72   : > { %v1115_v51 = vrot.slane %v1113_v6, 4  ;;  %v1119_v59 = vshll.u32 %v3987_v53, 16  ;;  %v1123_v16 = vshrl.u32 %v3987_v53, 16  ;;  %v1129_v8 = vshll.u32 %v5451_v52, 16  ;;  %v4181_v43 = vld [vmem:[%s4945_s9 + $0x11c] sm:$0xf] }
  0x73   : > { %v5485_v33 = vld [vmem:[#allocation2 + $0x3c] sm:$0xff]  ;;  %v2350_v56 = vsel %vm4977_vm2, %v5477_v42, %v5440_v57  ;;  %v583_v37 = vsel %vm4977_vm2, %v578_v26, %v582_v25  ;;  %v1133_v38 = vshrl.u32 %v5451_v52, 16  ;;  %v588_v34 = vrot.slane %v587_v12, 4  ;;  %v4143_v26 = vld [vmem:[%s4945_s9 + $0x108] sm:$0xf] }
  0x74   : > { %v5495_v6 = vld [vmem:[%s4945_s9 + $0x120] sm:$0xf]  ;;  %788 = vst [vmem:[#allocation2 + $0x3c] sm:$0xf] %v3967_v11  ;;  %1001 = vst [vmem:[#allocation2 + $0x40] sm:$0xf] %v879_v20  ;;  %v1116_v53 = vor.u32 %v1115_v51, %v5319_v2 }
  0x75   : > { %678 = vst [vmem:[#allocation2 + $0x68] sm:$0xf] %v583_v37  ;;  %v1121_v3 = vrot.slane %v1119_v59, 5  ;;  %v1125_v58 = vrot.slane %v1123_v16, 4  ;;  %v5498_v40 = vrot.slane %v1129_v8, 5  ;;  %v2586_v52 = vrot.slane %v2584_v46, 4 }
  0x76   : > { %v3956_v32 = vld [vmem:[%s4945_s9 + $0x11c] sm:$0xf]  ;;  %v2590_v15 = vshll.u32 %v4181_v43, 16  ;;  %v2594_v25 = vshrl.u32 %v4181_v43, 16  ;;  %v1117_v20 = vrot.slane %v1116_v53, 4  ;;  %v2600_v2 = vshll.u32 %v5495_v6, 16 }
  0x77   : > { %v1126_v11 = vor.u32 %v1125_v58, %v1121_v3  ;;  %v2604_v42 = vshrl.u32 %v5495_v6, 16  ;;  %v4144_v10 = vld [vmem:[%s4945_s9 + $0x10c] sm:$0xf]  ;;  %v593_v7 = vsel %vm4977_vm2, %v588_v34, %v5479_v1  ;;  %v2587_v5 = vor.u32 %v2586_v52, %v5348_v49  ;;  %v3989_v37 = vld [vmem:[%s4945_s9 + $0x84] sm:$0xf] }
  0x78   : > { %v5514_v46 = vrot.slane %v2590_v15, 5  ;;  %v2596_v51 = vrot.slane %v2594_v25, 4  ;;  %679 = vst [vmem:[#allocation2 + $0x74] sm:$0xf] %v593_v7  ;;  %v1122_v59 = vsel %vm4977_vm2, %v1117_v20, %v1121_v3  ;;  %v5518_v8 = vrot.slane %v2600_v2, 5  ;;  %v1233_v12 = vld [vmem:[#allocation2 + $0x30] sm:$0xff] }
  0x79   : > { %v1127_v16 = vrot.slane %v1126_v11, 4  ;;  %v596_v43 = vrot.slane %v594_v13, 4  ;;  %v5521_v6 = vrot.slane %v2587_v5, 4  ;;  %v600_v58 = vshll.u32 %v3956_v32, 16  ;;  %v5525_v34 = vld [vmem:[%s4945_s9 + $0x88] sm:$0xf] }
  0x7a   : > { %v2597_v53 = vor.u32 %v2596_v51, %v5514_v46  ;;  %v604_v49 = vshrl.u32 %v3956_v32, 16  ;;  %v610_v15 = vshll.u32 %v5504_v45, 16  ;;  %v614_v3 = vshrl.u32 %v5504_v45, 16  ;;  %v4183_v7 = vld [vmem:[%s4945_s9 + $0x124] sm:$0xf] }
  0x7b   : > { %v597_v52 = vor.u32 %v596_v43, %v5479_v1  ;;  %v1235_v25 = vld [vmem:[#allocation2 + $0x3c] sm:$0xff]  ;;  %v1132_v11 = vsel %vm4977_vm2, %v1127_v16, %v5498_v40  ;;  %2258 = vst [vmem:[#allocation2 + $0x30] sm:$0xf] %v4143_v26  ;;  %v602_v16 = vrot.slane %v600_v58, 5  ;;  %v2593_v26 = vsel %vm4977_vm2, %v5521_v6, %v5514_v46  ;;  %v3918_v35 = vld [vmem:[%s4945_s9 + $0x108] sm:$0xf] }
  0x7c   : > { %v4725_v20 = vld [vmem:[#allocation2 + $0x34] ss:$12 sps:$4 sm:$0xff]   ;;  %v5530_v13 = vld [vmem:[#allocation2 + $0x68] sm:$0xf]  ;;  %v5535_v2 = vrot.slane %v2597_v53, 4  ;;  %v4049_v5 = vcombine.low %v1233_v12, %v1235_v25  ;;  %v606_v43 = vrot.slane %v604_v49, 4 }
  0x7d   : > { %2259 = vst [vmem:[#allocation2 + $0x3c] sm:$0xf] %v4144_v10  ;;  %2471 = vst [vmem:[#allocation2 + $0x34] sm:$0xf] %v2340_v4  ;;  %v598_v51 = vrot.slane %v597_v52, 4  ;;  %1626 = vmatprep.mubr.bf16.mxu0 %v4725_v20  ;;  %v5551_v10 = vrot.slane %v610_v15, 5 }
  0x7e   : > { %2472 = vst [vmem:[#allocation2 + $0x40] sm:$0xf] %v2350_v56  ;;  %1217 = vst [vmem:[#allocation2 + $0x68] sm:$0xf] %v1122_v59  ;;  %v1135_v53 = vrot.slane %v1133_v38, 4  ;;  %v1139_v29 = vshll.u32 %v3989_v37, 16  ;;  %1627 = vmatmul.mubr.bf16.gmra.mxu0 %v4049_v5  ;;  %v607_v4 = vor.u32 %v606_v43, %v602_v16  ;;  %v2603_v38 = vsel %vm4977_vm2, %v5535_v2, %v5518_v8 }
  0x7f   : > { %v603_v9 = vsel %vm4977_vm2, %v598_v51, %v602_v16  ;;  %v1143_v56 = vshrl.u32 %v3989_v37, 16  ;;  %v1149_v59 = vshll.u32 %v5525_v34, 16  ;;  %v5558_v12 = vld [vmem:[%s4945_s9 + $0x128] sm:$0xf]  ;;  %v3919_v58 = vld [vmem:[%s4945_s9 + $0x10c] sm:$0xf] }
  0x80   : > { %246 = vst [vmem:[#allocation2 + $0x48] sm:$0xf] %v3918_v35  ;;  %v5561_v49 = vld [vmem:[#allocation2 + $0x74] sm:$0xf]  ;;  %680 = vst [vmem:[#allocation2 + $0x80] sm:$0xf] %v603_v9  ;;  %v1136_v46 = vor.u32 %v1135_v53, %v5498_v40 }
  0x81   : > { %v1141_v6 = vrot.slane %v1139_v29, 5  ;;  %v2606_v52 = vrot.slane %v2604_v42, 4  ;;  %247 = vst [vmem:[#allocation2 + $0x54] sm:$0xf] %v3919_v58  ;;  %1218 = vst [vmem:[#allocation2 + $0x74] sm:$0xf] %v1132_v11 }
  0x82   : > { %v608_v37 = vrot.slane %v607_v4, 4  ;;  %v1145_v15 = vrot.slane %v1143_v56, 4  ;;  %v1153_v25 = vshrl.u32 %v5525_v34, 16  ;;  %v2610_v20 = vshll.u32 %v4183_v7, 16  ;;  %v3935_v2 = vld [vmem:[%s4945_s9 + $0xbc] sm:$0xf] }
  0x83   : > { %v1137_v5 = vrot.slane %v1136_v46, 4  ;;  %v2607_v51 = vor.u32 %v2606_v52, %v5518_v8  ;;  %v2614_v16 = vshrl.u32 %v4183_v7, 16  ;;  %v2620_v43 = vshll.u32 %v5558_v12, 16  ;;  %v5580_v53 = vld [vmem:[%s4945_s9 + $0xc0] sm:$0xf] }
  0x84   : > { %v613_v29 = vsel %vm4977_vm2, %v608_v37, %v5551_v10  ;;  %v1146_v40 = vor.u32 %v1145_v15, %v1141_v6  ;;  %v5575_v42 = vrot.slane %v1149_v59, 5  ;;  %v5577_v11 = vrot.slane %v2610_v20, 5  ;;  %v806_v15 = vld [vmem:[%s4945_s9 + $0x24] sm:$0xf]  ;;  %v5646_v31 = vld [vmem:[%s4945_s9 + $0x128] sm:$0xf] }
  0x85   : > { %681 = vst [vmem:[#allocation2 + $0x8c] sm:$0xf] %v613_v29  ;;  %v1142_v8 = vsel %vm4977_vm2, %v1137_v5, %v1141_v6  ;;  %v5584_v7 = vrot.slane %v2607_v51, 4  ;;  %v2616_v35 = vrot.slane %v2614_v16, 4  ;;  %v2624_v9 = vshrl.u32 %v5558_v12, 16 }
  0x86   : > { %v1147_v4 = vrot.slane %v1146_v40, 4  ;;  %v343_v56 = vrot.slane %v341_v63, 4  ;;  %v347_v59 = vshll.u32 %v3935_v2, 16  ;;  %v351_v58 = vshrl.u32 %v3935_v2, 16  ;;  %v5605_v16 = vld [vmem:[%s4945_s9 + $0x28] sm:$0xf] }
  0x87   : > { %v2613_v46 = vsel %vm4977_vm2, %v5584_v7, %v5577_v11  ;;  %v2617_v52 = vor.u32 %v2616_v35, %v5577_v11  ;;  %v5594_v6 = vrot.slane %v2620_v43, 5  ;;  %v357_v37 = vshll.u32 %v5580_v53, 16  ;;  %v5598_v20 = vld [vmem:[#allocation2 + $0x80] sm:$0xf] }
  0x88   : > { %v1152_v36 = vsel %vm4977_vm2, %v1147_v4, %v5575_v42  ;;  %v344_v63 = vor.u32 %v343_v56, %v5396_v18  ;;  %v349_v5 = vrot.slane %v347_v59, 5  ;;  %v353_v51 = vrot.slane %v351_v58, 4  ;;  %v4727_v2 = vld [vmem:[#allocation2 + $0x68] ss:$12 sps:$4 sm:$0xff]   ;;  %1219 = vst [vmem:[#allocation2 + $0x80] sm:$0xf] %v1142_v8 }
  0x89   : > { %v5607_v43 = vrot.slane %v2617_v52, 4  ;;  %v5609_v29 = vrot.slane %v357_v37, 5  ;;  %2688 = vst [vmem:[#allocation2 + $0x68] sm:$0xf] %v2593_v26  ;;  %2689 = vst [vmem:[#allocation2 + $0x74] sm:$0xf] %v2603_v38  ;;  %4584 = vmatprep.mubr.bf16.mxu1 %v4727_v2 }
  0x8a   : > { %v345_v18 = vrot.slane %v344_v63, 4  ;;  %v354_v4 = vor.u32 %v353_v51, %v349_v5  ;;  %v882_v56 = vrot.slane %v880_v17, 4  ;;  %v886_v59 = vshll.u32 %v806_v15, 16  ;;  %v4162_v8 = vld [vmem:[%s4945_s9 + $0xc4] sm:$0xf] }
  0x8b   : > { %v2623_v58 = vsel %vm4977_vm2, %v5607_v43, %v5594_v6  ;;  %v361_v52 = vshrl.u32 %v5580_v53, 16  ;;  %v890_v37 = vshrl.u32 %v806_v15, 16  ;;  %v896_v35 = vshll.u32 %v5605_v16, 16  ;;  %v5625_v26 = vld [vmem:[%s4945_s9 + $0xc8] sm:$0xf] }
  0x8c   : > { %v5627_v38 = vld [vmem:[#allocation2 + $0x8c] sm:$0xf]  ;;  %v350_v23 = vsel %vm4977_vm2, %v345_v18, %v349_v5  ;;  %v355_v17 = vrot.slane %v354_v4, 4  ;;  %v883_v63 = vor.u32 %v882_v56, %v5415_v0  ;;  %v888_v51 = vrot.slane %v886_v59, 5  ;;  %v3958_v4 = vld [vmem:[%s4945_s9 + $0x124] sm:$0xf] }
  0x8d   : > { %1220 = vst [vmem:[#allocation2 + $0x8c] sm:$0xf] %v1152_v36  ;;  %463 = vst [vmem:[#allocation2 + $0x4c] sm:$0xf] %v350_v23  ;;  %v892_v2 = vrot.slane %v890_v37, 4  ;;  %v900_v15 = vshrl.u32 %v5605_v16, 16 }
  0x8e   : > { %v2353_v43 = vrot.slane %v2351_v24, 4  ;;  %v2357_v40 = vshll.u32 %v4162_v8, 16  ;;  %v360_v1 = vsel %vm4977_vm2, %v355_v17, %v5609_v29  ;;  %v884_v5 = vrot.slane %v883_v63, 4  ;;  %v3968_v24 = vld [vmem:[%s4945_s9 + $0x70] sm:$0xf] }
  0x8f   : > { %v2361_v18 = vshrl.u32 %v4162_v8, 16  ;;  %v2367_v0 = vshll.u32 %v5625_v26, 16  ;;  %464 = vst [vmem:[#allocation2 + $0x58] sm:$0xf] %v360_v1  ;;  %v893_v36 = vor.u32 %v892_v2, %v888_v51  ;;  %v5640_v56 = vrot.slane %v896_v35, 5 }
  0x90   : > { %v2354_v59 = vor.u32 %v2353_v43, %v5440_v57  ;;  %v5643_v37 = vrot.slane %v2357_v40, 5  ;;  %v889_v23 = vsel %vm4977_vm2, %v884_v5, %v888_v51  ;;  %v616_v1 = vrot.slane %v614_v3, 4  ;;  %v3969_v2 = vld [vmem:[%s4945_s9 + $0x74] sm:$0xf]  ;;  %v3991_v5 = vld [vmem:[%s4945_s9 + $0x8c] sm:$0xf] }
  0x91   : > { %v2363_v8 = vrot.slane %v2361_v18, 4  ;;  %v894_v35 = vrot.slane %v893_v36, 4  ;;  %v620_v57 = vshll.u32 %v3958_v4, 16  ;;  %v624_v40 = vshrl.u32 %v3958_v4, 16  ;;  %v5668_v4 = vld [vmem:[%s4945_s9 + $0x90] sm:$0xf] }
  0x92   : > { %v5654_v63 = vrot.slane %v2354_v59, 4  ;;  %v5658_v32 = vrot.slane %v2367_v0, 5  ;;  %v617_v14 = vor.u32 %v616_v1, %v5551_v10  ;;  %v630_v51 = vshll.u32 %v5646_v31, 16  ;;  %v5693_v1 = vld [vmem:[%s4945_s9 + $0x130] sm:$0xf] }
  0x93   : > { %v2364_v43 = vor.u32 %v2363_v8, %v5643_v37  ;;  %v899_v45 = vsel %vm4977_vm2, %v894_v35, %v5640_v56  ;;  %v622_v3 = vrot.slane %v620_v57, 5  ;;  %v626_v18 = vrot.slane %v624_v40, 4  ;;  %v4185_v35 = vld [vmem:[%s4945_s9 + $0x12c] sm:$0xf]  ;;  %v4187_v17 = vld [vmem:[%s4945_s9 + $0x134] sm:$0xf] }
  0x94   : > { %v634_v36 = vshrl.u32 %v5646_v31, 16  ;;  %v4729_v59 = vld [vmem:[#allocation2 + $0x80] ss:$12 sps:$4 sm:$0xff]   ;;  %v2360_v31 = vsel %vm4977_vm2, %v5654_v63, %v5643_v37  ;;  %v618_v57 = vrot.slane %v617_v14, 4  ;;  %v632_v7 = vrot.slane %v630_v51, 5 }
  0x95   : > { %v5670_v0 = vld [vmem:[#allocation2 + $0x48] sm:$0xff]  ;;  %v5672_v8 = vrot.slane %v2364_v43, 4  ;;  %2690 = vst [vmem:[#allocation2 + $0x80] sm:$0xf] %v2613_v46  ;;  %2691 = vst [vmem:[#allocation2 + $0x8c] sm:$0xf] %v2623_v58  ;;  %v627_v40 = vor.u32 %v626_v18, %v622_v3  ;;  %4585 = vmatmul.mubr.bf16.gmra.mxu1 %v4729_v59 }
  0x96   : > { %789 = vst [vmem:[#allocation2 + $0x48] sm:$0xf] %v3968_v24  ;;  %1002 = vst [vmem:[#allocation2 + $0x4c] sm:$0xf] %v889_v23  ;;  %v1155_v43 = vrot.slane %v1153_v25, 4  ;;  %v5695_v11 = vld [vmem:[#allocation2 + $0x54] sm:$0xff]  ;;  %v623_v34 = vsel %vm4977_vm2, %v618_v57, %v622_v3 }
  0x97   : > { %v1159_v46 = vshll.u32 %v3991_v5, 16  ;;  %v1163_v58 = vshrl.u32 %v3991_v5, 16  ;;  %v1169_v24 = vshll.u32 %v5668_v4, 16  ;;  %790 = vst [vmem:[#allocation2 + $0x54] sm:$0xf] %v3969_v2  ;;  %v2370_v14 = vsel %vm4977_vm2, %v5672_v8, %v5658_v32 }
  0x98   : > { %1003 = vst [vmem:[#allocation2 + $0x58] sm:$0xf] %v899_v45  ;;  %v628_v25 = vrot.slane %v627_v40, 4  ;;  %v1156_v37 = vor.u32 %v1155_v43, %v5575_v42  ;;  %v3960_v23 = vld [vmem:[%s4945_s9 + $0x12c] sm:$0xf]  ;;  %v1173_v2 = vshrl.u32 %v5668_v4, 16 }
  0x99   : > { %682 = vst [vmem:[#allocation2 + $0x98] sm:$0xf] %v623_v34  ;;  %v1161_v63 = vrot.slane %v1159_v46, 5  ;;  %v1165_v51 = vrot.slane %v1163_v58, 4  ;;  %v2626_v5 = vrot.slane %v2624_v9, 4  ;;  %v2630_v8 = vshll.u32 %v4185_v35, 16 }
  0x9a   : > { %v3961_v45 = vld [vmem:[%s4945_s9 + $0x130] sm:$0x1]  ;;  %v633_v18 = vsel %vm4977_vm2, %v628_v25, %v632_v7  ;;  %v1157_v59 = vrot.slane %v1156_v37, 4  ;;  %v2634_v3 = vshrl.u32 %v4185_v35, 16  ;;  %v4146_v40 = vld [vmem:[%s4945_s9 + $0x114] sm:$0xf] }
  0x9b   : > { %v4145_v57 = vld [vmem:[%s4945_s9 + $0x110] sm:$0xf]  ;;  %683 = vst [vmem:[#allocation2 + $0xa4] sm:$0xf] %v633_v18  ;;  %v1166_v42 = vor.u32 %v1165_v51, %v1161_v63  ;;  %v1171_v43 = vrot.slane %v1169_v24, 5  ;;  %v2627_v46 = vor.u32 %v2626_v5, %v5594_v6  ;;  %v2640_v4 = vshll.u32 %v5693_v1, 16 }
  0x9c   : > { %v5716_v12 = vrot.slane %v2630_v8, 5  ;;  %v2636_v9 = vrot.slane %v2634_v3, 4  ;;  %v2644_v58 = vshrl.u32 %v5693_v1, 16  ;;  %v636_v34 = vrot.slane %v634_v36, 4  ;;  %v3993_v25 = vld [vmem:[%s4945_s9 + $0x94] sm:$0xf] }
  0x9d   : > { %v1237_v37 = vld [vmem:[#allocation2 + $0x48] sm:$0xff]  ;;  %v1162_v35 = vsel %vm4977_vm2, %v1157_v59, %v1161_v63  ;;  %v1167_v10 = vrot.slane %v1166_v42, 4  ;;  %v5722_v18 = vrot.slane %v2627_v46, 4  ;;  %v640_v24 = vshll.u32 %v3960_v23, 16  ;;  %v3994_v51 = vld [vmem:[%s4945_s9 + $0x98] sm:$0x1] }
  0x9e   : > { %v2637_v6 = vor.u32 %v2636_v9, %v5716_v12  ;;  %v637_v5 = vor.u32 %v636_v34, %v632_v7  ;;  %v644_v8 = vshrl.u32 %v3960_v23, 16  ;;  %v650_v28 = vshll.u32 %v3961_v45, 16  ;;  %2260 = vst [vmem:[#allocation2 + $0x48] sm:$0xf] %v4145_v57  ;;  %v4188_v42 = vld [vmem:[%s4945_s9 + $0x138] sm:$0x1] }
  0x9f   : > { %v1239_v3 = vld [vmem:[#allocation2 + $0x54] sm:$0xff]  ;;  %v5726_v36 = vrot.slane %v2640_v4, 5  ;;  %v642_v41 = vrot.slane %v640_v24, 5  ;;  %v1175_v47 = vrot.slane %v1173_v2, 4  ;;  %v1172_v7 = vsel %vm4977_vm2, %v1167_v10, %v1171_v43  ;;  %v3920_v9 = vld [vmem:[%s4945_s9 + $0x110] sm:$0xf] }
  0xa0   : > { %v4734_v1 = vld [vmem:[#allocation2 + $0x4c] ss:$12 sps:$4 sm:$0xff]   ;;  %2261 = vst [vmem:[#allocation2 + $0x54] sm:$0xf] %v4146_v40  ;;  %v4052_v23 = vcombine.low %v1237_v37, %v1239_v3  ;;  %v638_v45 = vrot.slane %v637_v5, 4  ;;  %v646_v59 = vrot.slane %v644_v8, 4 }
  0xa1   : > { %2473 = vst [vmem:[#allocation2 + $0x4c] sm:$0xf] %v2360_v31  ;;  %2474 = vst [vmem:[#allocation2 + $0x58] sm:$0xf] %v2370_v14  ;;  %v5729_v63 = vld [vmem:[#allocation2 + $0x98] sm:$0xf]  ;;  %1634 = vmatprep.mubr.bf16.mxu0 %v4734_v1  ;;  %v1176_v2 = vor.u32 %v1175_v47, %v1171_v43 }
  0xa2   : > { %1221 = vst [vmem:[#allocation2 + $0x98] sm:$0xf] %v1162_v35  ;;  %v2638_v46 = vrot.slane %v2637_v6, 4  ;;  %v1179_v4 = vshll.u32 %v3993_v25, 16  ;;  %v1183_v57 = vshrl.u32 %v3993_v25, 16  ;;  %1635 = vmatmul.mubr.bf16.gmra.mxu0 %v4052_v23  ;;  %v643_v31 = vsel %vm4977_vm2, %v638_v45, %v642_v41 }
  0xa3   : > { %v5735_v40 = vld [vmem:[#allocation2 + $0xa4] sm:$0xf]  ;;  %v647_v14 = vor.u32 %v646_v59, %v642_v41  ;;  %v652_v10 = vrot.slane %v650_v28, 5  ;;  %v1189_v34 = vshll.u32 %v3994_v51, 16  ;;  %v3921_v37 = vld [vmem:[%s4945_s9 + $0x114] sm:$0xf]  ;;  %v2633_v25 = vsel %vm4977_vm2, %v5722_v18, %v5716_v12 }
  0xa4   : > { %248 = vst [vmem:[#allocation2 + $0x60] sm:$0xf] %v3920_v9  ;;  %1222 = vst [vmem:[#allocation2 + $0xa4] sm:$0xf] %v1172_v7  ;;  %v1177_v35 = vrot.slane %v1176_v2, 4  ;;  %v1181_v24 = vrot.slane %v1179_v4, 5  ;;  %v2643_v51 = vsel %vm4977_vm2, %v2638_v46, %v5726_v36 }
  0xa5   : > { %684 = vst [vmem:[#allocation2 + $0xb0] sm:$0xf] %v643_v31  ;;  %v1185_v47 = vrot.slane %v1183_v57, 4  ;;  %v2646_v43 = vrot.slane %v2644_v58, 4  ;;  %249 = vst [vmem:[#allocation2 + $0x6c] sm:$0xf] %v3921_v37  ;;  %v4111_v37 = vcombine.low %v5729_v63, %v5735_v40 }
  0xa6   : > { %v648_v6 = vrot.slane %v647_v14, 4  ;;  %v2650_v41 = vshll.u32 %v4187_v17, 16  ;;  %v2654_v5 = vshrl.u32 %v4187_v17, 16  ;;  %v3937_v28 = vld [vmem:[%s4945_s9 + $0xc4] sm:$0xf]  ;;  %v2660_v1 = vshll.u32 %v4188_v42, 16 }
  0xa7   : > { %v1186_v8 = vor.u32 %v1185_v47, %v1181_v24  ;;  %v2647_v3 = vor.u32 %v2646_v43, %v5726_v36  ;;  %v5754_v12 = vld [vmem:[%s4945_s9 + $0xc8] sm:$0xf]  ;;  %v363_v17 = vrot.slane %v361_v52, 4  ;;  %v1182_v18 = vsel %vm4977_vm2, %v1177_v35, %v1181_v24  ;;  %v808_v57 = vld [vmem:[%s4945_s9 + $0x2c] sm:$0xf]  ;;  %v4776_v63 = vld [vmem:[%s6317_s1 + $0x1c0] sm:$0xff]  }
  0xa8   : > { %v653_v58 = vsel %vm4977_vm2, %v648_v6, %v652_v10  ;;  %v5751_v7 = vrot.slane %v2650_v41, 5  ;;  %v2656_v23 = vrot.slane %v2654_v5, 4  ;;  %v1191_v36 = vrot.slane %v1189_v34, 5  ;;  %v5770_v14 = vld [vmem:[%s4945_s9 + $0x30] sm:$0xf] }
  0xa9   : > { %685 = vst [vmem:[#allocation2 + $0xbc] sm:$0xf] %v653_v58  ;;  %v1187_v45 = vrot.slane %v1186_v8, 4  ;;  %v367_v59 = vshll.u32 %v3937_v28, 16  ;;  %v5760_v42 = vrot.slane %v2647_v3, 4  ;;  %v364_v2 = vor.u32 %v363_v17, %v5609_v29 }
  0xaa   : > { %v2657_v46 = vor.u32 %v2656_v23, %v5751_v7  ;;  %v371_v4 = vshrl.u32 %v3937_v28, 16  ;;  %v5765_v53 = vrot.slane %v2660_v1, 5  ;;  %v377_v9 = vshll.u32 %v5754_v12, 16  ;;  %v4164_v47 = vld [vmem:[%s4945_s9 + $0xcc] sm:$0xf] }
  0xab   : > { %v369_v52 = vrot.slane %v367_v59, 5  ;;  %v381_v31 = vshrl.u32 %v5754_v12, 16  ;;  %v4736_v10 = vld [vmem:[#allocation2 + $0x98] ss:$12 sps:$4 sm:$0xff]   ;;  %v1192_v29 = vsel %vm4977_vm2, %v1187_v45, %v1191_v36  ;;  %v365_v35 = vrot.slane %v364_v2, 4 }
  0xac   : > { %v5772_v34 = vld [vmem:[#allocation2 + $0xb0] sm:$0xf]  ;;  %2692 = vst [vmem:[#allocation2 + $0x98] sm:$0xf] %v2633_v25  ;;  %2693 = vst [vmem:[#allocation2 + $0xa4] sm:$0xf] %v2643_v51  ;;  %4588 = vmatprep.mubr.bf16.mxu1 %v4736_v10 }
  0xad   : > { %1223 = vst [vmem:[#allocation2 + $0xb0] sm:$0xf] %v1182_v18  ;;  %v373_v24 = vrot.slane %v371_v4, 4  ;;  %v5780_v43 = vld [vmem:[%s4945_s9 + $0xd0] sm:$0xf]  ;;  %v2658_v6 = vrot.slane %v2657_v46, 4  ;;  %v370_v25 = vsel %vm4977_vm2, %v365_v35, %v369_v52 }
  0xae   : > { %v902_v41 = vrot.slane %v900_v15, 4  ;;  %v906_v5 = vshll.u32 %v808_v57, 16  ;;  %v910_v28 = vshrl.u32 %v808_v57, 16  ;;  %v379_v8 = vrot.slane %v377_v9, 5  ;;  %v3922_v3 = vld [vmem:[%s4945_s9 + $0x118] sm:$0xf] }
  0xaf   : > { %v374_v51 = vor.u32 %v373_v24, %v369_v52  ;;  %465 = vst [vmem:[#allocation2 + $0x64] sm:$0xf] %v370_v25  ;;  %v916_v16 = vshll.u32 %v5770_v14, 16  ;;  %250 = vst [vmem:[#allocation2 + $0x78] sm:$0xf] %v3922_v3  ;;  %v6322_v17 = vshrl.u32 %v5625_v26, 16 }
  0xb0   : > { %v5787_v1 = vld [vmem:[#allocation2 + $0xbc] sm:$0xf]  ;;  %v903_v58 = vor.u32 %v902_v41, %v5640_v56  ;;  %v908_v23 = vrot.slane %v906_v5, 5  ;;  %v912_v12 = vrot.slane %v910_v28, 4  ;;  %v2377_v45 = vshll.u32 %v4164_v47, 16 }
  0xb1   : > { %1224 = vst [vmem:[#allocation2 + $0xbc] sm:$0xf] %v1192_v29  ;;  %v375_v15 = vrot.slane %v374_v51, 4  ;;  %v2373_v18 = vrot.slane %v6322_v17, 4  ;;  %v2381_v36 = vshrl.u32 %v4164_v47, 16  ;;  %v2653_v56 = vsel %vm4977_vm2, %v5760_v42, %v5751_v7 }
  0xb2   : > { %v3923_v59 = vld [vmem:[%s4945_s9 + $0x11c] sm:$0xf]  ;;  %v904_v46 = vrot.slane %v903_v58, 4  ;;  %v913_v2 = vor.u32 %v912_v12, %v908_v23  ;;  %v2387_v4 = vshll.u32 %v5780_v43, 16  ;;  %v3939_v57 = vld [vmem:[%s4945_s9 + $0xcc] sm:$0xf]  ;;  %v2663_v7 = vsel %vm4977_vm2, %v2658_v6, %v5765_v53 }
  0xb3   : > { %251 = vst [vmem:[#allocation2 + $0x84] sm:$0xf] %v3923_v59  ;;  %v380_v52 = vsel %vm4977_vm2, %v375_v15, %v379_v8  ;;  %v2374_v26 = vor.u32 %v2373_v18, %v5658_v32  ;;  %v5803_v9 = vrot.slane %v2377_v45, 5  ;;  %v2383_v10 = vrot.slane %v2381_v36, 4  ;;  %v5806_v29 = vld [vmem:[%s4945_s9 + $0xd0] sm:$0xf] }
  0xb4   : > { %466 = vst [vmem:[#allocation2 + $0x70] sm:$0xf] %v380_v52  ;;  %v914_v42 = vrot.slane %v913_v2, 4  ;;  %v918_v35 = vrot.slane %v916_v16, 5  ;;  %v383_v24 = vrot.slane %v381_v31, 4  ;;  %v909_v32 = vsel %vm4977_vm2, %v904_v46, %v908_v23 }
  0xb5   : > { %v3970_v47 = vld [vmem:[%s4945_s9 + $0x78] sm:$0xf]  ;;  %v920_v41 = vshrl.u32 %v5770_v14, 16  ;;  %v387_v5 = vshll.u32 %v3939_v57, 16  ;;  %v391_v28 = vshrl.u32 %v3939_v57, 16  ;;  %v5815_v25 = vrot.slane %v2374_v26, 4 }
  0xb6   : > { %v2391_v51 = vshrl.u32 %v5780_v43, 16  ;;  %v384_v3 = vor.u32 %v383_v24, %v379_v8  ;;  %v397_v53 = vshll.u32 %v5806_v29, 16  ;;  %v810_v6 = vld [vmem:[%s4945_s9 + $0x34] sm:$0xf]  ;;  %v5820_v58 = vld [vmem:[#allocation2 + $0x60] sm:$0xff]  ;;  %v2384_v12 = vor.u32 %v2383_v10, %v5803_v9 }
  0xb7   : > { %v3971_v31 = vld [vmem:[%s4945_s9 + $0x7c] sm:$0xf]  ;;  %v5824_v16 = vrot.slane %v2387_v4, 5  ;;  %v389_v23 = vrot.slane %v387_v5, 5  ;;  %v393_v14 = vrot.slane %v391_v28, 4  ;;  %v919_v43 = vsel %vm4977_vm2, %v914_v42, %v918_v35 }
  0xb8   : > { %v5827_v15 = vld [vmem:[%s4945_s9 + $0x38] sm:$0xf]  ;;  %v4738_v17 = vld [vmem:[#allocation2 + $0xb0] ss:$12 sps:$4 sm:$0xff]   ;;  %791 = vst [vmem:[#allocation2 + $0x60] sm:$0xf] %v3970_v47  ;;  %v4114_v45 = vcombine.low %v5772_v34, %v5787_v1  ;;  %v2380_v57 = vsel %vm4977_vm2, %v5815_v25, %v5803_v9 }
  0xb9   : > { %1004 = vst [vmem:[#allocation2 + $0x64] sm:$0xf] %v909_v32  ;;  %v385_v8 = vrot.slane %v384_v3, 4  ;;  %v401_v18 = vshrl.u32 %v5806_v29, 16  ;;  %2694 = vst [vmem:[#allocation2 + $0xb0] sm:$0xf] %v2653_v56  ;;  %v394_v36 = vor.u32 %v393_v14, %v389_v23  ;;  %4589 = vmatmul.mubr.bf16.gmra.mxu1 %v4738_v17 }
  0xba   : > { %2695 = vst [vmem:[#allocation2 + $0xbc] sm:$0xf] %v2663_v7  ;;  %v5834_v59 = vrot.slane %v397_v53, 5  ;;  %v922_v46 = vrot.slane %v920_v41, 4  ;;  %v926_v2 = vshll.u32 %v810_v6, 16  ;;  %v930_v26 = vshrl.u32 %v810_v6, 16 }
  0xbb   : > { %v4166_v4 = vld [vmem:[%s4945_s9 + $0xd4] sm:$0xf]  ;;  %v390_v52 = vsel %vm4977_vm2, %v385_v8, %v389_v23  ;;  %v936_v10 = vshll.u32 %v5827_v15, 16  ;;  %v5845_v56 = vld [vmem:[%s4945_s9 + $0xd8] sm:$0xf]  ;;  %v5847_v29 = vld [vmem:[#allocation2 + $0x6c] sm:$0xff]  ;;  %v6323_v7 = vcombine.high %v5009_v39, %v5011_v44 }
  0xbc   : > { %v395_v42 = vrot.slane %v394_v36, 4  ;;  %467 = vst [vmem:[#allocation2 + $0x7c] sm:$0xf] %v390_v52  ;;  %v923_v24 = vor.u32 %v922_v46, %v918_v35  ;;  %v928_v47 = vrot.slane %v926_v2, 5  ;;  %v2393_v32 = vrot.slane %v2391_v51, 4 }
  0xbd   : > { %2076 = vmatprep.mubr.bf16.mxu1 %v6323_v7  ;;  %792 = vst [vmem:[#allocation2 + $0x6c] sm:$0xf] %v3971_v31  ;;  %1005 = vst [vmem:[#allocation2 + $0x70] sm:$0xf] %v919_v43  ;;  %v2385_v41 = vrot.slane %v2384_v12, 4  ;;  %v932_v5 = vrot.slane %v930_v26, 4 }
  0xbe   : > { %v2397_v28 = vshll.u32 %v4166_v4, 16  ;;  %v2401_v3 = vshrl.u32 %v4166_v4, 16  ;;  %v400_v53 = vsel %vm4977_vm2, %v395_v42, %v5834_v59  ;;  %v924_v6 = vrot.slane %v923_v24, 4  ;;  %v3924_v51 = vld [vmem:[%s4945_s9 + $0x120] sm:$0xf] }
  0xbf   : > { %v940_v23 = vshrl.u32 %v5827_v15, 16  ;;  %v2394_v35 = vor.u32 %v2393_v32, %v5824_v16  ;;  %v3925_v31 = vld [vmem:[%s4945_s9 + $0x124] sm:$0xf]  ;;  %468 = vst [vmem:[#allocation2 + $0x88] sm:$0xf] %v400_v53  ;;  %v933_v12 = vor.u32 %v932_v5, %v928_v47  ;;  %v2407_v43 = vshll.u32 %v5845_v56, 16 }
  0xc0   : > { %v5859_v14 = vrot.slane %v2397_v28, 5  ;;  %v2403_v17 = vrot.slane %v2401_v3, 4  ;;  %252 = vst [vmem:[#allocation2 + $0x90] sm:$0xf] %v3924_v51  ;;  %253 = vst [vmem:[#allocation2 + $0x9c] sm:$0xf] %v3925_v31  ;;  %v929_v15 = vsel %vm4977_vm2, %v924_v6, %v928_v47  ;;  %v6324_v51 = vcombine.low %v5009_v39, %v5011_v44 }
  0xc1   : > { %v3941_v8 = vld [vmem:[%s4945_s9 + $0xd4] sm:$0xf]  ;;  %v4147_v36 = vld [vmem:[%s4945_s9 + $0x118] sm:$0xf]  ;;  %v4148_v46 = vld [vmem:[%s4945_s9 + $0x11c] sm:$0xf] }
  0xc2   : > { %v938_v2 = vrot.slane %v936_v10, 5  ;;  %v5867_v4 = vrot.slane %v2394_v35, 4  ;;  %v5870_v52 = vld [vmem:[%s4945_s9 + $0xd8] sm:$0xf]  ;;  %v403_v26 = vrot.slane %v401_v18, 4  ;;  %v934_v42 = vrot.slane %v933_v12, 4  ;;  %2077 = vmatmul.mubr.bf16.vlgmr.msra.gmra.mxu1 %v6324_v51 }
  0xc3   : > { %v3972_v7 = vld [vmem:[%s4945_s9 + $0x80] sm:$0xf]  ;;  %v2404_v24 = vor.u32 %v2403_v17, %v5859_v14  ;;  %v407_v32 = vshll.u32 %v3941_v8, 16  ;;  %v411_v5 = vshrl.u32 %v3941_v8, 16  ;;  %v4760_v28 = vld [vmem:[%s6317_s1 + $0x230] sm:$0xff]   ;;  %v2390_v10 = vsel %vm4977_vm2, %v2385_v41, %v5824_v16  ;;  %v5888_v31 = vld [vmem:[#allocation2 + $0x78] sm:$0xff] }
  0xc4   : > { %v1241_v3 = vld [vmem:[#allocation2 + $0x60] sm:$0xff]  ;;  %v2411_v53 = vshrl.u32 %v5845_v56, 16  ;;  %v404_v18 = vor.u32 %v403_v26, %v5834_v59  ;;  %v417_v6 = vshll.u32 %v5870_v52, 16  ;;  %v812_v35 = vld [vmem:[%s4945_s9 + $0x3c] sm:$0xf]  ;;  %v2400_v12 = vsel %vm4977_vm2, %v5867_v4, %v5859_v14  ;;  %v1243_v59 = vld [vmem:[#allocation2 + $0x6c] sm:$0xff] }
  0xc5   : > { %v3973_v47 = vld [vmem:[%s4945_s9 + $0x84] sm:$0xf]  ;;  %v5894_v16 = vrot.slane %v2407_v43, 5  ;;  %v409_v41 = vrot.slane %v407_v32, 5  ;;  %v413_v56 = vrot.slane %v411_v5, 4  ;;  %v939_v39 = vsel %vm4977_vm2, %v934_v42, %v938_v2  ;;  %v4811_v32 = vld [vmem:[%s6317_s1 + $0x238] sm:$0xff]  }
  0xc6   : > { %v5897_v17 = vld [vmem:[%s4945_s9 + $0x40] sm:$0xf]  ;;  %v4743_v8 = vld [vmem:[#allocation2 + $0x64] ss:$12 sps:$4 sm:$0xff]   ;;  %793 = vst [vmem:[#allocation2 + $0x78] sm:$0xf] %v3972_v7  ;;  %v6325_v26 = vcombine.high %v5175_v50, %v5211_v27  ;;  %4625 = vmatpush3.bf16.msra.mxu1 %v4811_v32 }
  0xc7   : > { %1006 = vst [vmem:[#allocation2 + $0x7c] sm:$0xf] %v929_v15  ;;  %v5901_v44 = vrot.slane %v2404_v24, 4  ;;  %v405_v51 = vrot.slane %v404_v18, 4  ;;  %v942_v43 = vrot.slane %v940_v23, 4  ;;  %v4055_v15 = vcombine.low %v1241_v3, %v1243_v59  ;;  %4626 = vmatprep.subr.bf16.mxu1 %v4760_v28  ;;  %1642 = vmatprep.mubr.bf16.mxu0 %v4743_v8  ;;  %v4772_v4 = vld [vmem:[%s6317_s1 + $0x210] sm:$0xff]  }
  0xc8   : > { %2084 = vmatprep.mubr.bf16.mxu1 %v6325_v26  ;;  %2262 = vst [vmem:[#allocation2 + $0x60] sm:$0xf] %v4147_v36  ;;  %2263 = vst [vmem:[#allocation2 + $0x6c] sm:$0xf] %v4148_v46  ;;  %v414_v7 = vor.u32 %v413_v56, %v409_v41  ;;  %v5914_v42 = vrot.slane %v417_v6, 5  ;;  %v946_v23 = vshll.u32 %v812_v35, 16 }
  0xc9   : > { %2475 = vst [vmem:[#allocation2 + $0x64] sm:$0xf] %v2380_v57  ;;  %2476 = vst [vmem:[#allocation2 + $0x70] sm:$0xf] %v2390_v10  ;;  %v4763_v36 = vld [vmem:[%s6317_s1 + $0x228] sm:$0xff]   ;;  %v410_v24 = vsel %vm4977_vm2, %v405_v51, %v409_v41  ;;  %v943_v9 = vor.u32 %v942_v43, %v938_v2  ;;  %v950_v25 = vshrl.u32 %v812_v35, 16  ;;  %1643 = vmatmul.mubr.bf16.gmra.mxu0 %v4055_v15 }
  0xca   : > { %v5919_v46 = vld [vmem:[#allocation2 + $0x84] sm:$0xff]  ;;  %v956_v57 = vshll.u32 %v5897_v17, 16  ;;  %v4168_v5 = vld [vmem:[%s4945_s9 + $0xdc] sm:$0xf]  ;;  %v415_v3 = vrot.slane %v414_v7, 4  ;;  %v421_v10 = vshrl.u32 %v5870_v52, 16  ;;  %4627 = vmatpush3.bf16.msra.mxu1 %v4760_v28  ;;  %v2410_v28 = vsel %vm4977_vm2, %v5901_v44, %v5894_v16 }
  0xcb   : > { %794 = vst [vmem:[#allocation2 + $0x84] sm:$0xf] %v3973_v47  ;;  %1007 = vst [vmem:[#allocation2 + $0x88] sm:$0xf] %v939_v39  ;;  %v5926_v18 = vrot.slane %v946_v23, 5  ;;  %v2413_v41 = vrot.slane %v2411_v53, 4  ;;  %4628 = vmatprep.subr.bf16.mxu1 %v4763_v36 }
  0xcc   : > { %469 = vst [vmem:[#allocation2 + $0x94] sm:$0xf] %v410_v24  ;;  %v5929_v6 = vld [vmem:[%s4945_s9 + $0xe0] sm:$0xf]  ;;  %v944_v47 = vrot.slane %v943_v9, 4  ;;  %v952_v35 = vrot.slane %v950_v25, 4  ;;  %v420_v52 = vsel %vm4977_vm2, %v415_v3, %v5914_v42  ;;  %v6326_v9 = vcombine.low %v5175_v50, %v5211_v27 }
  0xcd   : > { %v5934_v2 = vld [vmem:[%s6317_s1 + $0x220] sm:$0xff]   ;;  %v960_v56 = vshrl.u32 %v5897_v17, 16  ;;  %v2417_v59 = vshll.u32 %v4168_v5, 16  ;;  %v2414_v53 = vor.u32 %v2413_v41, %v5894_v16  ;;  %v2421_v8 = vshrl.u32 %v4168_v5, 16  ;;  %v3926_v26 = vld [vmem:[%s4945_s9 + $0x128] sm:$0xf] }
  0xce   : > { %v2427_v39 = vshll.u32 %v5929_v6, 16  ;;  %v4149_v51 = vld [vmem:[%s4945_s9 + $0x120] sm:$0xf]  ;;  %v4150_v43 = vld [vmem:[%s4945_s9 + $0x124] sm:$0xf]  ;;  %v953_v32 = vor.u32 %v952_v35, %v5926_v18  ;;  %v5951_v15 = vrot.slane %v956_v57, 5  ;;  %2085 = vmatmul.mubr.bf16.gmra.mxu1 %v6326_v9  ;;  %v949_v25 = vsel %vm4977_vm2, %v944_v47, %v5926_v18 }
  0xcf   : > { %470 = vst [vmem:[#allocation2 + $0xa0] sm:$0xf] %v420_v52  ;;  %v3974_v17 = vld [vmem:[%s4945_s9 + $0x88] sm:$0xf]  ;;  %v5953_v7 = vrot.slane %v2417_v59, 5  ;;  %v5963_v16 = vrot.slane %v2414_v53, 4  ;;  %v6327_v35 = vcombine.high %v5460_v21, %v5485_v33  ;;  %4629 = vmatpush3.bf16.msra.mxu1 %v4763_v36 }
  0xd0   : > { %v3927_v23 = vld [vmem:[%s4945_s9 + $0x12c] sm:$0xf]  ;;  %254 = vst [vmem:[#allocation2 + $0xa8] sm:$0xf] %v3926_v26  ;;  %v3943_v24 = vld [vmem:[%s4945_s9 + $0xdc] sm:$0xf]  ;;  %4630 = vmatprep.subr.bf16.mxu1 %v5934_v2 }
  0xd1   : > { %v2423_v44 = vrot.slane %v2421_v8, 4  ;;  %v2431_v57 = vshrl.u32 %v5929_v6, 16  ;;  %255 = vst [vmem:[#allocation2 + $0xb4] sm:$0xf] %v3927_v23  ;;  %v3944_v5 = vld [vmem:[%s4945_s9 + $0xe0] sm:$0x1]  ;;  %2092 = vmatprep.mubr.bf16.mxu1 %v6327_v35 }
  0xd2   : > { %v1245_v3 = vld [vmem:[#allocation2 + $0x78] sm:$0xff]  ;;  %v954_v41 = vrot.slane %v953_v32, 4  ;;  %v423_v50 = vrot.slane %v421_v10, 4  ;;  %v427_v27 = vshll.u32 %v3943_v24, 16  ;;  %v431_v59 = vshrl.u32 %v3943_v24, 16  ;;  %v1247_v26 = vld [vmem:[#allocation2 + $0x84] sm:$0xff] }
  0xd3   : > { %v2424_v18 = vor.u32 %v2423_v44, %v5953_v7  ;;  %v5971_v47 = vrot.slane %v2427_v39, 5  ;;  %v437_v52 = vshll.u32 %v3944_v5, 16  ;;  %v814_v53 = vld [vmem:[%s4945_s9 + $0x44] sm:$0xf]  ;;  %v962_v6 = vrot.slane %v960_v56, 4  ;;  %v4769_v8 = vld [vmem:[%s6317_s1 + $0x218] sm:$0xff]   ;;  %4631 = vmatpush3.bf16.msra.mxu1 %v5934_v2 }
  0xd4   : > { %v4746_v32 = vld [vmem:[#allocation2 + $0x7c] ss:$12 sps:$4 sm:$0xff]   ;;  %v5978_v10 = vld [vmem:[#allocation2 + $0x90] sm:$0xff]  ;;  %v424_v36 = vor.u32 %v423_v50, %v5914_v42  ;;  %v429_v23 = vrot.slane %v427_v27, 5  ;;  %v433_v39 = vrot.slane %v431_v59, 4  ;;  %v4101_v24 = vcombine.high %v5670_v0, %v5695_v11  ;;  %4632 = vmatprep.subr.bf16.mxu1 %v4769_v8 }
  0xd5   : > { %2264 = vst [vmem:[#allocation2 + $0x78] sm:$0xf] %v4149_v51  ;;  %2265 = vst [vmem:[#allocation2 + $0x84] sm:$0xf] %v4150_v43  ;;  %v4058_v56 = vcombine.low %v1245_v3, %v1247_v26  ;;  %v3975_v9 = vld [vmem:[%s4945_s9 + $0x8c] sm:$0xf]  ;;  %v959_v42 = vsel %vm4977_vm2, %v954_v41, %v5951_v15  ;;  %v963_v51 = vor.u32 %v962_v6, %v5951_v15  ;;  %1650 = vmatprep.mubr.bf16.mxu0 %v4746_v32 }
  0xd6   : > { %2477 = vst [vmem:[#allocation2 + $0x7c] sm:$0xf] %v2400_v12  ;;  %2478 = vst [vmem:[#allocation2 + $0x88] sm:$0xf] %v2410_v28  ;;  %v439_v44 = vrot.slane %v437_v52, 5  ;;  %v425_v43 = vrot.slane %v424_v36, 4  ;;  %v434_v35 = vor.u32 %v433_v39, %v429_v23  ;;  %v6328_v59 = vcombine.low %v5460_v21, %v5485_v33 }
  0xd7   : > { %795 = vst [vmem:[#allocation2 + $0x90] sm:$0xf] %v3974_v17  ;;  %1008 = vst [vmem:[#allocation2 + $0x94] sm:$0xf] %v949_v25  ;;  %v815_v5 = vld [vmem:[%s4945_s9 + $0x48] sm:$0x1]  ;;  %1651 = vmatmul.mubr.bf16.gmra.mxu0 %v4058_v56  ;;  %4633 = vmatpush3.bf16.msra.mxu1 %v4769_v8  ;;  %v2420_v8 = vsel %vm4977_vm2, %v5963_v16, %v5953_v7 }
  0xd8   : > { %v966_v50 = vshll.u32 %v814_v53, 16  ;;  %v970_v14 = vshrl.u32 %v814_v53, 16  ;;  %v5998_v12 = vld [vmem:[#allocation2 + $0x9c] sm:$0xff]  ;;  %v2425_v28 = vrot.slane %v2424_v18, 4  ;;  %v976_v17 = vshll.u32 %v815_v5, 16  ;;  %2093 = vmatmul.mubr.bf16.gmra.mxu1 %v6328_v59  ;;  %4634 = vmatprep.subr.bf16.mxu1 %v4772_v4  ;;  %v4775_v56 = vld [vmem:[%s6317_s1 + $0x208] sm:$0xff]  }
  0xd9   : > { %v4170_v25 = vld [vmem:[%s4945_s9 + $0xe4] sm:$0xf]  ;;  %v2433_v3 = vrot.slane %v2431_v57, 4  ;;  %796 = vst [vmem:[#allocation2 + $0x9c] sm:$0xf] %v3975_v9  ;;  %v430_v2 = vsel %vm4977_vm2, %v425_v43, %v429_v23  ;;  %v435_v15 = vrot.slane %v434_v35, 4  ;;  %2100 = vmatprep.mubr.bf16.mxu1 %v4101_v24  ;;  %v4110_v48 = vcombine.high %v5978_v10, %v5998_v12 }
  0xda   : > { %1009 = vst [vmem:[#allocation2 + $0xa0] sm:$0xf] %v959_v42  ;;  %v968_v41 = vrot.slane %v966_v50, 5  ;;  %v972_v27 = vrot.slane %v970_v14, 4  ;;  %471 = vst [vmem:[#allocation2 + $0xac] sm:$0xf] %v430_v2  ;;  %v2430_v24 = vsel %vm4977_vm2, %v2425_v28, %v5971_v47  ;;  %v4104_v14 = vcombine.high %v5820_v58, %v5847_v29 }
  0xdb   : > { %v4171_v18 = vld [vmem:[%s4945_s9 + $0xe8] sm:$0x1]  ;;  %v2437_v52 = vshll.u32 %v4170_v25, 16  ;;  %v2441_v53 = vshrl.u32 %v4170_v25, 16  ;;  %v440_v57 = vsel %vm4977_vm2, %v435_v15, %v439_v44  ;;  %v964_v6 = vrot.slane %v963_v51, 4  ;;  %4635 = vmatpush3.bf16.msra.mxu1 %v4772_v4  ;;  %v4778_v7 = vld [vmem:[%s6317_s1 + $0x200] sm:$0xff]  }
  0xdc   : > { %v973_v26 = vor.u32 %v972_v27, %v968_v41  ;;  %v4151_v32 = vld [vmem:[%s4945_s9 + $0x128] sm:$0xf]  ;;  %v4152_v36 = vld [vmem:[%s4945_s9 + $0x12c] sm:$0xf]  ;;  %472 = vst [vmem:[#allocation2 + $0xb8] sm:$0xf] %v440_v57  ;;  %v2434_v21 = vor.u32 %v2433_v3, %v5971_v47  ;;  %v4100_v51 = vcombine.low %v5670_v0, %v5695_v11  ;;  %4636 = vmatprep.subr.bf16.mxu1 %v4775_v56 }
  0xdd   : > { %v978_v23 = vrot.slane %v976_v17, 5  ;;  %v2439_v33 = vrot.slane %v2437_v52, 5  ;;  %v2443_v39 = vrot.slane %v2441_v53, 4  ;;  %v3976_v42 = vld [vmem:[%s4945_s9 + $0x90] sm:$0xf]  ;;  %v2447_v5 = vshll.u32 %v4171_v18, 16 }
  0xde   : > { %v1249_v9 = vld [vmem:[#allocation2 + $0x90] sm:$0xff]  ;;  %v974_v44 = vrot.slane %v973_v26, 4  ;;  %v969_v35 = vsel %vm4977_vm2, %v964_v6, %v968_v41  ;;  %v2435_v25 = vrot.slane %v2434_v21, 4  ;;  %v4103_v2 = vcombine.low %v5820_v58, %v5847_v29  ;;  %v4756_v26 = vld [vmem:[%s6317_s1 + $0x1b8] sm:$0xff]  }
  0xdf   : > { %v3977_v43 = vld [vmem:[%s4945_s9 + $0x94] sm:$0xf]  ;;  %v2444_v50 = vor.u32 %v2443_v39, %v2439_v33  ;;  %2266 = vst [vmem:[#allocation2 + $0x90] sm:$0xf] %v4151_v32  ;;  %v2449_v4 = vrot.slane %v2447_v5, 5  ;;  %4637 = vmatpush3.bf16.msra.mxu1 %v4775_v56  ;;  %v4107_v27 = vcombine.high %v5888_v31, %v5919_v46  ;;  %v4106_v29 = vcombine.low %v5888_v31, %v5919_v46 }
  0xe0   : > { %v979_v47 = vsel %vm4977_vm2, %v974_v44, %v978_v23  ;;  %2101 = vmatmul.mubr.bf16.gmra.mxu1 %v4100_v51  ;;  %4638 = vmatprep.subr.bf16.mxu1 %v4778_v7  ;;  %v4153_v15 = vld [vmem:[%s4945_s9 + $0x130] sm:$0xf]  ;;  %v4154_v41 = vld [vmem:[%s4945_s9 + $0x134] sm:$0xf]  ;;  %v2440_v18 = vsel %vm4977_vm2, %v2435_v25, %v2439_v33  ;;  %v6329_v6 = vcombine.low %v5059_v55, %v5064_v61  ;;  %v4767_v33 = vld [vmem:[%s6317_s1 + $0x1d8] sm:$0xff]  }
  0xe1   : > { %v1251_v16 = vld [vmem:[#allocation2 + $0x9c] sm:$0xff]  ;;  %v6033_v11 = vld [vmem:[#allocation2 + $0xa8] sm:$0xff]  ;;  %v2445_v3 = vrot.slane %v2444_v50, 4  ;;  %2108 = vmatprep.mubr.bf16.mxu1 %v4104_v14  ;;  %v4758_v32 = vld [vmem:[%s6317_s1 + $0x1f0] sm:$0xff]   ;;  %v6330_v31 = vcombine.low %v5118_v54, %v5153_v22  ;;  %v4109_v55 = vcombine.low %v5978_v10, %v5998_v12  ;;  %v6331_v46 = vcombine.low %v5273_v19, %v5313_v60 }
  0xe2   : > { %v4749_v17 = vld [vmem:[#allocation2 + $0x94] ss:$12 sps:$4 sm:$0xff]   ;;  %2267 = vst [vmem:[#allocation2 + $0x9c] sm:$0xf] %v4152_v36  ;;  %v4061_v0 = vcombine.low %v1249_v9, %v1251_v16  ;;  %797 = vst [vmem:[#allocation2 + $0xa8] sm:$0xf] %v3976_v42  ;;  %v6332_v60 = vcombine.low %v5369_v30, %v5401_v62  ;;  %v6333_v23 = vcombine.low %v5530_v13, %v5561_v49 }
  0xe3   : > { %2479 = vst [vmem:[#allocation2 + $0x94] sm:$0xf] %v2420_v8  ;;  %2480 = vst [vmem:[#allocation2 + $0xa0] sm:$0xf] %v2430_v24  ;;  %1658 = vmatprep.mubr.bf16.mxu0 %v4749_v17  ;;  %v716_v28 = vld [vmem:[#allocation2 + $0xb4] sm:$0xff]  ;;  %4639 = vmatpush3.bf16.msra.mxu1 %v4778_v7  ;;  %v2450_v52 = vsel %vm4977_vm2, %v2445_v3, %v2449_v4  ;;  %v4761_v54 = vld [vmem:[%s6317_s1 + $0x1e8] sm:$0xff]   ;;  %v6334_v13 = vcombine.low %v5598_v20, %v5627_v38 }
  0xe4   : > { %1010 = vst [vmem:[#allocation2 + $0xac] sm:$0xf] %v969_v35  ;;  %1659 = vmatmul.mubr.bf16.gmra.mxu0 %v4061_v0  ;;  %798 = vst [vmem:[#allocation2 + $0xb4] sm:$0xf] %v3977_v43  ;;  %v4759_v61 = vld [vmem:[%s6317_s1 + $0x1b0] sm:$0xff]   ;;  %v4113_v36 = vcombine.high %v6033_v11, %v716_v28  ;;  %v4762_v22 = vld [vmem:[%s6317_s1 + $0x1a8] sm:$0xff]   ;;  %v4112_v10 = vcombine.low %v6033_v11, %v716_v28 }
  0xe5   : > { %1011 = vst [vmem:[#allocation2 + $0xb8] sm:$0xf] %v979_v47  ;;  %v4764_v19 = vld [vmem:[%s6317_s1 + $0x1e0] sm:$0xff]   ;;  %v4782_v21 = vld [vmem:[#allocation2 + $0x8] ss:$12 sps:$4 sm:$0xff]   ;;  %v4768_v30 = vld [vmem:[%s6317_s1 + $0x198] sm:$0xff]  }
  0xe6   : > { %v4765_v12 = vld [vmem:[%s6317_s1 + $0x1a0] sm:$0xff]   ;;  %v4770_v62 = vld [vmem:[%s6317_s1 + $0x1d0] sm:$0xff]   ;;  %v4773_v9 = vld [vmem:[%s6317_s1 + $0x1c8] sm:$0xff]  }
  0xe7   : > { %v4783_v49 = vld [vmem:[#allocation2 + $0x20] ss:$12 sps:$4 sm:$0xff]   ;;  %v4771_v39 = vld [vmem:[%s6317_s1 + $0x190] sm:$0xff]   ;;  %v4790_v56 = vld [vmem:[#allocation2 + $0x38] ss:$12 sps:$4 sm:$0xff]  }
  0xe8   : > { %2109 = vmatmul.mubr.bf16.gmra.mxu1 %v4103_v2  ;;  %v4774_v20 = vld [vmem:[%s6317_s1 + $0x188] sm:$0xff]   ;;  %v4781_v38 = vld [vmem:[#allocation2 + $0x4] ss:$12 sps:$4 sm:$0xff]  }
  0xe9   : > { %2116 = vmatprep.mubr.bf16.mxu1 %v4107_v27  ;;  %v4791_v44 = vld [vmem:[#allocation2 + $0x50] ss:$12 sps:$4 sm:$0xff]   ;;  %v4777_v8 = vld [vmem:[%s6317_s1 + $0x180] sm:$0xff]   ;;  %v4798_v24 = vld [vmem:[#allocation2 + $0x68] ss:$12 sps:$4 sm:$0xff]  }
  0xea   : > { %v4779_v43 = vld [vmem:[#allocation2] ss:$12 sps:$4 sm:$0xff]   ;;  %v4784_v35 = vld [vmem:[#allocation2 + $0x1c] ss:$12 sps:$4 sm:$0xff]   ;;  %v4806_v34 = vld [vmem:[#allocation2 + $0x98] ss:$12 sps:$4 sm:$0xff]  }
  0xeb   : > { %v1253_v59 = vld [vmem:[#allocation2 + $0xa8] sm:$0xff]  ;;  %v4786_v1 = vld [vmem:[#allocation2 + $0x18] ss:$12 sps:$4 sm:$0xff]   ;;  %v4807_v14 = vld [vmem:[#allocation2 + $0xb0] ss:$12 sps:$4 sm:$0xff]  }
  0xec   : > { %v1255_v53 = vld [vmem:[#allocation2 + $0xb4] sm:$0xff]  ;;  %2268 = vst [vmem:[#allocation2 + $0xa8] sm:$0xf] %v4153_v15  ;;  %v4799_v50 = vld [vmem:[#allocation2 + $0x80] ss:$12 sps:$4 sm:$0xff]  }
  0xed   : > { %v4752_v57 = vld [vmem:[#allocation2 + $0xac] ss:$12 sps:$4 sm:$0xff]   ;;  %2269 = vst [vmem:[#allocation2 + $0xb4] sm:$0xf] %v4154_v41  ;;  %v4064_v58 = vcombine.low %v1253_v59, %v1255_v53  ;;  %v4789_v7 = vld [vmem:[#allocation2 + $0x30] ss:$12 sps:$4 sm:$0xff]  }
  0xee   : > { %2481 = vst [vmem:[#allocation2 + $0xac] sm:$0xf] %v2440_v18  ;;  %2482 = vst [vmem:[#allocation2 + $0xb8] sm:$0xf] %v2450_v52  ;;  %1666 = vmatprep.mubr.bf16.mxu0 %v4752_v57  ;;  %v4792_v16 = vld [vmem:[#allocation2 + $0x4c] ss:$12 sps:$4 sm:$0xff]  }
  0xef   : > { %1667 = vmatmul.mubr.bf16.gmra.mxu0 %v4064_v58  ;;  %v4794_v4 = vld [vmem:[#allocation2 + $0x48] ss:$12 sps:$4 sm:$0xff]   ;;  %v4795_v28 = vld [vmem:[#allocation2 + $0x64] ss:$12 sps:$4 sm:$0xff]   ;;  %v4797_v59 = vld [vmem:[#allocation2 + $0x60] ss:$12 sps:$4 sm:$0xff]  }
  0xf0   : > { %4608 = vmatprep.mubr.bf16.mxu0 %v6329_v6  ;;  %2117 = vmatmul.mubr.bf16.gmra.mxu1 %v4106_v29  ;;  %v4800_v52 = vld [vmem:[#allocation2 + $0x7c] ss:$12 sps:$4 sm:$0xff]   ;;  %v4802_v53 = vld [vmem:[#allocation2 + $0x78] ss:$12 sps:$4 sm:$0xff]   ;;  %v4803_v57 = vld [vmem:[#allocation2 + $0x94] ss:$12 sps:$4 sm:$0xff]  }
  0xf1   : > { %2124 = vmatprep.mubr.bf16.mxu1 %v4110_v48  ;;  %v4805_v6 = vld [vmem:[#allocation2 + $0x90] ss:$12 sps:$4 sm:$0xff]  }
  0xf4   : > { %v4336_v42 = vpop.f32.mrf.mxu0 }
  0xf5   : > { %v4808_v48 = vld [vmem:[#allocation2 + $0xac] ss:$12 sps:$4 sm:$0xff]  }
  0xf6   : > { %v4337_v40 = vpop.f32.mrf.mxu0 }
  0xf7   : > { %4609 = vmatmul.mubr.bf16.vlgmr.msra.gmra.mxu0 %v6330_v31  ;;  %v4810_v31 = vld [vmem:[#allocation2 + $0xa8] ss:$12 sps:$4 sm:$0xff]  }
  0xf8   : > { %4481 = vmatpush3.bf16.msra.mxu0 %v4756_v26  ;;  %4612 = vmatprep.mubr.bf16.mxu0 %v6331_v46  ;;  %v4339_v5 = vpop.f32.mrf.mxu0 }
  0xf9   : > { %4482 = vmatprep.subr.bf16.mxu0 %v4758_v32  ;;  %2125 = vmatmul.mubr.bf16.gmra.mxu1 %v4109_v55 }
  0xfa   : > { %2132 = vmatprep.mubr.bf16.mxu1 %v4113_v36  ;;  %v4340_v51 = vpop.f32.mrf.mxu0 }
  0xfc   : > { %4483 = vmatpush3.bf16.msra.mxu0 %v4759_v61 }
  0xfd   : > { %4484 = vmatprep.subr.bf16.mxu0 %v4761_v54 }
  0xff   : > { %4613 = vmatmul.mubr.bf16.gmra.mxu0 %v6332_v60  ;;  %v4836_v60 = vmov 0  }
 0x100   : > { %4485 = vmatpush3.bf16.msra.mxu0 %v4762_v22  ;;  %4616 = vmatprep.mubr.bf16.mxu0 %v6333_v23  ;;  %3539 = vst [vmem:[%s6134_s6] sm:$0xf] %v4836_v60  ;;  %3540 = vst [vmem:[%s6134_s6 + $0x4] sm:$0xf] %v4836_v60 }
 0x101   : > { %4486 = vmatprep.subr.bf16.mxu0 %v4764_v19  ;;  %2133 = vmatmul.mubr.bf16.gmra.mxu1 %v4112_v10  ;;  %3541 = vst [vmem:[%s6134_s6 + $0x8] sm:$0xf] %v4836_v60  ;;  %3542 = vst [vmem:[%s6134_s6 + $0xc] sm:$0xf] %v4836_v60 }
 0x102   : > { %4640 = vmatprep.mubr.bf16.mxu1 %v4782_v21  ;;  %3558 = vst [vmem:[%s6134_s6 + $0x4c] sm:$0xf] %v4836_v60  ;;  %3559 = vst [vmem:[%s6134_s6 + $0x50] sm:$0xf] %v4836_v60 }
 0x103   : > { %3560 = vst [vmem:[%s6134_s6 + $0x54] sm:$0xf] %v4836_v60  ;;  %3543 = vst [vmem:[%s6134_s6 + $0x10] sm:$0xf] %v4836_v60 }
 0x104   : > { %4487 = vmatpush3.bf16.msra.mxu0 %v4765_v12  ;;  %3544 = vst [vmem:[%s6134_s6 + $0x14] sm:$0xf] %v4836_v60  ;;  %3545 = vst [vmem:[%s6134_s6 + $0x18] sm:$0xf] %v4836_v60 }
 0x105   : > { %4488 = vmatprep.subr.bf16.mxu0 %v4767_v33  ;;  %3546 = vst [vmem:[%s6134_s6 + $0x1c] sm:$0xf] %v4836_v60  ;;  %3547 = vst [vmem:[%s6134_s6 + $0x20] sm:$0xf] %v4836_v60 }
 0x106   : > { %3548 = vst [vmem:[%s6134_s6 + $0x24] sm:$0xf] %v4836_v60  ;;  %3549 = vst [vmem:[%s6134_s6 + $0x28] sm:$0xf] %v4836_v60 }
 0x107   : > { %4617 = vmatmul.mubr.bf16.gmra.mxu0 %v6334_v13  ;;  %3550 = vst [vmem:[%s6134_s6 + $0x2c] sm:$0xf] %v4836_v60  ;;  %3551 = vst [vmem:[%s6134_s6 + $0x30] sm:$0xf] %v4836_v60 }
 0x108   : > { %4489 = vmatpush3.bf16.msra.mxu0 %v4768_v30  ;;  %4620 = vmatprep.mubr.bf16.mxu0 %v4111_v37  ;;  %v4338_v37 = vadd.f32 %v4337_v40, %v4336_v42  ;;  %3552 = vst [vmem:[%s6134_s6 + $0x34] sm:$0xf] %v4836_v60  ;;  %3553 = vst [vmem:[%s6134_s6 + $0x38] sm:$0xf] %v4836_v60 }
 0x109   : > { %4490 = vmatprep.subr.bf16.mxu0 %v4770_v62  ;;  %4641 = vmatmul.mubr.bf16.vlgmr.msra.gmra.mxu1 %v4783_v49  ;;  %3554 = vst [vmem:[%s6134_s6 + $0x3c] sm:$0xf] %v4836_v60  ;;  %3555 = vst [vmem:[%s6134_s6 + $0x40] sm:$0xf] %v4836_v60  ;;  %v6160_v49 = vrot.slane %v4836_v60, 7 }
 0x10a   : > { %4644 = vmatprep.mubr.bf16.mxu1 %v4790_v56  ;;  %3556 = vst [vmem:[%s6134_s6 + $0x44] sm:$0xf] %v4836_v60  ;;  %3557 = vst [vmem:[%s6134_s6 + $0x48] sm:$0xf] %v4836_v60 }
 0x10b   : > { %v6164_v56 = vrot.slane %v6160_v49, 4 }
 0x10c   : > { %4491 = vmatpush3.bf16.msra.mxu0 %v4771_v39 }
 0x10d   : > { %4492 = vmatprep.subr.bf16.mxu0 %v4773_v9 }
 0x10f   : > { %4621 = vmatmul.mubr.bf16.gmra.mxu0 %v4114_v45  ;;  %v4787_v45 = vld [vmem:[#allocation2 + $0x34] ss:$12 sps:$4 sm:$0xff]  }
 0x110   : > { %4493 = vmatpush3.bf16.msra.mxu0 %v4774_v20  ;;  %3081 = vmatprep.mubr.bf16.mxu0 %v4781_v38  ;;  %v4578_v17 = vpop.f32.mrf.mxu1 }
 0x111   : > { %4494 = vmatprep.subr.bf16.mxu0 %v4776_v63  ;;  %4645 = vmatmul.mubr.bf16.gmra.mxu1 %v4791_v44  ;;  %v3795_v9 = vld [vmem:[%s6134_s6 + $0x48] sm:$0x1] }
 0x112   : > { %4648 = vmatprep.mubr.bf16.mxu1 %v4798_v24  ;;  %v1709_v25 = vpop.f32.mrf.mxu1  ;;  %v3796_v42 = vsel %vm3794_vm5, %v6164_v56, %v3795_v9 }
 0x113   : > { %v6124_v0 = vadd.f32 %v4338_v37, %v1709_v25  ;;  %3797 = vst [vmem:[%s6134_s6 + $0x48] sm:$0x1] %v3796_v42 }
 0x114   : > { %4495 = vmatpush3.bf16.msra.mxu0 %v4777_v8  ;;  %v4579_v11 = vpop.f32.mrf.mxu1 }
 0x116   : > { %v1712_v47 = vpop.f32.mrf.mxu1 }
 0x117   : > { %3082 = vmatmul.mubr.bf16.vlgmr.msra.gmra.mxu0 %v4779_v43 }
 0x118   : > { %3089 = vmatprep.mubr.bf16.mxu0 %v4784_v35 }
 0x119   : > { %4649 = vmatmul.mubr.bf16.gmra.mxu1 %v4799_v50 }
 0x11a   : > { %4652 = vmatprep.mubr.bf16.mxu1 %v4806_v34 }
 0x11b   : > { %v4342_v3 = vpop.f32.mrf.mxu0 }
 0x11d   : > { %v4343_v2 = vpop.f32.mrf.mxu0 }
 0x11e   : > { %v4344_v15 = vadd.f32 %v4343_v2, %v4342_v3 }
 0x11f   : > { %3090 = vmatmul.mubr.bf16.gmra.mxu0 %v4786_v1  ;;  %v4345_v41 = vpop.f32.mrf.mxu0 }
 0x120   : > { %3097 = vmatprep.mubr.bf16.mxu0 %v4787_v45  ;;  %v6126_v27 = vadd.f32 %v4578_v17, %v4344_v15 }
 0x121   : > { %4653 = vmatmul.mubr.bf16.gmra.mxu1 %v4807_v14  ;;  %v4346_v18 = vpop.f32.mrf.mxu0 }
 0x127   : > { %3098 = vmatmul.mubr.bf16.gmra.mxu0 %v4789_v7 }
 0x128   : > { %3105 = vmatprep.mubr.bf16.mxu0 %v4792_v16 }
 0x12f   : > { %3106 = vmatmul.mubr.bf16.gmra.mxu0 %v4794_v4 }
 0x130   : > { %3113 = vmatprep.mubr.bf16.mxu0 %v4795_v28  ;;  %v4582_v58 = vpop.f32.mrf.mxu1 }
 0x132   : > { %v1725_v29 = vpop.f32.mrf.mxu1 }
 0x134   : > { %v4583_v26 = vpop.f32.mrf.mxu1 }
 0x136   : > { %v1728_v32 = vpop.f32.mrf.mxu1 }
 0x137   : > { %3114 = vmatmul.mubr.bf16.gmra.mxu0 %v4797_v59 }
 0x138   : > { %3121 = vmatprep.mubr.bf16.mxu0 %v4800_v52 }
 0x13e   : > { %v4348_v55 = vpop.f32.mrf.mxu0 }
 0x13f   : > { %3122 = vmatmul.mubr.bf16.gmra.mxu0 %v4802_v53 }
 0x140   : > { %3129 = vmatprep.mubr.bf16.mxu0 %v4803_v57  ;;  %v4349_v61 = vpop.f32.mrf.mxu0 }
 0x141   : > { %v4350_v46 = vadd.f32 %v4349_v61, %v4348_v55 }
 0x142   : > { %v4351_v36 = vpop.f32.mrf.mxu0 }
 0x143   : > { %v6128_v54 = vadd.f32 %v4350_v46, %v1725_v29 }
 0x144   : > { %v4352_v22 = vpop.f32.mrf.mxu0 }
 0x147   : > { %3130 = vmatmul.mubr.bf16.gmra.mxu0 %v4805_v6 }
 0x148   : > { %3137 = vmatprep.mubr.bf16.mxu0 %v4808_v48 }
 0x14f   : > { %3138 = vmatmul.mubr.bf16.gmra.mxu0 %v4810_v31 }
 0x155   : > { %v6136_v19 = vpop.f32.mrf.mxu1 }
 0x157   : > { %v1741_v10 = vpop.f32.mrf.mxu1 }
 0x159   : > { %v4587_v12 = vpop.f32.mrf.mxu1 }
 0x15b   : > { %v1744_v23 = vpop.f32.mrf.mxu1 }
 0x162   : > { %v4354_v21 = vpop.f32.mrf.mxu0 }
 0x164   : > { %v4355_v33 = vpop.f32.mrf.mxu0 }
 0x165   : > { %v4356_v30 = vadd.f32 %v4355_v33, %v4354_v21 }
 0x166   : > { %v4357_v62 = vpop.f32.mrf.mxu0 }
 0x167   : > { %v1734_v13 = vadd.f32 %v4582_v58, %v4356_v30 }
 0x168   : > { %v4358_v39 = vpop.f32.mrf.mxu0 }
 0x179   : > { %v4590_v20 = vpop.f32.mrf.mxu1 }
 0x17b   : > { %v1757_v38 = vpop.f32.mrf.mxu1 }
 0x17d   : > { %v4591_v63 = vpop.f32.mrf.mxu1 }
 0x17f   : > { %v1760_v40 = vpop.f32.mrf.mxu1 }
 0x182   : > { %v4416_v37 = vpop.f32.mrf.mxu1 }
 0x184   : > { %v4417_v44 = vpop.f32.mrf.mxu1 }
 0x185   : > { %v4418_v5 = vadd.f32 %v4417_v44, %v4416_v37 }
 0x186   : > { %v4419_v24 = vpop.f32.mrf.mxu1 }
 0x187   : > { %v6170_v51 = vadd.f32 %v4418_v5, %v6124_v0 }
 0x188   : > { %v4420_v35 = vpop.f32.mrf.mxu1 }
 0x189   : > { %v4360_v8 = vpop.f32.mrf.mxu0 }
 0x18b   : > { %v4361_v43 = vpop.f32.mrf.mxu0 }
 0x18c   : > { %v4362_v50 = vadd.f32 %v4361_v43, %v4360_v8 }
 0x18d   : > { %v4363_v34 = vpop.f32.mrf.mxu0 }
 0x18e   : > { %v4422_v1 = vpop.f32.mrf.mxu1  ;;  %v1742_v45 = vadd.f32 %v4362_v50, %v1741_v10 }
 0x18f   : > { %v4364_v14 = vpop.f32.mrf.mxu0 }
 0x190   : > { %v4423_v7 = vpop.f32.mrf.mxu1 }
 0x191   : > { %v4424_v16 = vadd.f32 %v4423_v7, %v4422_v1 }
 0x192   : > { %v4425_v17 = vpop.f32.mrf.mxu1 }
 0x193   : > { %v6173_v25 = vadd.f32 %v4424_v16, %v6126_v27 }
 0x194   : > { %v4426_v47 = vpop.f32.mrf.mxu1 }
 0x197   : > { %v4366_v11 = vpop.f32.mrf.mxu0 }
 0x198   : > { %v4428_v28 = vpop.f32.mrf.mxu1 }
 0x199   : > { %v4367_v4 = vpop.f32.mrf.mxu0 }
 0x19a   : > { %v4368_v3 = vadd.f32 %v4367_v4, %v4366_v11  ;;  %v4429_v2 = vpop.f32.mrf.mxu1 }
 0x19b   : > { %v4369_v0 = vpop.f32.mrf.mxu0  ;;  %v4430_v41 = vadd.f32 %v4429_v2, %v4428_v28 }
 0x19c   : > { %v1750_v15 = vadd.f32 %v6136_v19, %v4368_v3  ;;  %v4431_v18 = vpop.f32.mrf.mxu1 }
 0x19d   : > { %v4370_v59 = vpop.f32.mrf.mxu0  ;;  %v6177_v52 = vadd.f32 %v4430_v41, %v6128_v54 }
 0x19e   : > { %v4432_v53 = vpop.f32.mrf.mxu1 }
 0x1a0   : > { %v4434_v57 = vpop.f32.mrf.mxu1 }
 0x1a2   : > { %v4435_v27 = vpop.f32.mrf.mxu1 }
 0x1a3   : > { %v4436_v6 = vadd.f32 %v4435_v27, %v4434_v57 }
 0x1a4   : > { %v4372_v58 = vpop.f32.mrf.mxu0  ;;  %v4437_v26 = vpop.f32.mrf.mxu1 }
 0x1a5   : > { %v6179_v31 = vadd.f32 %v4436_v6, %v1734_v13 }
 0x1a6   : > { %v4373_v29 = vpop.f32.mrf.mxu0  ;;  %v4438_v61 = vpop.f32.mrf.mxu1 }
 0x1a7   : > { %v4374_v48 = vadd.f32 %v4373_v29, %v4372_v58 }
 0x1a8   : > { %v4375_v32 = vpop.f32.mrf.mxu0  ;;  %v4440_v36 = vpop.f32.mrf.mxu1 }
 0x1a9   : > { %v1758_v55 = vadd.f32 %v4374_v48, %v1757_v38 }
 0x1aa   : > { %v4376_v46 = vpop.f32.mrf.mxu0  ;;  %v4441_v22 = vpop.f32.mrf.mxu1 }
 0x1ab   : > { %v4442_v19 = vadd.f32 %v4441_v22, %v4440_v36 }
 0x1ac   : > { %v4443_v54 = vpop.f32.mrf.mxu1 }
 0x1ad   : > { %v6181_v10 = vadd.f32 %v4442_v19, %v1742_v45  ;;  %v6207_v54 = vld [vmem:[%s6318_s2] ss:$0 sm:$0xff] }
 0x1ae   : > { %v4444_v23 = vpop.f32.mrf.mxu1 }
 0x1af   : > { %v4378_v60 = vpop.f32.mrf.mxu0 }
 0x1b0   : > { %v4446_v30 = vpop.f32.mrf.mxu1 }
 0x1b1   : > { %v4379_v12 = vpop.f32.mrf.mxu0 }
 0x1b2   : > { %v4380_v21 = vadd.f32 %v4379_v12, %v4378_v60  ;;  %v4447_v9 = vpop.f32.mrf.mxu1 }
 0x1b3   : > { %v4381_v33 = vpop.f32.mrf.mxu0  ;;  %v4448_v13 = vadd.f32 %v4447_v9, %v4446_v30 }
 0x1b4   : > { %v1766_v62 = vadd.f32 %v4590_v20, %v4380_v21  ;;  %v4449_v38 = vpop.f32.mrf.mxu1 }
 0x1b5   : > { %v4382_v39 = vpop.f32.mrf.mxu0  ;;  %v6183_v63 = vadd.f32 %v4448_v13, %v1750_v15 }
 0x1b6   : > { %v4450_v37 = vpop.f32.mrf.mxu1 }
 0x1b7   : > { %v4610_v42 = vpop.f32.mrf.mxu0 }
 0x1b9   : > { %v2175_v40 = vpop.f32.mrf.mxu0  ;;  %v4452_v5 = vpop.f32.mrf.mxu1 }
 0x1ba   : > { %v2176_v19 = vadd.f32 %v2175_v40, %v6170_v51  ;;  %v2184_v40 = vadd.f32 %v4610_v42, %v6173_v25 }
 0x1bb   : > { %v4611_v44 = vpop.f32.mrf.mxu0  ;;  %v4453_v24 = vpop.f32.mrf.mxu1 }
 0x1bc   : > { %v4454_v43 = vadd.f32 %v4453_v24, %v4452_v5 }
 0x1bd   : > { %v2178_v8 = vpop.f32.mrf.mxu0  ;;  %v4455_v50 = vpop.f32.mrf.mxu1 }
 0x1be   : > { %v6187_v34 = vadd.f32 %v4454_v43, %v1758_v55 }
 0x1bf   : > { %v6185_v35 = vpop.f32.mrf.mxu0  ;;  %v4456_v1 = vpop.f32.mrf.mxu1 }
 0x1c1   : > { %v6189_v20 = vpop.f32.mrf.mxu0  ;;  %v4458_v14 = vpop.f32.mrf.mxu1 }
 0x1c3   : > { %v4615_v45 = vpop.f32.mrf.mxu0  ;;  %v4459_v16 = vpop.f32.mrf.mxu1 }
 0x1c4   : > { %v4460_v17 = vadd.f32 %v4459_v16, %v4458_v14  ;;  %v3775_v16 = vld [vmem:[%s6134_s6 + $0x8] sm:$0xf] }
 0x1c5   : > { %v2194_v7 = vpop.f32.mrf.mxu0  ;;  %v4461_v47 = vpop.f32.mrf.mxu1 }
 0x1c6   : > { %v2135_v4 = vadd.f32 %v4460_v17, %v1766_v62 }
 0x1c7   : > { %v6191_v11 = vpop.f32.mrf.mxu0  ;;  %v4462_v3 = vpop.f32.mrf.mxu1 }
 0x1c9   : > { %v6193_v28 = vpop.f32.mrf.mxu0  ;;  %v4642_v2 = vpop.f32.mrf.mxu1 }
 0x1cb   : > { %v4619_v0 = vpop.f32.mrf.mxu0  ;;  %v3180_v41 = vpop.f32.mrf.mxu1 }
 0x1cd   : > { %v2210_v15 = vpop.f32.mrf.mxu0  ;;  %v4643_v18 = vpop.f32.mrf.mxu1 }
 0x1ce   : > { %v2192_v15 = vadd.f32 %v6189_v20, %v6177_v52 }
 0x1cf   : > { %v4622_v59 = vpop.f32.mrf.mxu0  ;;  %v3183_v58 = vpop.f32.mrf.mxu1 }
 0x1d0   : > { %v6195_v53 = vadd.f32 %v4622_v59, %v2135_v4 }
 0x1d1   : > { %v6197_v57 = vpop.f32.mrf.mxu0  ;;  %v6199_v29 = vpop.f32.mrf.mxu1 }
 0x1d3   : > { %v4623_v27 = vpop.f32.mrf.mxu0  ;;  %v3196_v48 = vpop.f32.mrf.mxu1 }
 0x1d5   : > { %v2226_v6 = vpop.f32.mrf.mxu0  ;;  %v4647_v32 = vpop.f32.mrf.mxu1 }
 0x1d7   : > { %v4496_v26 = vpop.f32.mrf.mxu0  ;;  %v3199_v61 = vpop.f32.mrf.mxu1 }
 0x1d9   : > { %v4497_v55 = vpop.f32.mrf.mxu0  ;;  %v6201_v22 = vpop.f32.mrf.mxu1 }
 0x1da   : > { %v4498_v46 = vadd.f32 %v4497_v55, %v4496_v26 }
 0x1db   : > { %v4499_v36 = vpop.f32.mrf.mxu0  ;;  %v6209_v23 = vpop.f32.mrf.mxu1 }
 0x1dc   : > { %v3181_v60 = vadd.f32 %v4498_v46, %v3180_v41 }
 0x1dd   : > { %v4500_v12 = vpop.f32.mrf.mxu0  ;;  %v4651_v30 = vpop.f32.mrf.mxu1 }
 0x1de   : > { %v3243_v21 = vadd.f32 %v3181_v60, %v2176_v19 }
 0x1df   : > { %v4502_v33 = vpop.f32.mrf.mxu0  ;;  %v3215_v9 = vpop.f32.mrf.mxu1 }
 0x1e0   : > { %v3266_v62 = vadd.f32 %v6207_v54, %v3243_v21 }
 0x1e1   : > { %v4503_v39 = vpop.f32.mrf.mxu0  ;;  %v6212_v51 = vpop.f32.mrf.mxu1 }
 0x1e2   : > { %v3282_v13 = vmax.f32 %v3266_v62, 0.0  ;;  %v4504_v38 = vadd.f32 %v4503_v39, %v4502_v33 }
 0x1e3   : > { %v4505_v37 = vpop.f32.mrf.mxu0  ;;  %v6215_v24 = vpop.f32.mrf.mxu1 }
 0x1e4   : > { %v4304_v44 = vpack.c.bf16 %v3282_v13, %v3282_v13  ;;  %v3189_v5 = vadd.f32 %v4642_v2, %v4504_v38 }
 0x1e5   : > { %v4506_v8 = vpop.f32.mrf.mxu0  ;;  %v4655_v45 = vpop.f32.mrf.mxu1 }
 0x1e6   : > { %v3613_v43 = vshrl.u32 %v4304_v44, 16  ;;  %v3245_v50 = vadd.f32 %v3189_v5, %v2184_v40  ;;  %v3616_v25 = vshll.u32 %v4304_v44, 16 }
 0x1e7   : > { %v4508_v1 = vpop.f32.mrf.mxu0  ;;  %v3231_v47 = vpop.f32.mrf.mxu1 }
 0x1e8   : > { %v3615_v7 = vrot.slane %v3613_v43, 7  ;;  %v3268_v42 = vadd.f32 %v6207_v54, %v3245_v50 }
 0x1e9   : > { %v4509_v17 = vpop.f32.mrf.mxu0 }
 0x1ea   : > { %v3618_v4 = vor.u32 %v3616_v25, %v3615_v7  ;;  %v3619_v3 = vrot.slane %v3615_v7, 4  ;;  %v3284_v0 = vmax.f32 %v3268_v42, 0.0  ;;  %v4510_v2 = vadd.f32 %v4509_v17, %v4508_v1 }
 0x1eb   : > { %v4511_v41 = vpop.f32.mrf.mxu0 }
 0x1ec   : > { %v3627_v59 = vsel %vm6218_vm9, %v3619_v3, %v6160_v49  ;;  %v3776_v18 = vsel %vm3774_vm10, %v3618_v4, %v3775_v16  ;;  %v4306_v58 = vpack.c.bf16 %v3284_v0, %v3284_v0  ;;  %v3197_v27 = vadd.f32 %v4510_v2, %v3196_v48 }
 0x1ed   : > { %3777 = vst [vmem:[%s6134_s6 + $0x8] sm:$0xf] %v3776_v18  ;;  %3778 = vst [vmem:[%s6134_s6 + $0xc] sm:$0xf] %v3627_v59  ;;  %v4512_v6 = vpop.f32.mrf.mxu0  ;;  %v2200_v48 = vadd.f32 %v6185_v35, %v6179_v31 }
 0x1ee   : > { %v3630_v26 = vshrl.u32 %v4306_v58, 16  ;;  %v3247_v32 = vadd.f32 %v3197_v27, %v2192_v15  ;;  %v3633_v46 = vshll.u32 %v4306_v58, 16 }
 0x1ef   : > { %v4514_v55 = vpop.f32.mrf.mxu0 }
 0x1f0   : > { %v3632_v61 = vrot.slane %v3630_v26, 7  ;;  %v3270_v52 = vadd.f32 %v6207_v54, %v3247_v32 }
 0x1f1   : > { %v4515_v20 = vpop.f32.mrf.mxu0 }
 0x1f2   : > { %v3635_v36 = vor.u32 %v3633_v46, %v3632_v61  ;;  %v3637_v19 = vrot.slane %v3632_v61, 4  ;;  %v3286_v60 = vmax.f32 %v3270_v52, 0.0  ;;  %v4516_v12 = vadd.f32 %v4515_v20, %v4514_v55 }
 0x1f3   : > { %v4517_v21 = vpop.f32.mrf.mxu0 }
 0x1f4   : > { %v3636_v33 = vsel %vm6218_vm9, %v6164_v56, %v3635_v36  ;;  %v3645_v30 = vsel %vm6218_vm9, %v3637_v19, %v6160_v49  ;;  %v4308_v62 = vpack.c.bf16 %v3286_v60, %v3286_v60  ;;  %v3205_v39 = vadd.f32 %v6199_v29, %v4516_v12 }
 0x1f5   : > { %3779 = vst [vmem:[%s6134_s6 + $0x10] sm:$0xf] %v3636_v33  ;;  %3780 = vst [vmem:[%s6134_s6 + $0x14] sm:$0xf] %v3645_v30  ;;  %v4518_v9 = vpop.f32.mrf.mxu0  ;;  %v2208_v29 = vadd.f32 %v6193_v28, %v6181_v10 }
 0x1f6   : > { %v3648_v13 = vshrl.u32 %v4308_v62, 16  ;;  %v3249_v38 = vadd.f32 %v3205_v39, %v2200_v48  ;;  %v3651_v35 = vshll.u32 %v4308_v62, 16 }
 0x1f7   : > { %v4520_v37 = vpop.f32.mrf.mxu0 }
 0x1f8   : > { %v3650_v31 = vrot.slane %v3648_v13, 7  ;;  %v3272_v40 = vadd.f32 %v6207_v54, %v3249_v38 }
 0x1f9   : > { %v4521_v44 = vpop.f32.mrf.mxu0 }
 0x1fa   : > { %v3653_v5 = vor.u32 %v3651_v35, %v3650_v31  ;;  %v3655_v8 = vrot.slane %v3650_v31, 4  ;;  %v3288_v43 = vmax.f32 %v3272_v40, 0.0  ;;  %v4522_v50 = vadd.f32 %v4521_v44, %v4520_v37 }
 0x1fb   : > { %v4523_v1 = vpop.f32.mrf.mxu0 }
 0x1fc   : > { %v3654_v45 = vsel %vm6218_vm9, %v6164_v56, %v3653_v5  ;;  %v3663_v7 = vsel %vm6218_vm9, %v3655_v8, %v6160_v49  ;;  %v4310_v25 = vpack.c.bf16 %v3288_v43, %v3288_v43  ;;  %v3213_v42 = vadd.f32 %v4522_v50, %v6209_v23 }
 0x1fd   : > { %3781 = vst [vmem:[%s6134_s6 + $0x18] sm:$0xf] %v3654_v45  ;;  %3782 = vst [vmem:[%s6134_s6 + $0x1c] sm:$0xf] %v3663_v7  ;;  %v4524_v16 = vpop.f32.mrf.mxu0  ;;  %v2216_v23 = vadd.f32 %v6191_v11, %v6183_v63 }
 0x1fe   : > { %v3666_v17 = vshrl.u32 %v4310_v25, 16  ;;  %v3251_v47 = vadd.f32 %v3213_v42, %v2208_v29  ;;  %v3669_v28 = vshll.u32 %v4310_v25, 16 }
 0x1ff   : > { %v4526_v4 = vpop.f32.mrf.mxu0 }
 0x200   : > { %v3668_v10 = vrot.slane %v3666_v17, 7  ;;  %v3274_v3 = vadd.f32 %v6207_v54, %v3251_v47 }
 0x201   : > { %v4527_v0 = vpop.f32.mrf.mxu0 }
 0x202   : > { %v3671_v2 = vor.u32 %v3669_v28, %v3668_v10  ;;  %v3673_v15 = vrot.slane %v3668_v10, 4  ;;  %v3290_v41 = vmax.f32 %v3274_v3, 0.0  ;;  %v4528_v59 = vadd.f32 %v4527_v0, %v4526_v4 }
 0x203   : > { %v4529_v18 = vpop.f32.mrf.mxu0 }
 0x204   : > { %v3672_v58 = vsel %vm6218_vm9, %v6164_v56, %v3671_v2  ;;  %v3681_v27 = vsel %vm6218_vm9, %v3673_v15, %v6160_v49  ;;  %v4312_v6 = vpack.c.bf16 %v3290_v41, %v3290_v41  ;;  %v3221_v26 = vadd.f32 %v6201_v22, %v4528_v59 }
 0x205   : > { %3783 = vst [vmem:[%s6134_s6 + $0x20] sm:$0xf] %v3672_v58  ;;  %3784 = vst [vmem:[%s6134_s6 + $0x24] sm:$0xf] %v3681_v27  ;;  %v4530_v32 = vpop.f32.mrf.mxu0  ;;  %v2224_v22 = vadd.f32 %v6197_v57, %v6187_v34 }
 0x206   : > { %v3684_v55 = vshrl.u32 %v4312_v6, 16  ;;  %v3253_v61 = vadd.f32 %v3221_v26, %v2216_v23  ;;  %v3687_v11 = vshll.u32 %v4312_v6, 16 }
 0x207   : > { %v4532_v46 = vpop.f32.mrf.mxu0 }
 0x208   : > { %v3686_v63 = vrot.slane %v3684_v55, 7  ;;  %v3276_v52 = vadd.f32 %v6207_v54, %v3253_v61 }
 0x209   : > { %v4533_v20 = vpop.f32.mrf.mxu0 }
 0x20a   : > { %v3689_v36 = vor.u32 %v3687_v11, %v3686_v63  ;;  %v3691_v19 = vrot.slane %v3686_v63, 4  ;;  %v3292_v60 = vmax.f32 %v3276_v52, 0.0  ;;  %v4534_v12 = vadd.f32 %v4533_v20, %v4532_v46 }
 0x20b   : > { %v4535_v48 = vpop.f32.mrf.mxu0 }
 0x20c   : > { %v3690_v21 = vsel %vm6218_vm9, %v6164_v56, %v3689_v36  ;;  %v3699_v33 = vsel %vm6218_vm9, %v3691_v19, %v6160_v49  ;;  %v4314_v30 = vpack.c.bf16 %v3292_v60, %v3292_v60  ;;  %v3229_v62 = vadd.f32 %v4534_v12, %v6215_v24 }
 0x20d   : > { %3785 = vst [vmem:[%s6134_s6 + $0x28] sm:$0xf] %v3690_v21  ;;  %3786 = vst [vmem:[%s6134_s6 + $0x2c] sm:$0xf] %v3699_v33  ;;  %v4536_v39 = vpop.f32.mrf.mxu0 }
 0x20e   : > { %v3702_v9 = vshrl.u32 %v4314_v30, 16  ;;  %v3255_v13 = vadd.f32 %v3229_v62, %v2224_v22  ;;  %v3705_v38 = vshll.u32 %v4314_v30, 16 }
 0x20f   : > { %v4538_v34 = vpop.f32.mrf.mxu0 }
 0x210   : > { %v3704_v57 = vrot.slane %v3702_v9, 7  ;;  %v3278_v37 = vadd.f32 %v6207_v54, %v3255_v13 }
 0x211   : > { %v4539_v31 = vpop.f32.mrf.mxu0 }
 0x212   : > { %v3707_v35 = vor.u32 %v3705_v38, %v3704_v57  ;;  %v3709_v40 = vrot.slane %v3704_v57, 4  ;;  %v3294_v44 = vmax.f32 %v3278_v37, 0.0  ;;  %v4540_v5 = vadd.f32 %v4539_v31, %v4538_v34 }
 0x213   : > { %v4541_v8 = vpop.f32.mrf.mxu0 }
 0x214   : > { %v3708_v24 = vsel %vm6218_vm9, %v6164_v56, %v3707_v35  ;;  %v3717_v43 = vsel %vm6218_vm9, %v3709_v40, %v6160_v49  ;;  %v4316_v50 = vpack.c.bf16 %v3294_v44, %v3294_v44  ;;  %v3237_v29 = vadd.f32 %v6212_v51, %v4540_v5 }
 0x215   : > { %3787 = vst [vmem:[%s6134_s6 + $0x30] sm:$0xf] %v3708_v24  ;;  %3788 = vst [vmem:[%s6134_s6 + $0x34] sm:$0xf] %v3717_v43  ;;  %v4542_v1 = vpop.f32.mrf.mxu0 }
 0x216   : > { %v3720_v45 = vshrl.u32 %v4316_v50, 16  ;;  %v3257_v7 = vadd.f32 %v3237_v29, %v6195_v53  ;;  %v3723_v42 = vshll.u32 %v4316_v50, 16 }
 0x218   : > { %v3722_v25 = vrot.slane %v3720_v45, 7  ;;  %v3280_v16 = vadd.f32 %v6207_v54, %v3257_v7 }
 0x21a   : > { %v3725_v17 = vor.u32 %v3723_v42, %v3722_v25  ;;  %v3727_v47 = vrot.slane %v3722_v25, 4  ;;  %v3296_v4 = vmax.f32 %v3280_v16, 0.0 }
 0x21c   : > { %v3726_v51 = vsel %vm6218_vm9, %v6164_v56, %v3725_v17  ;;  %v3735_v10 = vsel %vm6218_vm9, %v3727_v47, %v6160_v49  ;;  %v4318_v28 = vpack.c.bf16 %v3296_v4, %v3296_v4 }
 0x21d   : > { %3789 = vst [vmem:[%s6134_s6 + $0x38] sm:$0xf] %v3726_v51  ;;  %3790 = vst [vmem:[%s6134_s6 + $0x3c] sm:$0xf] %v3735_v10 }
 0x21e   : > { %v3738_v53 = vshrl.u32 %v4318_v28, 16  ;;  %v3741_v0 = vshll.u32 %v4318_v28, 16 }
 0x220   : > { %v3740_v3 = vrot.slane %v3738_v53, 7 }
 0x222   : > { %v3743_v54 = vor.u32 %v3741_v0, %v3740_v3  ;;  %v3745_v2 = vrot.slane %v3740_v3, 4 }
 0x224   : > { %v3744_v15 = vsel %vm6218_vm9, %v6164_v56, %v3743_v54  ;;  %v3753_v41 = vsel %vm6218_vm9, %v3745_v2, %v6160_v49 }
 0x225   : > { %3791 = vst [vmem:[%s6134_s6 + $0x40] sm:$0xf] %v3744_v15  ;;  %3792 = vst [vmem:[%s6134_s6 + $0x44] sm:$0xf] %v3753_v41 }
 0x226 PF: > { %s13_s14 = sadd.s32 1, %s4834_s14   ;;  %s6337_s12 = smov %s4830_s13 }
 0x227   : > { %p10_p5 = scmp.ge.s32.totalorder %s13_s14, 4   ;;  %s6338_s13 = smov %s6340_s15 }
 0x229   :  { %12 = sbr.rel (!%p10_p5) target bundleno = 2 (0x2), region = 73 }

</bundles_post_ra>
